<compile_context>
chip_gen: v6e
topology: v6e:2x2x1
jax: 0.10.0
libtpu: 0.0.40
codegen_flags: <defaults>
</compile_context>

<pallas_src>
import functools
import math

import jax
import jax.numpy as jnp
from jax.experimental import pallas as pl
from jax.experimental.pallas import tpu as pltpu

LANE = 128
SUB = 16  # sublane-tile multiple used for row counts (bf16-friendly, makes reshapes cheap)


def _round_up(x, m):
    return ((x + m - 1) // m) * m


def _conv_row_plan(in_h, in_w, kernel_sizes):
    """Per-conv-layer output row counts on the flattened full HxW grid.

    rows[l] = rows produced by conv layer l (rows[0] is also the kernel-input row count,
    since conv0 is im2col'd in the wrapper).  Layer l >= 1 slices windows of length rows[l]
    at offsets up to (k_l-1)*(W+1) from rows[l-1], so rows[l-1] >= rows[l] + (k_l-1)*(W+1).
    """
    S = in_h * in_w
    n = len(kernel_sizes)
    rows = [0] * n
    rows[-1] = _round_up(S, SUB)
    for l in range(n - 1, 0, -1):
        d = (kernel_sizes[l] - 1) * (in_w + 1)
        rows[l - 1] = _round_up(rows[l] + d, SUB)
    return tuple(rows)


# ----------------------------------------------------------------------------
# Fused forward kernel: conv stack + FC head + sigmoid, all in VMEM.
# refs = (x_col, conv_w0, conv_b0, ..., fc_w0, fc_b0, ..., out)
# ----------------------------------------------------------------------------
def _ecg12_fused_kernel(*refs, grid_w, kernel_sizes, rows, n_conv, n_fc):
    x_ref = refs[0]
    conv_refs = refs[1:1 + 2 * n_conv]
    fc_refs = refs[1 + 2 * n_conv:1 + 2 * n_conv + 2 * n_fc]
    o_ref = refs[1 + 2 * n_conv + 2 * n_fc]
    W = grid_w
    Bt = x_ref.shape[0]

    def epilogue(z, is_last):
        if is_last:                       # eval-mode Sigmoid (exact, tiny tile)
            return 1.0 / (1.0 + jnp.exp(-z))
        return jnp.maximum(z, 0.0)        # ReLU

    # ---- conv0: wrapper-side im2col -> ONE matmul with K = k0*k0*C_in ----
    r0 = rows[0]
    x = x_ref[...]                                           # [Bt, r0, k0*k0*C_in] bf16
    z = jnp.dot(x.reshape(Bt * r0, x.shape[-1]), conv_refs[0][...],
                preferred_element_type=jnp.float32)
    z = jnp.maximum(z + conv_refs[1][...], 0.0)              # f32 bias + ReLU epilogue
    cur = z.astype(jnp.bfloat16).reshape(Bt, r0, -1)         # bf16 between layers

    # ---- conv layers >= 1: k*k shifted windows concatenated along K -> ONE matmul ----
    for l in range(1, n_conv):
        w_ref, b_ref = conv_refs[2 * l], conv_refs[2 * l + 1]
        k = kernel_sizes[l]
        r_out = rows[l]
        c_pad = cur.shape[-1]
        span = r_out + (k - 1) * W
        # Pre-shift by j (k-1 misaligned sublane shifts) so per-i slices are aligned
        # (W is a multiple of 8 in this config).
        shifted = [cur[:, j:j + span, :] for j in range(k)]
        pieces = [shifted[j][:, i * W:i * W + r_out, :]
                  for i in range(k) for j in range(k)]
        col = jnp.concatenate(pieces, axis=-1)               # [Bt, r_out, k*k*c_pad] bf16
        z = jnp.dot(col.reshape(Bt * r_out, k * k * c_pad), w_ref[...],
                    preferred_element_type=jnp.float32)      # MXU accumulates internally
        z = jnp.maximum(z + b_ref[...], 0.0)
        cur = z.astype(jnp.bfloat16).reshape(Bt, r_out, -1)

    # ---- fc0: contraction over (grid position, REAL channel), M = Bt.
    # fc0 weight rows at invalid grid positions are zero, so junk rows of the
    # full-grid conv output contribute nothing. ----
    w0_ref, b0_ref = fc_refs[0], fc_refs[1]
    c_real, S = w0_ref.shape[0], w0_ref.shape[1]
    # one bf16 transpose per sample (XLU), then cheap sublane extractions per channel
    cur_t = jnp.stack([jnp.transpose(cur[b]) for b in range(Bt)], axis=0)  # [Bt, c_pad, r_f]
    acc = jnp.dot(cur_t[:, 0, :S], w0_ref[0], preferred_element_type=jnp.float32)
    for c in range(1, c_real):
        acc = acc + jnp.dot(cur_t[:, c, :S], w0_ref[c],
                            preferred_element_type=jnp.float32)
    h = epilogue(acc + b0_ref[...], n_fc == 1)

    # ---- remaining fc layers (row form, 128-lane padded, M = Bt) ----
    for l in range(1, n_fc):
        w_ref, b_ref = fc_refs[2 * l], fc_refs[2 * l + 1]
        z = jnp.dot(h.astype(jnp.bfloat16), w_ref[...],
                    preferred_element_type=jnp.float32) + b_ref[...]
        h = epilogue(z, l == n_fc - 1)

    o_ref[:, 0, :] = h.astype(o_ref.dtype)                   # lane-dense [Bt, N_pad] store


# ----------------------------------------------------------------------------
# Wrapper: one-time layout glue for the NCHW input + a single pallas_call.
# ----------------------------------------------------------------------------
def ecg12_imagenet_forward(prep, x_nchw, *, meta, block_b=None):
    kernel_sizes = meta["kernel_sizes"]
    rows = meta["rows"]
    n_out_real = meta["n_out"]
    B, C, H, W = x_nchw.shape
    S = H * W
    n_conv = len(prep["conv"])
    n_fc = len(prep["fc"])

    # Batch tiling: Bt samples per grid step; keep the grid >= 2 steps so both v7x
    # TensorCores get work (v5e/v6e: just pipelining).
    if block_b is None:
        block_b = 8 if B >= 16 else max(1, B // 2)
    grid_b = pl.cdiv(B, block_b)
    b_pad = grid_b * block_b

    # --- wrapper-side conv0 im2col (cheap XLA glue): channel-last rows (r = h*W + w),
    # zero tail pad, 9 taps folded into the channel dim, bf16. ---
    k0 = kernel_sizes[0]
    r_in = rows[0]
    tail = r_in + (k0 - 1) * (W + 1) - S
    x_rows = jnp.transpose(x_nchw, (0, 2, 3, 1)).reshape(B, S, C)
    x_rows = jnp.pad(x_rows, ((0, b_pad - B), (0, max(tail, 0)), (0, 0)))
    cols = [x_rows[:, i * W + j:i * W + j + r_in, :]
            for i in range(k0) for j in range(k0)]
    x_col = jnp.concatenate(cols, axis=-1).astype(jnp.bfloat16)  # [b_pad, r_in, k0*k0*C]

    conv_flat = [a for wb in prep["conv"] for a in wb]
    fc_flat = [a for wb in prep["fc"] for a in wb]
    n_out_pad = fc_flat[-1].shape[-1]

    def _const_spec(a):
        return pl.BlockSpec(a.shape, lambda b, _nd=a.ndim: (0,) * _nd)

    in_specs = ([pl.BlockSpec((block_b, r_in, x_col.shape[-1]), lambda b: (b, 0, 0))]
                + [_const_spec(a) for a in conv_flat + fc_flat])
    out_specs = pl.BlockSpec((block_b, 1, n_out_pad), lambda b: (b, 0, 0))

    kernel = functools.partial(_ecg12_fused_kernel, grid_w=W,
                               kernel_sizes=tuple(kernel_sizes), rows=tuple(rows),
                               n_conv=n_conv, n_fc=n_fc)
    out = pl.pallas_call(
        kernel,
        out_shape=jax.ShapeDtypeStruct((b_pad, 1, n_out_pad), jnp.float32),
        grid=(grid_b,),
        in_specs=in_specs,
        out_specs=out_specs,
        compiler_params=pltpu.CompilerParams(
            dimension_semantics=("parallel",),       # shard batch steps across TCs (v7x)
            vmem_limit_bytes=32 * 1024 * 1024),
    )(x_col, *conv_flat, *fc_flat)
    return out[:B, 0, :n_out_real]


# ----------------------------------------------------------------------------
# One-time weight layout preparation (hoisted out of the forward path).
# ----------------------------------------------------------------------------
def prepare_params(params, *, in_channels, kernel_sizes, in_h, in_w):
    assert len(params["conv"]) == len(kernel_sizes)
    H, W = in_h, in_w
    S = H * W
    rows = _conv_row_plan(H, W, kernel_sizes)
    prep = {"conv": [], "fc": []}

    # conv0: taps folded into the contraction dim (matches the wrapper im2col order):
    # weight [c_out, c_in, kh, kw] -> [kh*kw*c_in, c_out_pad]
    (w0c, b0c), k0 = params["conv"][0], kernel_sizes[0]
    c_out = w0c.shape[0]
    c_out_pad = _round_up(c_out, LANE)
    wf = jnp.transpose(w0c, (2, 3, 1, 0)).reshape(k0 * k0 * in_channels, c_out)
    wf = jnp.pad(wf, ((0, 0), (0, c_out_pad - c_out)))
    bf = jnp.pad(b0c, (0, c_out_pad - c_out)).reshape(1, c_out_pad)
    prep["conv"].append((wf.astype(jnp.bfloat16), bf.astype(jnp.float32)))
    c_real, c_pad = c_out, c_out_pad

    # conv l >= 1: per-tap [c_in_pad, c_out_pad] slabs flattened to [k*k*c_in_pad, c_out_pad]
    for (w, b), k in zip(params["conv"][1:], kernel_sizes[1:]):
        c_out = w.shape[0]
        c_out_pad = _round_up(c_out, LANE)
        taps = jnp.transpose(w, (2, 3, 1, 0)).reshape(k * k, c_real, c_out)
        taps = jnp.pad(taps, ((0, 0), (0, c_pad - c_real), (0, c_out_pad - c_out)))
        wf = taps.reshape(k * k * c_pad, c_out_pad)
        bf = jnp.pad(b, (0, c_out_pad - c_out)).reshape(1, c_out_pad)
        prep["conv"].append((wf.astype(jnp.bfloat16), bf.astype(jnp.float32)))
        c_real, c_pad = c_out, c_out_pad

    oh, ow = in_h, in_w
    for k in kernel_sizes:
        oh, ow = oh - k + 1, ow - k + 1

    # fc0: scatter the PyTorch (C, H, W)-flatten weight onto the full HxW grid, split per
    # REAL conv-output channel (zero rows at invalid grid positions).
    w0, b0 = params["fc"][0]
    n0 = w0.shape[1]
    n0_pad = _round_up(n0, LANE)
    w0_grid = jnp.zeros((c_real, H, W, n0), w0.dtype)
    w0_grid = w0_grid.at[:, :oh, :ow, :].set(w0.reshape(c_real, oh, ow, n0))
    w0_grid = w0_grid.reshape(c_real, S, n0)
    w0_grid = jnp.pad(w0_grid, ((0, 0), (0, 0), (0, n0_pad - n0)))
    b0_pad = jnp.pad(b0, (0, n0_pad - n0)).reshape(1, n0_pad)
    prep["fc"].append((w0_grid.astype(jnp.bfloat16), b0_pad.astype(jnp.float32)))

    prev_real, prev_pad = n0, n0_pad
    for (w, b) in params["fc"][1:]:
        n = w.shape[1]
        n_pad = _round_up(n, LANE)
        w_p = jnp.pad(w, ((0, prev_pad - prev_real), (0, n_pad - n)))
        b_p = jnp.pad(b, (0, n_pad - n)).reshape(1, n_pad)
        prep["fc"].append((w_p.astype(jnp.bfloat16), b_p.astype(jnp.float32)))
        prev_real, prev_pad = n, n_pad

    meta = {"kernel_sizes": tuple(kernel_sizes), "rows": rows,
            "n_out": prev_real, "hw": (H, W)}
    return prep, meta


# ----------------------------------------------------------------------------
# Model definition (mirrors Ecg12ImageNet.__init__, PyTorch layouts) + f32 reference
# ----------------------------------------------------------------------------
def calc_out_length(l_in, kernel_lengths, stride, dilation, padding=0):
    l_out = l_in
    for kernel in kernel_lengths:
        l_out = math.floor((l_out + 2 * padding - dilation * (kernel - 1) - 1) / stride + 1)
    return l_out


def init_params(key, in_channels, hidden_channels, kernel_sizes,
                in_h, in_w, fc_hidden_dims, num_of_classes=2):
    params = {"conv": [], "fc": []}
    c_in = in_channels
    for c_out, k in zip(hidden_channels, kernel_sizes):
        key, kw_, kb_ = jax.random.split(key, 3)
        bound = 1.0 / math.sqrt(c_in * k * k)
        w = jax.random.uniform(kw_, (c_out, c_in, k, k), jnp.float32, -bound, bound)
        b = jax.random.uniform(kb_, (c_out,), jnp.float32, -bound, bound)
        params["conv"].append((w, b))
        c_in = c_out
    out_h = calc_out_length(in_h, kernel_sizes, 1, 1)
    out_w = calc_out_length(in_w, kernel_sizes, 1, 1)
    in_dim = hidden_channels[-1] * out_h * out_w
    fc_dims = list(fc_hidden_dims) + [1 if num_of_classes == 2 else num_of_classes]
    for out_dim in fc_dims:
        key, kw_, kb_ = jax.random.split(key, 3)
        bound = 1.0 / math.sqrt(in_dim)
        w = jax.random.uniform(kw_, (in_dim, out_dim), jnp.float32, -bound, bound)
        b = jax.random.uniform(kb_, (out_dim,), jnp.float32, -bound, bound)
        params["fc"].append((w, b))
        in_dim = out_dim
    return params


def _reference_forward(params, x):
    out = x
    for (w, b) in params["conv"]:
        out = jax.lax.conv_general_dilated(
            out, w, window_strides=(1, 1), padding="VALID",
            dimension_numbers=("NCHW", "OIHW", "NCHW"))
        out = jnp.maximum(out + b[None, :, None, None], 0.0)
    out = out.reshape(x.shape[0], -1)
    n_fc = len(params["fc"])
    for i, (w, b) in enumerate(params["fc"]):
        out = out @ w + b
        out = jax.nn.sigmoid(out) if i == n_fc - 1 else jnp.maximum(out, 0.0)
    return out


if __name__ == "__main__":
    # Small config consistent with the module:
    #   in_channels=4, hidden_channels=[8, 16], kernel_sizes=[3, 3],
    #   in_h=in_w=16, fc_hidden_dims=[32], num_of_classes=2  -> output [B, 1]
    key = jax.random.PRNGKey(0)
    key, kx = jax.random.split(key)
    B, C, H, W = 2, 4, 16, 16
    hidden_channels = [8, 16]
    kernel_sizes = [3, 3]
    fc_hidden_dims = [32]
    x = jax.random.normal(kx, (B, C, H, W), jnp.float32)

    params = init_params(key, in_channels=C, hidden_channels=hidden_channels,
                         kernel_sizes=kernel_sizes, in_h=H, in_w=W,
                         fc_hidden_dims=fc_hidden_dims, num_of_classes=2)
    prep, meta = prepare_params(params, in_channels=C, kernel_sizes=kernel_sizes,
                                in_h=H, in_w=W)

    fwd = jax.jit(functools.partial(ecg12_imagenet_forward, meta=meta))
    out = jax.block_until_ready(fwd(prep, x))
    assert out.shape == (B, 1), out.shape

    ref = jax.block_until_ready(_reference_forward(params, x))
    # Documented tolerance: bf16 MXU operands with f32 accumulation vs. f32 reference.
    assert jnp.allclose(out, ref, atol=1e-2, rtol=1e-2), \
        float(jnp.max(jnp.abs(out - ref)))

    print("KERNEL_OK")
</pallas_src>

<mosaic_0001>
module attributes {stable_mosaic.version = 11 : i64} {
  func.func @_ecg12_fused_kernel(%arg0: i32, %arg1: memref<1x304x36xbf16, #tpu.memory_space<vmem>>, %arg2: memref<36x128xbf16, #tpu.memory_space<vmem>>, %arg3: memref<1x128xf32, #tpu.memory_space<vmem>>, %arg4: memref<1152x128xbf16, #tpu.memory_space<vmem>>, %arg5: memref<1x128xf32, #tpu.memory_space<vmem>>, %arg6: memref<16x256x128xbf16, #tpu.memory_space<vmem>>, %arg7: memref<1x128xf32, #tpu.memory_space<vmem>>, %arg8: memref<128x128xbf16, #tpu.memory_space<vmem>>, %arg9: memref<1x128xf32, #tpu.memory_space<vmem>>, %arg10: memref<1x1x128xf32, #tpu.memory_space<vmem>>) attributes {dimension_semantics = [#tpu.dimension_semantics<parallel>], iteration_bounds = array<i64: 2>, scalar_prefetch = 0 : i64, scratch_operands = 0 : i64, tpu.core_type = #tpu.core_type<tc>, window_params = [{transform_indices = @transform_0, window_bounds = array<i64: 1, 304, 36>}, {pipeline_mode = #tpu.pipeline_mode<synchronous>, transform_indices = @transform_1, window_bounds = array<i64: 36, 128>}, {pipeline_mode = #tpu.pipeline_mode<synchronous>, transform_indices = @transform_2, window_bounds = array<i64: 1, 128>}, {pipeline_mode = #tpu.pipeline_mode<synchronous>, transform_indices = @transform_3, window_bounds = array<i64: 1152, 128>}, {pipeline_mode = #tpu.pipeline_mode<synchronous>, transform_indices = @transform_4, window_bounds = array<i64: 1, 128>}, {pipeline_mode = #tpu.pipeline_mode<synchronous>, transform_indices = @transform_5, window_bounds = array<i64: 16, 256, 128>}, {pipeline_mode = #tpu.pipeline_mode<synchronous>, transform_indices = @transform_6, window_bounds = array<i64: 1, 128>}, {pipeline_mode = #tpu.pipeline_mode<synchronous>, transform_indices = @transform_7, window_bounds = array<i64: 128, 128>}, {pipeline_mode = #tpu.pipeline_mode<synchronous>, transform_indices = @transform_8, window_bounds = array<i64: 1, 128>}, {transform_indices = @transform_9, window_bounds = array<i64: 1, 1, 128>}]} {
    %c0 = arith.constant 0 : index
    %c0_0 = arith.constant 0 : index
    %c0_1 = arith.constant 0 : index
    %0 = vector.load %arg1[%c0, %c0_0, %c0_1] : memref<1x304x36xbf16, #tpu.memory_space<vmem>>, vector<1x304x36xbf16>
    %1 = vector.shape_cast %0 : vector<1x304x36xbf16> to vector<304x36xbf16>
    %c0_2 = arith.constant 0 : index
    %c0_3 = arith.constant 0 : index
    %2 = vector.load %arg2[%c0_2, %c0_3] : memref<36x128xbf16, #tpu.memory_space<vmem>>, vector<36x128xbf16>
    %cst = arith.constant dense<0.000000e+00> : vector<304x128xf32>
    %3 = tpu.matmul %1, %2, %cst {dimension_numbers = #tpu.dot_dimension_numbers<[1], [0], [0], [1], [0, 0, 1, 1], [], []>} : vector<304x36xbf16>, vector<36x128xbf16>, vector<304x128xf32> -> vector<304x128xf32>
    %c0_4 = arith.constant 0 : index
    %c0_5 = arith.constant 0 : index
    %4 = vector.load %arg3[%c0_4, %c0_5] : memref<1x128xf32, #tpu.memory_space<vmem>>, vector<1x128xf32>
    %5 = vector.broadcast %4 : vector<1x128xf32> to vector<304x128xf32>
    %6 = arith.addf %3, %5 : vector<304x128xf32>
    %cst_6 = arith.constant 0.000000e+00 : f32
    %7 = vector.broadcast %cst_6 : f32 to vector<304x128xf32>
    %8 = arith.maximumf %6, %7 : vector<304x128xf32>
    %9 = arith.truncf %8 : vector<304x128xf32> to vector<304x128xbf16>
    %10 = vector.shape_cast %9 : vector<304x128xbf16> to vector<1x304x128xbf16>
    %11 = vector.extract_strided_slice %10 {offsets = [0, 0, 0], sizes = [1, 288, 128], strides = [1, 1, 1]} : vector<1x304x128xbf16> to vector<1x288x128xbf16>
    %12 = vector.extract_strided_slice %10 {offsets = [0, 1, 0], sizes = [1, 288, 128], strides = [1, 1, 1]} : vector<1x304x128xbf16> to vector<1x288x128xbf16>
    %13 = vector.extract_strided_slice %10 {offsets = [0, 2, 0], sizes = [1, 288, 128], strides = [1, 1, 1]} : vector<1x304x128xbf16> to vector<1x288x128xbf16>
    %14 = vector.extract_strided_slice %11 {offsets = [0, 0, 0], sizes = [1, 256, 128], strides = [1, 1, 1]} : vector<1x288x128xbf16> to vector<1x256x128xbf16>
    %15 = vector.extract_strided_slice %12 {offsets = [0, 0, 0], sizes = [1, 256, 128], strides = [1, 1, 1]} : vector<1x288x128xbf16> to vector<1x256x128xbf16>
    %16 = vector.extract_strided_slice %13 {offsets = [0, 0, 0], sizes = [1, 256, 128], strides = [1, 1, 1]} : vector<1x288x128xbf16> to vector<1x256x128xbf16>
    %17 = vector.extract_strided_slice %11 {offsets = [0, 16, 0], sizes = [1, 256, 128], strides = [1, 1, 1]} : vector<1x288x128xbf16> to vector<1x256x128xbf16>
    %18 = vector.extract_strided_slice %12 {offsets = [0, 16, 0], sizes = [1, 256, 128], strides = [1, 1, 1]} : vector<1x288x128xbf16> to vector<1x256x128xbf16>
    %19 = vector.extract_strided_slice %13 {offsets = [0, 16, 0], sizes = [1, 256, 128], strides = [1, 1, 1]} : vector<1x288x128xbf16> to vector<1x256x128xbf16>
    %20 = vector.extract_strided_slice %11 {offsets = [0, 32, 0], sizes = [1, 256, 128], strides = [1, 1, 1]} : vector<1x288x128xbf16> to vector<1x256x128xbf16>
    %21 = vector.extract_strided_slice %12 {offsets = [0, 32, 0], sizes = [1, 256, 128], strides = [1, 1, 1]} : vector<1x288x128xbf16> to vector<1x256x128xbf16>
    %22 = vector.extract_strided_slice %13 {offsets = [0, 32, 0], sizes = [1, 256, 128], strides = [1, 1, 1]} : vector<1x288x128xbf16> to vector<1x256x128xbf16>
    %23 = tpu.concatenate %14, %15, %16, %17, %18, %19, %20, %21, %22 in 2 : vector<1x256x128xbf16>, vector<1x256x128xbf16>, vector<1x256x128xbf16>, vector<1x256x128xbf16>, vector<1x256x128xbf16>, vector<1x256x128xbf16>, vector<1x256x128xbf16>, vector<1x256x128xbf16>, vector<1x256x128xbf16> -> vector<1x256x1152xbf16>
    %24 = vector.shape_cast %23 : vector<1x256x1152xbf16> to vector<256x1152xbf16>
    %c0_7 = arith.constant 0 : index
    %c0_8 = arith.constant 0 : index
    %25 = vector.load %arg4[%c0_7, %c0_8] : memref<1152x128xbf16, #tpu.memory_space<vmem>>, vector<1152x128xbf16>
    %cst_9 = arith.constant dense<0.000000e+00> : vector<256x128xf32>
    %26 = tpu.matmul %24, %25, %cst_9 {dimension_numbers = #tpu.dot_dimension_numbers<[1], [0], [0], [1], [0, 0, 1, 1], [], []>} : vector<256x1152xbf16>, vector<1152x128xbf16>, vector<256x128xf32> -> vector<256x128xf32>
    %c0_10 = arith.constant 0 : index
    %c0_11 = arith.constant 0 : index
    %27 = vector.load %arg5[%c0_10, %c0_11] : memref<1x128xf32, #tpu.memory_space<vmem>>, vector<1x128xf32>
    %28 = vector.broadcast %27 : vector<1x128xf32> to vector<256x128xf32>
    %29 = arith.addf %26, %28 : vector<256x128xf32>
    %cst_12 = arith.constant 0.000000e+00 : f32
    %30 = vector.broadcast %cst_12 : f32 to vector<256x128xf32>
    %31 = arith.maximumf %29, %30 : vector<256x128xf32>
    %32 = arith.truncf %31 : vector<256x128xf32> to vector<256x128xbf16>
    %33 = vector.shape_cast %32 : vector<256x128xbf16> to vector<1x256x128xbf16>
    %34 = vector.shape_cast %33 : vector<1x256x128xbf16> to vector<256x128xbf16>
    %35 = tpu.transpose %34, [1, 0] : vector<256x128xbf16> -> vector<128x256xbf16>
    %36 = vector.shape_cast %35 : vector<128x256xbf16> to vector<1x128x256xbf16>
    %37 = vector.extract_strided_slice %36 {offsets = [0, 0, 0], sizes = [1, 1, 256], strides = [1, 1, 1]} : vector<1x128x256xbf16> to vector<1x1x256xbf16>
    %38 = vector.shape_cast %37 : vector<1x1x256xbf16> to vector<1x256xbf16>
    %c0_13 = arith.constant 0 : index
    %c0_14 = arith.constant 0 : index
    %c0_15 = arith.constant 0 : index
    %39 = vector.load %arg6[%c0_13, %c0_14, %c0_15] : memref<16x256x128xbf16, #tpu.memory_space<vmem>>, vector<1x256x128xbf16>
    %40 = vector.shape_cast %39 : vector<1x256x128xbf16> to vector<256x128xbf16>
    %cst_16 = arith.constant dense<0.000000e+00> : vector<1x128xf32>
    %41 = tpu.matmul %38, %40, %cst_16 {dimension_numbers = #tpu.dot_dimension_numbers<[1], [0], [0], [1], [0, 0, 1, 1], [], []>} : vector<1x256xbf16>, vector<256x128xbf16>, vector<1x128xf32> -> vector<1x128xf32>
    %42 = vector.extract_strided_slice %36 {offsets = [0, 1, 0], sizes = [1, 1, 256], strides = [1, 1, 1]} : vector<1x128x256xbf16> to vector<1x1x256xbf16>
    %43 = vector.shape_cast %42 : vector<1x1x256xbf16> to vector<1x256xbf16>
    %c1 = arith.constant 1 : index
    %c0_17 = arith.constant 0 : index
    %c0_18 = arith.constant 0 : index
    %44 = vector.load %arg6[%c1, %c0_17, %c0_18] : memref<16x256x128xbf16, #tpu.memory_space<vmem>>, vector<1x256x128xbf16>
    %45 = vector.shape_cast %44 : vector<1x256x128xbf16> to vector<256x128xbf16>
    %cst_19 = arith.constant dense<0.000000e+00> : vector<1x128xf32>
    %46 = tpu.matmul %43, %45, %cst_19 {dimension_numbers = #tpu.dot_dimension_numbers<[1], [0], [0], [1], [0, 0, 1, 1], [], []>} : vector<1x256xbf16>, vector<256x128xbf16>, vector<1x128xf32> -> vector<1x128xf32>
    %47 = arith.addf %41, %46 : vector<1x128xf32>
    %48 = vector.extract_strided_slice %36 {offsets = [0, 2, 0], sizes = [1, 1, 256], strides = [1, 1, 1]} : vector<1x128x256xbf16> to vector<1x1x256xbf16>
    %49 = vector.shape_cast %48 : vector<1x1x256xbf16> to vector<1x256xbf16>
    %c2 = arith.constant 2 : index
    %c0_20 = arith.constant 0 : index
    %c0_21 = arith.constant 0 : index
    %50 = vector.load %arg6[%c2, %c0_20, %c0_21] : memref<16x256x128xbf16, #tpu.memory_space<vmem>>, vector<1x256x128xbf16>
    %51 = vector.shape_cast %50 : vector<1x256x128xbf16> to vector<256x128xbf16>
    %cst_22 = arith.constant dense<0.000000e+00> : vector<1x128xf32>
    %52 = tpu.matmul %49, %51, %cst_22 {dimension_numbers = #tpu.dot_dimension_numbers<[1], [0], [0], [1], [0, 0, 1, 1], [], []>} : vector<1x256xbf16>, vector<256x128xbf16>, vector<1x128xf32> -> vector<1x128xf32>
    %53 = arith.addf %47, %52 : vector<1x128xf32>
    %54 = vector.extract_strided_slice %36 {offsets = [0, 3, 0], sizes = [1, 1, 256], strides = [1, 1, 1]} : vector<1x128x256xbf16> to vector<1x1x256xbf16>
    %55 = vector.shape_cast %54 : vector<1x1x256xbf16> to vector<1x256xbf16>
    %c3 = arith.constant 3 : index
    %c0_23 = arith.constant 0 : index
    %c0_24 = arith.constant 0 : index
    %56 = vector.load %arg6[%c3, %c0_23, %c0_24] : memref<16x256x128xbf16, #tpu.memory_space<vmem>>, vector<1x256x128xbf16>
    %57 = vector.shape_cast %56 : vector<1x256x128xbf16> to vector<256x128xbf16>
    %cst_25 = arith.constant dense<0.000000e+00> : vector<1x128xf32>
    %58 = tpu.matmul %55, %57, %cst_25 {dimension_numbers = #tpu.dot_dimension_numbers<[1], [0], [0], [1], [0, 0, 1, 1], [], []>} : vector<1x256xbf16>, vector<256x128xbf16>, vector<1x128xf32> -> vector<1x128xf32>
    %59 = arith.addf %53, %58 : vector<1x128xf32>
    %60 = vector.extract_strided_slice %36 {offsets = [0, 4, 0], sizes = [1, 1, 256], strides = [1, 1, 1]} : vector<1x128x256xbf16> to vector<1x1x256xbf16>
    %61 = vector.shape_cast %60 : vector<1x1x256xbf16> to vector<1x256xbf16>
    %c4 = arith.constant 4 : index
    %c0_26 = arith.constant 0 : index
    %c0_27 = arith.constant 0 : index
    %62 = vector.load %arg6[%c4, %c0_26, %c0_27] : memref<16x256x128xbf16, #tpu.memory_space<vmem>>, vector<1x256x128xbf16>
    %63 = vector.shape_cast %62 : vector<1x256x128xbf16> to vector<256x128xbf16>
    %cst_28 = arith.constant dense<0.000000e+00> : vector<1x128xf32>
    %64 = tpu.matmul %61, %63, %cst_28 {dimension_numbers = #tpu.dot_dimension_numbers<[1], [0], [0], [1], [0, 0, 1, 1], [], []>} : vector<1x256xbf16>, vector<256x128xbf16>, vector<1x128xf32> -> vector<1x128xf32>
    %65 = arith.addf %59, %64 : vector<1x128xf32>
    %66 = vector.extract_strided_slice %36 {offsets = [0, 5, 0], sizes = [1, 1, 256], strides = [1, 1, 1]} : vector<1x128x256xbf16> to vector<1x1x256xbf16>
    %67 = vector.shape_cast %66 : vector<1x1x256xbf16> to vector<1x256xbf16>
    %c5 = arith.constant 5 : index
    %c0_29 = arith.constant 0 : index
    %c0_30 = arith.constant 0 : index
    %68 = vector.load %arg6[%c5, %c0_29, %c0_30] : memref<16x256x128xbf16, #tpu.memory_space<vmem>>, vector<1x256x128xbf16>
    %69 = vector.shape_cast %68 : vector<1x256x128xbf16> to vector<256x128xbf16>
    %cst_31 = arith.constant dense<0.000000e+00> : vector<1x128xf32>
    %70 = tpu.matmul %67, %69, %cst_31 {dimension_numbers = #tpu.dot_dimension_numbers<[1], [0], [0], [1], [0, 0, 1, 1], [], []>} : vector<1x256xbf16>, vector<256x128xbf16>, vector<1x128xf32> -> vector<1x128xf32>
    %71 = arith.addf %65, %70 : vector<1x128xf32>
    %72 = vector.extract_strided_slice %36 {offsets = [0, 6, 0], sizes = [1, 1, 256], strides = [1, 1, 1]} : vector<1x128x256xbf16> to vector<1x1x256xbf16>
    %73 = vector.shape_cast %72 : vector<1x1x256xbf16> to vector<1x256xbf16>
    %c6 = arith.constant 6 : index
    %c0_32 = arith.constant 0 : index
    %c0_33 = arith.constant 0 : index
    %74 = vector.load %arg6[%c6, %c0_32, %c0_33] : memref<16x256x128xbf16, #tpu.memory_space<vmem>>, vector<1x256x128xbf16>
    %75 = vector.shape_cast %74 : vector<1x256x128xbf16> to vector<256x128xbf16>
    %cst_34 = arith.constant dense<0.000000e+00> : vector<1x128xf32>
    %76 = tpu.matmul %73, %75, %cst_34 {dimension_numbers = #tpu.dot_dimension_numbers<[1], [0], [0], [1], [0, 0, 1, 1], [], []>} : vector<1x256xbf16>, vector<256x128xbf16>, vector<1x128xf32> -> vector<1x128xf32>
    %77 = arith.addf %71, %76 : vector<1x128xf32>
    %78 = vector.extract_strided_slice %36 {offsets = [0, 7, 0], sizes = [1, 1, 256], strides = [1, 1, 1]} : vector<1x128x256xbf16> to vector<1x1x256xbf16>
    %79 = vector.shape_cast %78 : vector<1x1x256xbf16> to vector<1x256xbf16>
    %c7 = arith.constant 7 : index
    %c0_35 = arith.constant 0 : index
    %c0_36 = arith.constant 0 : index
    %80 = vector.load %arg6[%c7, %c0_35, %c0_36] : memref<16x256x128xbf16, #tpu.memory_space<vmem>>, vector<1x256x128xbf16>
    %81 = vector.shape_cast %80 : vector<1x256x128xbf16> to vector<256x128xbf16>
    %cst_37 = arith.constant dense<0.000000e+00> : vector<1x128xf32>
    %82 = tpu.matmul %79, %81, %cst_37 {dimension_numbers = #tpu.dot_dimension_numbers<[1], [0], [0], [1], [0, 0, 1, 1], [], []>} : vector<1x256xbf16>, vector<256x128xbf16>, vector<1x128xf32> -> vector<1x128xf32>
    %83 = arith.addf %77, %82 : vector<1x128xf32>
    %84 = vector.extract_strided_slice %36 {offsets = [0, 8, 0], sizes = [1, 1, 256], strides = [1, 1, 1]} : vector<1x128x256xbf16> to vector<1x1x256xbf16>
    %85 = vector.shape_cast %84 : vector<1x1x256xbf16> to vector<1x256xbf16>
    %c8 = arith.constant 8 : index
    %c0_38 = arith.constant 0 : index
    %c0_39 = arith.constant 0 : index
    %86 = vector.load %arg6[%c8, %c0_38, %c0_39] : memref<16x256x128xbf16, #tpu.memory_space<vmem>>, vector<1x256x128xbf16>
    %87 = vector.shape_cast %86 : vector<1x256x128xbf16> to vector<256x128xbf16>
    %cst_40 = arith.constant dense<0.000000e+00> : vector<1x128xf32>
    %88 = tpu.matmul %85, %87, %cst_40 {dimension_numbers = #tpu.dot_dimension_numbers<[1], [0], [0], [1], [0, 0, 1, 1], [], []>} : vector<1x256xbf16>, vector<256x128xbf16>, vector<1x128xf32> -> vector<1x128xf32>
    %89 = arith.addf %83, %88 : vector<1x128xf32>
    %90 = vector.extract_strided_slice %36 {offsets = [0, 9, 0], sizes = [1, 1, 256], strides = [1, 1, 1]} : vector<1x128x256xbf16> to vector<1x1x256xbf16>
    %91 = vector.shape_cast %90 : vector<1x1x256xbf16> to vector<1x256xbf16>
    %c9 = arith.constant 9 : index
    %c0_41 = arith.constant 0 : index
    %c0_42 = arith.constant 0 : index
    %92 = vector.load %arg6[%c9, %c0_41, %c0_42] : memref<16x256x128xbf16, #tpu.memory_space<vmem>>, vector<1x256x128xbf16>
    %93 = vector.shape_cast %92 : vector<1x256x128xbf16> to vector<256x128xbf16>
    %cst_43 = arith.constant dense<0.000000e+00> : vector<1x128xf32>
    %94 = tpu.matmul %91, %93, %cst_43 {dimension_numbers = #tpu.dot_dimension_numbers<[1], [0], [0], [1], [0, 0, 1, 1], [], []>} : vector<1x256xbf16>, vector<256x128xbf16>, vector<1x128xf32> -> vector<1x128xf32>
    %95 = arith.addf %89, %94 : vector<1x128xf32>
    %96 = vector.extract_strided_slice %36 {offsets = [0, 10, 0], sizes = [1, 1, 256], strides = [1, 1, 1]} : vector<1x128x256xbf16> to vector<1x1x256xbf16>
    %97 = vector.shape_cast %96 : vector<1x1x256xbf16> to vector<1x256xbf16>
    %c10 = arith.constant 10 : index
    %c0_44 = arith.constant 0 : index
    %c0_45 = arith.constant 0 : index
    %98 = vector.load %arg6[%c10, %c0_44, %c0_45] : memref<16x256x128xbf16, #tpu.memory_space<vmem>>, vector<1x256x128xbf16>
    %99 = vector.shape_cast %98 : vector<1x256x128xbf16> to vector<256x128xbf16>
    %cst_46 = arith.constant dense<0.000000e+00> : vector<1x128xf32>
    %100 = tpu.matmul %97, %99, %cst_46 {dimension_numbers = #tpu.dot_dimension_numbers<[1], [0], [0], [1], [0, 0, 1, 1], [], []>} : vector<1x256xbf16>, vector<256x128xbf16>, vector<1x128xf32> -> vector<1x128xf32>
    %101 = arith.addf %95, %100 : vector<1x128xf32>
    %102 = vector.extract_strided_slice %36 {offsets = [0, 11, 0], sizes = [1, 1, 256], strides = [1, 1, 1]} : vector<1x128x256xbf16> to vector<1x1x256xbf16>
    %103 = vector.shape_cast %102 : vector<1x1x256xbf16> to vector<1x256xbf16>
    %c11 = arith.constant 11 : index
    %c0_47 = arith.constant 0 : index
    %c0_48 = arith.constant 0 : index
    %104 = vector.load %arg6[%c11, %c0_47, %c0_48] : memref<16x256x128xbf16, #tpu.memory_space<vmem>>, vector<1x256x128xbf16>
    %105 = vector.shape_cast %104 : vector<1x256x128xbf16> to vector<256x128xbf16>
    %cst_49 = arith.constant dense<0.000000e+00> : vector<1x128xf32>
    %106 = tpu.matmul %103, %105, %cst_49 {dimension_numbers = #tpu.dot_dimension_numbers<[1], [0], [0], [1], [0, 0, 1, 1], [], []>} : vector<1x256xbf16>, vector<256x128xbf16>, vector<1x128xf32> -> vector<1x128xf32>
    %107 = arith.addf %101, %106 : vector<1x128xf32>
    %108 = vector.extract_strided_slice %36 {offsets = [0, 12, 0], sizes = [1, 1, 256], strides = [1, 1, 1]} : vector<1x128x256xbf16> to vector<1x1x256xbf16>
    %109 = vector.shape_cast %108 : vector<1x1x256xbf16> to vector<1x256xbf16>
    %c12 = arith.constant 12 : index
    %c0_50 = arith.constant 0 : index
    %c0_51 = arith.constant 0 : index
    %110 = vector.load %arg6[%c12, %c0_50, %c0_51] : memref<16x256x128xbf16, #tpu.memory_space<vmem>>, vector<1x256x128xbf16>
    %111 = vector.shape_cast %110 : vector<1x256x128xbf16> to vector<256x128xbf16>
    %cst_52 = arith.constant dense<0.000000e+00> : vector<1x128xf32>
    %112 = tpu.matmul %109, %111, %cst_52 {dimension_numbers = #tpu.dot_dimension_numbers<[1], [0], [0], [1], [0, 0, 1, 1], [], []>} : vector<1x256xbf16>, vector<256x128xbf16>, vector<1x128xf32> -> vector<1x128xf32>
    %113 = arith.addf %107, %112 : vector<1x128xf32>
    %114 = vector.extract_strided_slice %36 {offsets = [0, 13, 0], sizes = [1, 1, 256], strides = [1, 1, 1]} : vector<1x128x256xbf16> to vector<1x1x256xbf16>
    %115 = vector.shape_cast %114 : vector<1x1x256xbf16> to vector<1x256xbf16>
    %c13 = arith.constant 13 : index
    %c0_53 = arith.constant 0 : index
    %c0_54 = arith.constant 0 : index
    %116 = vector.load %arg6[%c13, %c0_53, %c0_54] : memref<16x256x128xbf16, #tpu.memory_space<vmem>>, vector<1x256x128xbf16>
    %117 = vector.shape_cast %116 : vector<1x256x128xbf16> to vector<256x128xbf16>
    %cst_55 = arith.constant dense<0.000000e+00> : vector<1x128xf32>
    %118 = tpu.matmul %115, %117, %cst_55 {dimension_numbers = #tpu.dot_dimension_numbers<[1], [0], [0], [1], [0, 0, 1, 1], [], []>} : vector<1x256xbf16>, vector<256x128xbf16>, vector<1x128xf32> -> vector<1x128xf32>
    %119 = arith.addf %113, %118 : vector<1x128xf32>
    %120 = vector.extract_strided_slice %36 {offsets = [0, 14, 0], sizes = [1, 1, 256], strides = [1, 1, 1]} : vector<1x128x256xbf16> to vector<1x1x256xbf16>
    %121 = vector.shape_cast %120 : vector<1x1x256xbf16> to vector<1x256xbf16>
    %c14 = arith.constant 14 : index
    %c0_56 = arith.constant 0 : index
    %c0_57 = arith.constant 0 : index
    %122 = vector.load %arg6[%c14, %c0_56, %c0_57] : memref<16x256x128xbf16, #tpu.memory_space<vmem>>, vector<1x256x128xbf16>
    %123 = vector.shape_cast %122 : vector<1x256x128xbf16> to vector<256x128xbf16>
    %cst_58 = arith.constant dense<0.000000e+00> : vector<1x128xf32>
    %124 = tpu.matmul %121, %123, %cst_58 {dimension_numbers = #tpu.dot_dimension_numbers<[1], [0], [0], [1], [0, 0, 1, 1], [], []>} : vector<1x256xbf16>, vector<256x128xbf16>, vector<1x128xf32> -> vector<1x128xf32>
    %125 = arith.addf %119, %124 : vector<1x128xf32>
    %126 = vector.extract_strided_slice %36 {offsets = [0, 15, 0], sizes = [1, 1, 256], strides = [1, 1, 1]} : vector<1x128x256xbf16> to vector<1x1x256xbf16>
    %127 = vector.shape_cast %126 : vector<1x1x256xbf16> to vector<1x256xbf16>
    %c15 = arith.constant 15 : index
    %c0_59 = arith.constant 0 : index
    %c0_60 = arith.constant 0 : index
    %128 = vector.load %arg6[%c15, %c0_59, %c0_60] : memref<16x256x128xbf16, #tpu.memory_space<vmem>>, vector<1x256x128xbf16>
    %129 = vector.shape_cast %128 : vector<1x256x128xbf16> to vector<256x128xbf16>
    %cst_61 = arith.constant dense<0.000000e+00> : vector<1x128xf32>
    %130 = tpu.matmul %127, %129, %cst_61 {dimension_numbers = #tpu.dot_dimension_numbers<[1], [0], [0], [1], [0, 0, 1, 1], [], []>} : vector<1x256xbf16>, vector<256x128xbf16>, vector<1x128xf32> -> vector<1x128xf32>
    %131 = arith.addf %125, %130 : vector<1x128xf32>
    %c0_62 = arith.constant 0 : index
    %c0_63 = arith.constant 0 : index
    %132 = vector.load %arg7[%c0_62, %c0_63] : memref<1x128xf32, #tpu.memory_space<vmem>>, vector<1x128xf32>
    %133 = arith.addf %131, %132 : vector<1x128xf32>
    %cst_64 = arith.constant 0.000000e+00 : f32
    %134 = vector.broadcast %cst_64 : f32 to vector<1x128xf32>
    %135 = arith.maximumf %133, %134 : vector<1x128xf32>
    %136 = arith.truncf %135 : vector<1x128xf32> to vector<1x128xbf16>
    %c0_65 = arith.constant 0 : index
    %c0_66 = arith.constant 0 : index
    %137 = vector.load %arg8[%c0_65, %c0_66] : memref<128x128xbf16, #tpu.memory_space<vmem>>, vector<128x128xbf16>
    %cst_67 = arith.constant dense<0.000000e+00> : vector<1x128xf32>
    %138 = tpu.matmul %136, %137, %cst_67 {dimension_numbers = #tpu.dot_dimension_numbers<[1], [0], [0], [1], [0, 0, 1, 1], [], []>} : vector<1x128xbf16>, vector<128x128xbf16>, vector<1x128xf32> -> vector<1x128xf32>
    %c0_68 = arith.constant 0 : index
    %c0_69 = arith.constant 0 : index
    %139 = vector.load %arg9[%c0_68, %c0_69] : memref<1x128xf32, #tpu.memory_space<vmem>>, vector<1x128xf32>
    %140 = arith.addf %138, %139 : vector<1x128xf32>
    %cst_70 = arith.constant 0.000000e+00 : f32
    %141 = vector.broadcast %cst_70 : f32 to vector<1x128xf32>
    %142 = arith.subf %141, %140 : vector<1x128xf32>
    %143 = math.exp %142 : vector<1x128xf32>
    %cst_71 = arith.constant 1.000000e+00 : f32
    %144 = vector.broadcast %cst_71 : f32 to vector<1x128xf32>
    %145 = arith.addf %144, %143 : vector<1x128xf32>
    %cst_72 = arith.constant 1.000000e+00 : f32
    %146 = vector.broadcast %cst_72 : f32 to vector<1x128xf32>
    %147 = arith.divf %146, %145 : vector<1x128xf32>
    %c0_73 = arith.constant 0 : index
    %c0_74 = arith.constant 0 : index
    %c0_75 = arith.constant 0 : index
    %148 = vector.load %arg10[%c0_73, %c0_74, %c0_75] : memref<1x1x128xf32, #tpu.memory_space<vmem>>, vector<1x1x128xf32>
    %149 = vector.shape_cast %148 : vector<1x1x128xf32> to vector<1x128xf32>
    %150 = vector.shape_cast %147 : vector<1x128xf32> to vector<1x1x128xf32>
    tpu.vector_store %arg10[%c0_73, %c0_74, %c0_75], %150 {strides = array<i32>} : memref<1x1x128xf32, #tpu.memory_space<vmem>>, vector<1x1x128xf32>,
    return
  }
  func.func @transform_0(%arg0: i32) -> (i32, i32, i32) {
    %c0_i32 = arith.constant 0 : i32
    %c0_i32_0 = arith.constant 0 : i32
    %c0_i32_1 = arith.constant 0 : i32
    return %arg0, %c0_i32, %c0_i32_0 : i32, i32, i32
  }
  func.func @transform_1(%arg0: i32) -> (i32, i32) {
    %c0_i32 = arith.constant 0 : i32
    %c0_i32_0 = arith.constant 0 : i32
    %c0_i32_1 = arith.constant 0 : i32
    return %c0_i32, %c0_i32_0 : i32, i32
  }
  func.func @transform_2(%arg0: i32) -> (i32, i32) {
    %c0_i32 = arith.constant 0 : i32
    %c0_i32_0 = arith.constant 0 : i32
    %c0_i32_1 = arith.constant 0 : i32
    return %c0_i32, %c0_i32_0 : i32, i32
  }
  func.func @transform_3(%arg0: i32) -> (i32, i32) {
    %c0_i32 = arith.constant 0 : i32
    %c0_i32_0 = arith.constant 0 : i32
    %c0_i32_1 = arith.constant 0 : i32
    return %c0_i32, %c0_i32_0 : i32, i32
  }
  func.func @transform_4(%arg0: i32) -> (i32, i32) {
    %c0_i32 = arith.constant 0 : i32
    %c0_i32_0 = arith.constant 0 : i32
    %c0_i32_1 = arith.constant 0 : i32
    return %c0_i32, %c0_i32_0 : i32, i32
  }
  func.func @transform_5(%arg0: i32) -> (i32, i32, i32) {
    %c0_i32 = arith.constant 0 : i32
    %c0_i32_0 = arith.constant 0 : i32
    %c0_i32_1 = arith.constant 0 : i32
    %c0_i32_2 = arith.constant 0 : i32
    return %c0_i32, %c0_i32_0, %c0_i32_1 : i32, i32, i32
  }
  func.func @transform_6(%arg0: i32) -> (i32, i32) {
    %c0_i32 = arith.constant 0 : i32
    %c0_i32_0 = arith.constant 0 : i32
    %c0_i32_1 = arith.constant 0 : i32
    return %c0_i32, %c0_i32_0 : i32, i32
  }
  func.func @transform_7(%arg0: i32) -> (i32, i32) {
    %c0_i32 = arith.constant 0 : i32
    %c0_i32_0 = arith.constant 0 : i32
    %c0_i32_1 = arith.constant 0 : i32
    return %c0_i32, %c0_i32_0 : i32, i32
  }
  func.func @transform_8(%arg0: i32) -> (i32, i32) {
    %c0_i32 = arith.constant 0 : i32
    %c0_i32_0 = arith.constant 0 : i32
    %c0_i32_1 = arith.constant 0 : i32
    return %c0_i32, %c0_i32_0 : i32, i32
  }
  func.func @transform_9(%arg0: i32) -> (i32, i32, i32) {
    %c0_i32 = arith.constant 0 : i32
    %c0_i32_0 = arith.constant 0 : i32
    %c0_i32_1 = arith.constant 0 : i32
    return %arg0, %c0_i32, %c0_i32_0 : i32, i32, i32
  }
}

</mosaic_0001>

<bundles_post_ra>
// kernel: ecg12_imagenet_forward.1
= control target key start
LH: loop header
LB: loop body
LE: loop exit
PB: predicated region body
PF: predicated region fallthrough
CT: control target
= control target key end

     0   :  { %14 = vsyncpa [#allocation3], 0  ;;  %s7351_s30 = smov 0   ;;  %s8514_s0 = inlined_call_operand.vmem [shape: bf16[2,304,36], index: 0, kind: input, shape index: {}]   ;;  %s8515_s1 = inlined_call_operand.vmem [shape: bf16[36,128], index: 1, kind: input, shape index: {}]   ;;  %s8516_s2 = inlined_call_operand.vmem [shape: f32[1,128], index: 2, kind: input, shape index: {}]   ;;  %s8517_s3 = inlined_call_operand.vmem [shape: bf16[1152,128], index: 3, kind: input, shape index: {}]   ;;  %s8518_s4 = inlined_call_operand.vmem [shape: f32[1,128], index: 4, kind: input, shape index: {}]   ;;  %s8519_s5 = inlined_call_operand.hbm [shape: bf16[16,256,128], index: 5, kind: input, shape index: {}]   ;;  %s8520_s6 = inlined_call_operand.vmem [shape: f32[1,128], index: 6, kind: input, shape index: {}]   ;;  %s8521_s7 = inlined_call_operand.vmem [shape: bf16[128,128], index: 7, kind: input, shape index: {}]   ;;  %s8522_s8 = inlined_call_operand.vmem [shape: f32[1,128], index: 8, kind: input, shape index: {}]   ;;  %s8523_s9 = inlined_call_operand.vmem [shape: f32[2,1,128], index: 9, kind: output, shape index: {}]  }
   0x1 LB: > { %s7357_s10 = sadd.s32 4294967295, %s7294_s30   ;;  %p5479_p0 = scmp.ge.s32.totalorder %s7294_s30, 1  ;;  %s7294_s30 = sphi %s7351_s30, %s20_s30  }
   0x2   : > { %p245_p1 = scmp.lt.s32.totalorder %s7294_s30, 3  ;;  %s7296_s11 = smov [#allocation2]  }
   0x3   : > { %s269_s12 = sshll.u32 %s7296_s11, 4  ;;  %p6880_p3 = scmp.eq.s32.totalorder %s7357_s10, 0  ;;  %s270_s12 = int_to_ptr.vmem [resolvable:$true] %s269_s12 }
   0x4   : > { %p7361_p2 = pnand %p5479_p0, %p245_p1  ;;  %s7269_s14 = scalar_lea.vmem %s270_s12, 32768 }
   0x5   : > { %p7270_p7 = scmp.ne.s32.totalorder %s270_s12, %s7269_s14  ;;  %p7277_p10 = scmp.lt.s32.totalorder %s270_s12, %s270_s12 }
   0x6   : > { %p6876_p4 = pneg %p7361_p2  ;;  %p7278_p11 = scmp.lt.s32.totalorder %s7269_s14, %s7269_s14 }
   0x8   : > { %p6877_p5 = pnand %p6880_p3, %p6876_p4  ;;  %p7279_p12 = por %p7278_p11, %p7277_p10 }
   0xa   : > { %p7260_p6 = pneg %p6877_p5 }
   0xc   : > { %p7272_p8 = pnand %p7270_p7, %p7260_p6 }
   0xe   : > { %p7273_p9 = pneg %p7272_p8 }
  0x10   : > { %p7280_p13 = pnand %p7279_p12, %p7273_p9 }
  0x12   : > { %7283 = shalt.err (!%p7280_p13)
}
  0x13   : > { %s7297_s15 = smov 64   ;;  %s7298_s16 = smov 4  }
  0x14   : > { %6879 = dma.hbm_to_vmem [thread:$0]  (!%p6877_p5), %s8519_s5, 32768, %s270_s12, [#allocation3], %s7297_s15, %s7297_s15, %s7298_s16  }
  0x15   : > { %302 = sbr.rel (%p7361_p2) target bundleno = 1608 (0x648), region = 56 }
  0x1a   : > { %7289 = dma.done.wait (%p6880_p3), [#allocation3], 32768  }
  0x1b   : > { %7291 = vsyncadd (%p6880_p3), [#allocation3], 4294934528  ;;  %p336_p0 = scmp.lt.s32.totalorder %s7357_s10, 1  ;;  %v8524_v0 = vmov 0.0   ;;  %vm7300_vm0 = vmmov 0   ;;  %vm563_vm1 = vcmask 1041408  }
  0x1c   : > { %6721 = vmatprep.subr.bf16.mxu0 %v8524_v0  ;;  %6727 = vmatprep.mubr.msk.bf16.mxu0 %vm7300_vm0, %v8524_v0  ;;  %v6895_v1 = vld [vmem:[%s8515_s1 + $0x10] ss:$0 sps:$4 sm:$0x33]   ;;  %v6896_v3 = vld [vmem:[%s8515_s1 + $0x8] sm:$0xff]   ;;  %v6897_v4 = vld [vmem:[%s8515_s1] sm:$0xff]   ;;  %vm505_vm2 = vcmask 293888  }
  0x1d   : > { %s8600_s10 = smov (!%p336_p0, %s7357_s10), 1  ;;  %v565_v2 = vsel %vm563_vm1, %v6895_v1, 0  ;;  %v6916_v7 = vld [vmem:[%s8517_s3 + $0x78] sm:$0xff]   ;;  %v6918_v9 = vld [vmem:[%s8517_s3 + $0x70] sm:$0xff]   ;;  %v6920_v19 = vld [vmem:[%s8517_s3 + $0x68] sm:$0xff]   ;;  %vm975_vm4 = vcmask 1046528  }
  0x1e   : > { %s6871_s19 = smul.u32 152, %s8600_s10  ;;  %6722 = vmatpush3.bf16.msra.mxu0 %v565_v2  ;;  %v6917_v8 = vld [vmem:[%s8517_s3 + $0x38] sm:$0xff]   ;;  %5888 = vmatprep.subr.bf16.mxu1 %v6916_v7  ;;  %v6919_v11 = vld [vmem:[%s8517_s3 + $0x30] sm:$0xff]   ;;  %v6922_v21 = vld [vmem:[%s8517_s3 + $0x28] sm:$0xff]   ;;  %vm809_vm3 = vsmask.f32 7424  ;;  %s343_s14 = scalar_lea.vmem %s8523_s9, %s8600_s10 }
  0x1f   : > { %6723 = vmatprep.subr.bf16.mxu0 %v8524_v0  ;;  %5889 = vmatpush3.bf16.msra.mxu1 %v6917_v8  ;;  %v6921_v18 = vld [vmem:[%s8517_s3 + $0x178] sm:$0xff]   ;;  %v6925_v23 = vld [vmem:[%s8517_s3 + $0x170] sm:$0xff]   ;;  %v6924_v24 = vld [vmem:[%s8517_s3 + $0x60] sm:$0xff]  }
  0x20   : > { %s7393_s24 = scalar_lea.vmem %s8514_s0, %s6871_s19  ;;  %5890 = vmatprep.subr.bf16.mxu1 %v6918_v9  ;;  %v6923_v20 = vld [vmem:[%s8517_s3 + $0x138] sm:$0xff]   ;;  %v6927_v25 = vld [vmem:[%s8517_s3 + $0x130] sm:$0xff]   ;;  %v6926_v26 = vld [vmem:[%s8517_s3 + $0x20] sm:$0xff]  }
  0x21   : > { %v6898_v5 = vld [vmem:[%s7393_s24] sm:$0xff]   ;;  %v6899_v6 = vld [vmem:[%s7393_s24 + $0x8] sm:$0xff]   ;;  %v6900_v10 = vld [vmem:[%s7393_s24 + $0x10] sm:$0xff]  }
  0x22   : > { %6724 = vmatpush3.bf16.msra.mxu0 %v6896_v3  ;;  %v6901_v12 = vld [vmem:[%s7393_s24 + $0x18] sm:$0xff]   ;;  %v6902_v13 = vld [vmem:[%s7393_s24 + $0x20] sm:$0xff]   ;;  %v6903_v14 = vld [vmem:[%s7393_s24 + $0x28] sm:$0xff]  }
  0x23   : > { %6725 = vmatprep.subr.bf16.mxu0 %v8524_v0  ;;  %5891 = vmatpush3.bf16.msra.mxu1 %v6919_v11  ;;  %v6904_v15 = vld [vmem:[%s7393_s24 + $0x30] sm:$0xff]   ;;  %v6905_v16 = vld [vmem:[%s7393_s24 + $0x38] sm:$0xff]   ;;  %v6906_v17 = vld [vmem:[%s7393_s24 + $0x40] sm:$0xff]  }
  0x24   : > { %5892 = vmatprep.subr.bf16.mxu1 %v6920_v19  ;;  %v6907_v22 = vld [vmem:[%s7393_s24 + $0x48] sm:$0xff]   ;;  %v6928_v28 = vld [vmem:[%s8517_s3 + $0x58] sm:$0xff]   ;;  %v6908_v31 = vld [vmem:[%s7393_s24 + $0x50] sm:$0xff]  }
  0x25   : > { %v6929_v27 = vld [vmem:[%s8517_s3 + $0x168] sm:$0xff]   ;;  %v6930_v30 = vld [vmem:[%s8517_s3 + $0x18] sm:$0xff]   ;;  %v6933_v32 = vld [vmem:[%s8517_s3 + $0x160] sm:$0xff]  }
  0x26   : > { %6726 = vmatpush3.bf16.msra.mxu0 %v6897_v4  ;;  %v6931_v29 = vld [vmem:[%s8517_s3 + $0x128] sm:$0xff]   ;;  %v6932_v33 = vld [vmem:[%s8517_s3 + $0x50] sm:$0xff]   ;;  %v6935_v34 = vld [vmem:[%s8517_s3 + $0x120] sm:$0xff]  }
  0x27   : > { %6112 = vmatprep.subr.bf16.mxu0 %v6921_v18  ;;  %5893 = vmatpush3.bf16.msra.mxu1 %v6922_v21  ;;  %v6934_v35 = vld [vmem:[%s8517_s3 + $0x10] sm:$0xff]   ;;  %v6937_v36 = vld [vmem:[%s8517_s3 + $0x158] sm:$0xff]   ;;  %v6936_v37 = vld [vmem:[%s8517_s3 + $0x48] sm:$0xff]  }
  0x28   : > { %5894 = vmatprep.subr.bf16.mxu1 %v6924_v24  ;;  %v6939_v38 = vld [vmem:[%s8517_s3 + $0x118] sm:$0xff]   ;;  %v6938_v39 = vld [vmem:[%s8517_s3 + $0x8] sm:$0xff]   ;;  %v6941_v41 = vld [vmem:[%s8517_s3 + $0x150] sm:$0xff]  }
  0x29   : > { %6728 = vmatmul.mubr.msk.bf16.vlgmr.msra.gmra.mxu0 %vm505_vm2, %v6898_v5  ;;  %v6909_v40 = vld [vmem:[%s7393_s24 + $0x58] sm:$0xff]   ;;  %v6940_v42 = vld [vmem:[%s8517_s3 + $0x40] sm:$0xff]   ;;  %v6943_v43 = vld [vmem:[%s8517_s3 + $0x110] sm:$0xff]  }
  0x2a   : > { %6731 = vmatprep.mubr.msk.bf16.mxu0 %vm7300_vm0, %v8524_v0  ;;  %6113 = vmatpush3.bf16.msra.mxu0 %v6923_v20  ;;  %v6942_v44 = vld [vmem:[%s8517_s3] sm:$0xff]   ;;  %v6946_v45 = vld [vmem:[%s8517_s3 + $0x148] sm:$0xff]   ;;  %v6945_v49 = vld [vmem:[%s8517_s3 + $0xf8] sm:$0xff]  }
  0x2b   : > { %6114 = vmatprep.subr.bf16.mxu0 %v6925_v23  ;;  %5895 = vmatpush3.bf16.msra.mxu1 %v6926_v26  ;;  %v6948_v46 = vld [vmem:[%s8517_s3 + $0x108] sm:$0xff]   ;;  %v6949_v47 = vld [vmem:[%s8517_s3 + $0x140] sm:$0xff]   ;;  %v6912_v52 = vld [vmem:[%s7393_s24 + $0x70] sm:$0xff]  }
  0x2c   : > { %5896 = vmatprep.subr.bf16.mxu1 %v6928_v28  ;;  %v6910_v48 = vld [vmem:[%s7393_s24 + $0x60] sm:$0xff]   ;;  %v6911_v51 = vld [vmem:[%s7393_s24 + $0x68] sm:$0xff]   ;;  %v6913_v53 = vld [vmem:[%s7393_s24 + $0x78] sm:$0xff]  }
  0x2d   : > { %v6950_v50 = vld [vmem:[%s8517_s3 + $0x100] sm:$0xff]   ;;  %v6915_v55 = vld [vmem:[%s7393_s24 + $0x88] sm:$0xff]   ;;  %v6944_v56 = vld [vmem:[%s7393_s24 + $0x90] sm:$0xff]  }
  0x2e   : > { %6115 = vmatpush3.bf16.msra.mxu0 %v6927_v25  ;;  %v6914_v54 = vld [vmem:[%s7393_s24 + $0x80] sm:$0xff]   ;;  %v7584_v58 = vld [vmem:[%s8517_s3 + $0x238] sm:$0xff]  }
  0x2f   : > { %6116 = vmatprep.subr.bf16.mxu0 %v6929_v27  ;;  %5897 = vmatpush3.bf16.msra.mxu1 %v6930_v30  ;;  %v7579_v57 = vld [vmem:[%s8516_s2] ss:$0 sm:$0xff]  ;;  %v6947_v27 = vld [vmem:[%s8517_s3 + $0xb8] sm:$0xff]   ;;  %v6951_v30 = vld [vmem:[%s8517_s3 + $0xf0] sm:$0xff]  }
  0x30   : > { %5898 = vmatprep.subr.bf16.mxu1 %v6932_v33 }
  0x31   : > { %6732 = vmatmul.mubr.msk.bf16.gmra.mxu0 %vm505_vm2, %v6899_v6 }
  0x32   : > { %6735 = vmatprep.mubr.msk.bf16.mxu0 %vm7300_vm0, %v8524_v0  ;;  %6117 = vmatpush3.bf16.msra.mxu0 %v6931_v29 }
  0x33   : > { %6118 = vmatprep.subr.bf16.mxu0 %v6933_v32  ;;  %5899 = vmatpush3.bf16.msra.mxu1 %v6934_v35 }
  0x34   : > { %5900 = vmatprep.subr.bf16.mxu1 %v6936_v37  ;;  %v6952_v37 = vld [vmem:[%s8517_s3 + $0xb0] sm:$0xff]  }
  0x36   : > { %6119 = vmatpush3.bf16.msra.mxu0 %v6935_v34 }
  0x37   : > { %6120 = vmatprep.subr.bf16.mxu0 %v6937_v36  ;;  %5901 = vmatpush3.bf16.msra.mxu1 %v6938_v39 }
  0x38   : > { %5902 = vmatprep.subr.bf16.mxu1 %v6940_v42  ;;  %v6953_v42 = vld [vmem:[%s8517_s3 + $0xe8] sm:$0xff]  }
  0x39   : > { %6736 = vmatmul.mubr.msk.bf16.gmra.mxu0 %vm505_vm2, %v6900_v10 }
  0x3a   : > { %6739 = vmatprep.mubr.msk.bf16.mxu0 %vm7300_vm0, %v8524_v0  ;;  %6121 = vmatpush3.bf16.msra.mxu0 %v6939_v38 }
  0x3b   : > { %6122 = vmatprep.subr.bf16.mxu0 %v6941_v41  ;;  %5903 = vmatpush3.bf16.msra.mxu1 %v6942_v44  ;;  %v6954_v44 = vld [vmem:[%s8517_s3 + $0xa8] sm:$0xff]  }
  0x3c   : > { %6000 = vmatprep.subr.bf16.mxu1 %v6945_v49  ;;  %v6955_v49 = vld [vmem:[%s8517_s3 + $0xe0] sm:$0xff]  }
  0x3e   : > { %6123 = vmatpush3.bf16.msra.mxu0 %v6943_v43 }
  0x3f   : > { %6124 = vmatprep.subr.bf16.mxu0 %v6946_v45 }
  0x41   : > { %6740 = vmatmul.mubr.msk.bf16.gmra.mxu0 %vm505_vm2, %v6901_v12 }
  0x42   : > { %6743 = vmatprep.mubr.msk.bf16.mxu0 %vm7300_vm0, %v8524_v0  ;;  %6125 = vmatpush3.bf16.msra.mxu0 %v6948_v46 }
  0x43   : > { %6126 = vmatprep.subr.bf16.mxu0 %v6949_v47 }
  0x46   : > { %6127 = vmatpush3.bf16.msra.mxu0 %v6950_v50  ;;  %v6964_v50 = vld [vmem:[%s8517_s3 + $0x230] sm:$0xff]  }
  0x47   : > { %6803 = vmatprep.subr.bf16.mxu0 %v7584_v58 }
  0x49   : > { %6744 = vmatmul.mubr.msk.bf16.gmra.mxu0 %vm505_vm2, %v6902_v13 }
  0x4a   : > { %6747 = vmatprep.mubr.msk.bf16.mxu0 %vm7300_vm0, %v8524_v0 }
  0x51   : > { %6748 = vmatmul.mubr.msk.bf16.gmra.mxu0 %vm505_vm2, %v6903_v14 }
  0x52   : > { %6751 = vmatprep.mubr.msk.bf16.mxu0 %vm7300_vm0, %v8524_v0 }
  0x59   : > { %6752 = vmatmul.mubr.msk.bf16.gmra.mxu0 %vm505_vm2, %v6904_v15 }
  0x5a   : > { %6755 = vmatprep.mubr.msk.bf16.mxu0 %vm7300_vm0, %v8524_v0 }
  0x61   : > { %6756 = vmatmul.mubr.msk.bf16.gmra.mxu0 %vm505_vm2, %v6905_v16 }
  0x62   : > { %6759 = vmatprep.mubr.msk.bf16.mxu0 %vm7300_vm0, %v8524_v0 }
  0x69   : > { %6760 = vmatmul.mubr.msk.bf16.gmra.mxu0 %vm505_vm2, %v6906_v17 }
  0x6a   : > { %6763 = vmatprep.mubr.msk.bf16.mxu0 %vm7300_vm0, %v8524_v0 }
  0x71   : > { %6764 = vmatmul.mubr.msk.bf16.gmra.mxu0 %vm505_vm2, %v6907_v22 }
  0x72   : > { %6767 = vmatprep.mubr.msk.bf16.mxu0 %vm7300_vm0, %v8524_v0 }
  0x79   : > { %6768 = vmatmul.mubr.msk.bf16.gmra.mxu0 %vm505_vm2, %v6908_v31 }
  0x7a   : > { %6771 = vmatprep.mubr.msk.bf16.mxu0 %vm7300_vm0, %v8524_v0 }
  0x81   : > { %6772 = vmatmul.mubr.msk.bf16.gmra.mxu0 %vm505_vm2, %v6909_v40 }
  0x82   : > { %6775 = vmatprep.mubr.msk.bf16.mxu0 %vm7300_vm0, %v8524_v0 }
  0x89   : > { %6776 = vmatmul.mubr.msk.bf16.gmra.mxu0 %vm505_vm2, %v6910_v48 }
  0x8a   : > { %6779 = vmatprep.mubr.msk.bf16.mxu0 %vm7300_vm0, %v8524_v0 }
  0x91   : > { %6780 = vmatmul.mubr.msk.bf16.gmra.mxu0 %vm505_vm2, %v6911_v51 }
  0x92   : > { %6783 = vmatprep.mubr.msk.bf16.mxu0 %vm7300_vm0, %v8524_v0 }
  0x99   : > { %6784 = vmatmul.mubr.msk.bf16.gmra.mxu0 %vm505_vm2, %v6912_v52 }
  0x9a   : > { %6787 = vmatprep.mubr.msk.bf16.mxu0 %vm7300_vm0, %v8524_v0 }
  0xa1   : > { %6788 = vmatmul.mubr.msk.bf16.gmra.mxu0 %vm505_vm2, %v6913_v53 }
  0xa2   : > { %6791 = vmatprep.mubr.msk.bf16.mxu0 %vm7300_vm0, %v8524_v0 }
  0xa9   : > { %6792 = vmatmul.mubr.msk.bf16.gmra.mxu0 %vm505_vm2, %v6914_v54 }
  0xaa   : > { %6795 = vmatprep.mubr.msk.bf16.mxu0 %vm7300_vm0, %v8524_v0 }
  0xb1   : > { %6796 = vmatmul.mubr.msk.bf16.gmra.mxu0 %vm505_vm2, %v6915_v55 }
  0xb2   : > { %6799 = vmatprep.mubr.msk.bf16.mxu0 %vm7300_vm0, %v8524_v0 }
  0xb9   : > { %6800 = vmatmul.mubr.msk.bf16.gmra.mxu0 %vm505_vm2, %v6944_v56  ;;  %v6956_v56 = vld [vmem:[%s8517_s3 + $0xa0] sm:$0xff]  }
  0xe9   : > { %v601_v59 = vpop.f32.mrf.mxu0 }
  0xea   : > { %v602_v61 = vadd.f32 %v7579_v57, %v601_v59 }
  0xeb   : > { %v6729_v60 = vpop.f32.mrf.mxu0 }
  0xec   : > { %v752_v2 = vmax.f32 %v602_v61, 0.0  ;;  %v6957_v61 = vld [vmem:[%s8517_s3 + $0xd8] sm:$0xff]  }
  0xed   : > { %v604_v62 = vpop.f32.mrf.mxu0 }
  0xee   : > { %v605_v63 = vadd.f32 %v7579_v57, %v604_v62 }
  0xef   : > { %v6730_v1 = vpop.f32.mrf.mxu0 }
  0xf0   : > { %v753_v3 = vmax.f32 %v605_v63, 0.0 }
  0xf1   : > { %v609_v4 = vpop.f32.mrf.mxu0 }
  0xf2   : > { %v790_v5 = vpack.c.bf16 %v753_v3, %v752_v2  ;;  %v610_v6 = vadd.f32 %v7579_v57, %v609_v4  ;;  %v6958_v4 = vld [vmem:[%s8517_s3 + $0x98] sm:$0xff]  }
  0xf3   : > { %v6733_v7 = vpop.f32.mrf.mxu0 }
  0xf4   : > { %v813_v8 = vshll.u32 %v790_v5, 16  ;;  %v754_v11 = vmax.f32 %v610_v6, 0.0  ;;  %v811_v18 = vshrl.u32 %v790_v5, 16  ;;  %v976_v22 = vrot.slane %v790_v5, 1 }
  0xf5   : > { %v612_v9 = vpop.f32.mrf.mxu0 }
  0xf6   : > { %v613_v10 = vadd.f32 %v7579_v57, %v612_v9  ;;  %v815_v14 = vrot.slane %v813_v8, 1  ;;  %v6959_v9 = vld [vmem:[%s8517_s3 + $0xd0] sm:$0xff]  }
  0xf7   : > { %v6734_v12 = vpop.f32.mrf.mxu0 }
  0xf8   : > { %v755_v13 = vmax.f32 %v613_v10, 0.0  ;;  %v816_v25 = vor.u32 %v815_v14, %v811_v18  ;;  %v6968_v10 = vld [vmem:[%s8517_s3 + $0x220] sm:$0xff]  }
  0xf9   : > { %v617_v15 = vpop.f32.mrf.mxu0 }
  0xfa   : > { %v7591_v16 = vpack.c.bf16 %v755_v13, %v754_v11  ;;  %v618_v19 = vadd.f32 %v7579_v57, %v617_v15 }
  0xfb   : > { %v6737_v17 = vpop.f32.mrf.mxu0 }
  0xfc   : > { %v818_v20 = vshll.u32 %v7591_v16, 16  ;;  %v977_v21 = vrot.slane %v7591_v16, 1  ;;  %v756_v31 = vmax.f32 %v618_v19, 0.0  ;;  %v822_v40 = vshrl.u32 %v7591_v16, 16  ;;  %v6960_v17 = vld [vmem:[%s8517_s3 + $0x90] sm:$0xff]   ;;  %v6961_v19 = vld [vmem:[%s8517_s3 + $0xc8] sm:$0xff]  }
  0xfd   : > { %v620_v23 = vpop.f32.mrf.mxu0 }
  0xfe   : > { %v621_v24 = vadd.f32 %v7579_v57, %v620_v23  ;;  %v820_v26 = vrot.slane %v818_v20, 1  ;;  %v7601_v28 = vsel %vm975_vm4, %v976_v22, %v977_v21 }
  0xff   : > { %v6738_v29 = vpop.f32.mrf.mxu0 }
 0x100   : > { %v757_v32 = vmax.f32 %v621_v24, 0.0  ;;  %v821_v33 = vsel %vm809_vm3, %v816_v25, %v820_v26  ;;  %v824_v47 = vor.u32 %v822_v40, %v820_v26  ;;  %v6969_v25 = vld [vmem:[%s8517_s3 + $0x218] sm:$0xff]  }
 0x101   : > { %v625_v34 = vpop.f32.mrf.mxu0  ;;  %1666 = vmatprep.mubr.bf16.mxu1 %v821_v33  ;;  %v6965_v33 = vld [vmem:[%s8517_s3 + $0xc0] sm:$0xff]  }
 0x102   : > { %v7607_v35 = vpack.c.bf16 %v757_v32, %v756_v31  ;;  %1667 = vmatmul.mubr.bf16.vlgmr.msra.gmra.mxu1 %v790_v5  ;;  %v626_v38 = vadd.f32 %v7579_v57, %v625_v34  ;;  %v6970_v34 = vld [vmem:[%s8517_s3 + $0x210] sm:$0xff]  }
 0x103   : > { %6001 = vmatpush3.bf16.msra.mxu1 %v6947_v27  ;;  %v6741_v36 = vpop.f32.mrf.mxu0  ;;  %v6962_v27 = vld [vmem:[%s8517_s3 + $0x88] sm:$0xff]  }
 0x104   : > { %v979_v39 = vrot.slane %v7607_v35, 1  ;;  %v826_v41 = vshll.u32 %v7607_v35, 16  ;;  %6002 = vmatprep.subr.bf16.mxu1 %v6951_v30  ;;  %v758_v52 = vmax.f32 %v626_v38, 0.0  ;;  %v830_v1 = vshrl.u32 %v7607_v35, 16 }
 0x105   : > { %v628_v43 = vpop.f32.mrf.mxu0 }
 0x106   : > { %v629_v45 = vadd.f32 %v7579_v57, %v628_v43  ;;  %v7624_v46 = vsel %vm975_vm4, %v977_v21, %v979_v39  ;;  %v828_v48 = vrot.slane %v826_v41, 1  ;;  %v6967_v41 = vld [vmem:[%s8517_s3 + $0x80] sm:$0xff]  }
 0x107   : > { %v6742_v51 = vpop.f32.mrf.mxu0  ;;  %1988 = vmatprep.mubr.bf16.mxu0 %v7624_v46  ;;  %6003 = vmatpush3.bf16.msra.mxu1 %v6952_v37 }
 0x108   : > { %v759_v53 = vmax.f32 %v629_v45, 0.0  ;;  %v829_v54 = vsel %vm809_vm3, %v824_v47, %v828_v48  ;;  %6004 = vmatprep.subr.bf16.mxu1 %v6953_v42  ;;  %v832_v7 = vor.u32 %v830_v1, %v828_v48 }
 0x109   : > { %v633_v55 = vpop.f32.mrf.mxu0  ;;  %1674 = vmatprep.mubr.bf16.mxu1 %v829_v54  ;;  %1989 = vmatmul.mubr.bf16.vlgmr.msra.gmra.mxu0 %v829_v54 }
 0x10a   : > { %v7637_v59 = vpack.c.bf16 %v759_v53, %v758_v52  ;;  %1675 = vmatmul.mubr.bf16.gmra.mxu1 %v7591_v16  ;;  %6804 = vmatpush3.bf16.msra.mxu0 %v7584_v58  ;;  %v634_v62 = vadd.f32 %v7579_v57, %v633_v55  ;;  %v6966_v58 = vld [vmem:[%s8517_s3 + $0x228] sm:$0xff]  }
 0x10b   : > { %v6745_v60 = vpop.f32.mrf.mxu0  ;;  %6005 = vmatpush3.bf16.msra.mxu1 %v6954_v44  ;;  %6805 = vmatprep.subr.bf16.mxu0 %v6964_v50  ;;  %v6972_v44 = vld [vmem:[%s8517_s3 + $0x208] sm:$0xff]  }
 0x10c   : > { %v981_v63 = vrot.slane %v7637_v59, 1  ;;  %v834_v2 = vshll.u32 %v7637_v59, 16  ;;  %6006 = vmatprep.subr.bf16.mxu1 %v6955_v49  ;;  %v760_v12 = vmax.f32 %v634_v62, 0.0  ;;  %v838_v23 = vshrl.u32 %v7637_v59, 16 }
 0x10d   : > { %v636_v3 = vpop.f32.mrf.mxu0 }
 0x10e   : > { %v637_v5 = vadd.f32 %v7579_v57, %v636_v3  ;;  %v7656_v6 = vsel %vm975_vm4, %v979_v39, %v981_v63  ;;  %v836_v8 = vrot.slane %v834_v2, 1  ;;  %6806 = vmatpush3.bf16.msra.mxu0 %v6964_v50  ;;  %v6971_v50 = vld [vmem:[%s8517_s3 + $0x1f8] sm:$0xff]  }
 0x10f   : > { %v6746_v11 = vpop.f32.mrf.mxu0  ;;  %1996 = vmatprep.mubr.bf16.mxu0 %v7656_v6  ;;  %6007 = vmatpush3.bf16.msra.mxu1 %v6956_v56  ;;  %v6974_v56 = vld [vmem:[%s8517_s3 + $0x200] sm:$0xff]  }
 0x110   : > { %v761_v13 = vmax.f32 %v637_v5, 0.0  ;;  %v7666_v14 = vsel %vm809_vm3, %v832_v7, %v836_v8  ;;  %6008 = vmatprep.subr.bf16.mxu1 %v6957_v61  ;;  %6807 = vmatprep.subr.bf16.mxu0 %v6966_v58  ;;  %v840_v31 = vor.u32 %v838_v23, %v836_v8 }
 0x111   : > { %v641_v15 = vpop.f32.mrf.mxu0  ;;  %1682 = vmatprep.mubr.bf16.mxu1 %v7666_v14  ;;  %1997 = vmatmul.mubr.bf16.gmra.mxu0 %v7666_v14 }
 0x112   : > { %v7673_v18 = vpack.c.bf16 %v761_v13, %v760_v12  ;;  %1683 = vmatmul.mubr.bf16.gmra.mxu1 %v7607_v35  ;;  %6808 = vmatpush3.bf16.msra.mxu0 %v6966_v58  ;;  %v642_v21 = vadd.f32 %v7579_v57, %v641_v15 }
 0x113   : > { %v6749_v20 = vpop.f32.mrf.mxu0  ;;  %6009 = vmatpush3.bf16.msra.mxu1 %v6958_v4  ;;  %6809 = vmatprep.subr.bf16.mxu0 %v6968_v10 }
 0x114   : > { %v983_v22 = vrot.slane %v7673_v18, 1  ;;  %v842_v24 = vshll.u32 %v7673_v18, 16  ;;  %6010 = vmatprep.subr.bf16.mxu1 %v6959_v9  ;;  %v762_v37 = vmax.f32 %v642_v21, 0.0  ;;  %v846_v48 = vshrl.u32 %v7673_v18, 16 }
 0x115   : > { %v644_v26 = vpop.f32.mrf.mxu0 }
 0x116   : > { %v645_v29 = vadd.f32 %v7579_v57, %v644_v26  ;;  %v7691_v30 = vsel %vm975_vm4, %v981_v63, %v983_v22  ;;  %v844_v32 = vrot.slane %v842_v24, 1  ;;  %6810 = vmatpush3.bf16.msra.mxu0 %v6968_v10 }
 0x117   : > { %v6750_v36 = vpop.f32.mrf.mxu0  ;;  %2004 = vmatprep.mubr.bf16.mxu0 %v7691_v30  ;;  %6011 = vmatpush3.bf16.msra.mxu1 %v6960_v17 }
 0x118   : > { %v763_v38 = vmax.f32 %v645_v29, 0.0  ;;  %v7701_v39 = vsel %vm809_vm3, %v840_v31, %v844_v32  ;;  %6012 = vmatprep.subr.bf16.mxu1 %v6961_v19  ;;  %6811 = vmatprep.subr.bf16.mxu0 %v6969_v25  ;;  %v848_v54 = vor.u32 %v846_v48, %v844_v32 }
 0x119   : > { %v649_v40 = vpop.f32.mrf.mxu0  ;;  %1690 = vmatprep.mubr.bf16.mxu1 %v7701_v39  ;;  %2005 = vmatmul.mubr.bf16.gmra.mxu0 %v7701_v39 }
 0x11a   : > { %v7708_v42 = vpack.c.bf16 %v763_v38, %v762_v37  ;;  %1691 = vmatmul.mubr.bf16.gmra.mxu1 %v7637_v59  ;;  %6812 = vmatpush3.bf16.msra.mxu0 %v6969_v25  ;;  %v650_v45 = vadd.f32 %v7579_v57, %v649_v40 }
 0x11b   : > { %v6753_v43 = vpop.f32.mrf.mxu0  ;;  %6013 = vmatpush3.bf16.msra.mxu1 %v6962_v27  ;;  %6813 = vmatprep.subr.bf16.mxu0 %v6970_v34 }
 0x11c   : > { %v985_v47 = vrot.slane %v7708_v42, 1  ;;  %v850_v49 = vshll.u32 %v7708_v42, 16  ;;  %6014 = vmatprep.subr.bf16.mxu1 %v6965_v33  ;;  %v764_v61 = vmax.f32 %v650_v45, 0.0  ;;  %v854_v5 = vshrl.u32 %v7708_v42, 16 }
 0x11d   : > { %v652_v51 = vpop.f32.mrf.mxu0 }
 0x11e   : > { %v653_v52 = vadd.f32 %v7579_v57, %v652_v51  ;;  %v7723_v53 = vsel %vm975_vm4, %v983_v22, %v985_v47  ;;  %v852_v55 = vrot.slane %v850_v49, 1  ;;  %6814 = vmatpush3.bf16.msra.mxu0 %v6970_v34 }
 0x11f   : > { %v6754_v60 = vpop.f32.mrf.mxu0  ;;  %2012 = vmatprep.mubr.bf16.mxu0 %v7723_v53  ;;  %6015 = vmatpush3.bf16.msra.mxu1 %v6967_v41 }
 0x120   : > { %v765_v62 = vmax.f32 %v653_v52, 0.0  ;;  %v7730_v63 = vsel %vm809_vm3, %v848_v54, %v852_v55  ;;  %6224 = vmatprep.subr.bf16.mxu1 %v6971_v50  ;;  %6815 = vmatprep.subr.bf16.mxu0 %v6972_v44  ;;  %v856_v11 = vor.u32 %v854_v5, %v852_v55 }
 0x121   : > { %v657_v1 = vpop.f32.mrf.mxu0  ;;  %1698 = vmatprep.mubr.bf16.mxu1 %v7730_v63  ;;  %2013 = vmatmul.mubr.bf16.gmra.mxu0 %v7730_v63 }
 0x122   : > { %v7734_v2 = vpack.c.bf16 %v765_v62, %v764_v61  ;;  %1699 = vmatmul.mubr.bf16.gmra.mxu1 %v7673_v18  ;;  %6816 = vmatpush3.bf16.msra.mxu0 %v6972_v44  ;;  %v658_v3 = vadd.f32 %v7579_v57, %v657_v1 }
 0x123   : > { %v6757_v58 = vpop.f32.mrf.mxu0  ;;  %6817 = vmatprep.subr.bf16.mxu0 %v6974_v56 }
 0x124   : > { %v987_v4 = vrot.slane %v7734_v2, 1  ;;  %v858_v7 = vshll.u32 %v7734_v2, 16  ;;  %v766_v15 = vmax.f32 %v658_v3, 0.0  ;;  %v862_v25 = vshrl.u32 %v7734_v2, 16 }
 0x125   : > { %v660_v8 = vpop.f32.mrf.mxu0 }
 0x126   : > { %v661_v9 = vadd.f32 %v7579_v57, %v660_v8  ;;  %v7743_v10 = vsel %vm975_vm4, %v985_v47, %v987_v4  ;;  %v860_v12 = vrot.slane %v858_v7, 1  ;;  %6818 = vmatpush3.bf16.msra.mxu0 %v6974_v56 }
 0x127   : > { %v6758_v13 = vpop.f32.mrf.mxu0  ;;  %2020 = vmatprep.mubr.bf16.mxu0 %v7743_v10 }
 0x128   : > { %v767_v17 = vmax.f32 %v661_v9, 0.0  ;;  %v7747_v19 = vsel %vm809_vm3, %v856_v11, %v860_v12  ;;  %v864_v32 = vor.u32 %v862_v25, %v860_v12 }
 0x129   : > { %v665_v20 = vpop.f32.mrf.mxu0  ;;  %1706 = vmatprep.mubr.bf16.mxu1 %v7747_v19  ;;  %2021 = vmatmul.mubr.bf16.gmra.mxu0 %v7747_v19 }
 0x12a   : > { %v7751_v21 = vpack.c.bf16 %v767_v17, %v766_v15  ;;  %1707 = vmatmul.mubr.bf16.gmra.mxu1 %v7708_v42  ;;  %v666_v23 = vadd.f32 %v7579_v57, %v665_v20 }
 0x12b   : > { %v6761_v22 = vpop.f32.mrf.mxu0 }
 0x12c   : > { %v989_v24 = vrot.slane %v7751_v21, 1  ;;  %v866_v26 = vshll.u32 %v7751_v21, 16  ;;  %v768_v36 = vmax.f32 %v666_v23, 0.0  ;;  %v870_v47 = vshrl.u32 %v7751_v21, 16 }
 0x12d   : > { %v668_v27 = vpop.f32.mrf.mxu0 }
 0x12e   : > { %v669_v29 = vadd.f32 %v7579_v57, %v668_v27  ;;  %v7760_v31 = vsel %vm975_vm4, %v987_v4, %v989_v24  ;;  %v868_v33 = vrot.slane %v866_v26, 1 }
 0x12f   : > { %v6762_v34 = vpop.f32.mrf.mxu0  ;;  %2028 = vmatprep.mubr.bf16.mxu0 %v7760_v31 }
 0x130   : > { %v769_v37 = vmax.f32 %v669_v29, 0.0  ;;  %v7764_v38 = vsel %vm809_vm3, %v864_v32, %v868_v33  ;;  %v872_v52 = vor.u32 %v870_v47, %v868_v33 }
 0x131   : > { %v673_v40 = vpop.f32.mrf.mxu0  ;;  %1714 = vmatprep.mubr.bf16.mxu1 %v7764_v38  ;;  %2029 = vmatmul.mubr.bf16.gmra.mxu0 %v7764_v38 }
 0x132   : > { %v7768_v41 = vpack.c.bf16 %v769_v37, %v768_v36  ;;  %1715 = vmatmul.mubr.bf16.gmra.mxu1 %v7734_v2  ;;  %v674_v44 = vadd.f32 %v7579_v57, %v673_v40 }
 0x133   : > { %v6765_v43 = vpop.f32.mrf.mxu0 }
 0x134   : > { %v991_v45 = vrot.slane %v7768_v41, 1  ;;  %v874_v48 = vshll.u32 %v7768_v41, 16  ;;  %v770_v56 = vmax.f32 %v674_v44, 0.0  ;;  %v878_v5 = vshrl.u32 %v7768_v41, 16 }
 0x135   : > { %v676_v49 = vpop.f32.mrf.mxu0 }
 0x136   : > { %v677_v50 = vadd.f32 %v7579_v57, %v676_v49  ;;  %v7777_v51 = vsel %vm975_vm4, %v989_v24, %v991_v45  ;;  %v876_v54 = vrot.slane %v874_v48, 1 }
 0x137   : > { %v6766_v55 = vpop.f32.mrf.mxu0  ;;  %2036 = vmatprep.mubr.bf16.mxu0 %v7777_v51 }
 0x138   : > { %v771_v60 = vmax.f32 %v677_v50, 0.0  ;;  %v7781_v61 = vsel %vm809_vm3, %v872_v52, %v876_v54  ;;  %v880_v12 = vor.u32 %v878_v5, %v876_v54 }
 0x139   : > { %v681_v62 = vpop.f32.mrf.mxu0  ;;  %1722 = vmatprep.mubr.bf16.mxu1 %v7781_v61  ;;  %2037 = vmatmul.mubr.bf16.gmra.mxu0 %v7781_v61 }
 0x13a   : > { %v7785_v1 = vpack.c.bf16 %v771_v60, %v770_v56  ;;  %1723 = vmatmul.mubr.bf16.gmra.mxu1 %v7751_v21  ;;  %v682_v3 = vadd.f32 %v7579_v57, %v681_v62 }
 0x13b   : > { %v6769_v58 = vpop.f32.mrf.mxu0 }
 0x13c   : > { %v993_v4 = vrot.slane %v7785_v1, 1  ;;  %v882_v7 = vshll.u32 %v7785_v1, 16  ;;  %v772_v17 = vmax.f32 %v682_v3, 0.0  ;;  %v886_v29 = vshrl.u32 %v7785_v1, 16 }
 0x13d   : > { %v684_v8 = vpop.f32.mrf.mxu0 }
 0x13e   : > { %v685_v9 = vadd.f32 %v7579_v57, %v684_v8  ;;  %v7794_v11 = vsel %vm975_vm4, %v991_v45, %v993_v4  ;;  %v884_v13 = vrot.slane %v882_v7, 1 }
 0x13f   : > { %v6770_v15 = vpop.f32.mrf.mxu0  ;;  %2044 = vmatprep.mubr.bf16.mxu0 %v7794_v11 }
 0x140   : > { %v773_v20 = vmax.f32 %v685_v9, 0.0  ;;  %v7798_v22 = vsel %vm809_vm3, %v880_v12, %v884_v13  ;;  %v888_v37 = vor.u32 %v886_v29, %v884_v13 }
 0x141   : > { %v689_v23 = vpop.f32.mrf.mxu0  ;;  %1730 = vmatprep.mubr.bf16.mxu1 %v7798_v22  ;;  %2045 = vmatmul.mubr.bf16.gmra.mxu0 %v7798_v22 }
 0x142   : > { %v7802_v24 = vpack.c.bf16 %v773_v20, %v772_v17  ;;  %1731 = vmatmul.mubr.bf16.gmra.mxu1 %v7768_v41  ;;  %v690_v26 = vadd.f32 %v7579_v57, %v689_v23 }
 0x143   : > { %v6773_v25 = vpop.f32.mrf.mxu0 }
 0x144   : > { %v995_v27 = vrot.slane %v7802_v24, 1  ;;  %v890_v32 = vshll.u32 %v7802_v24, 16  ;;  %v774_v44 = vmax.f32 %v690_v26, 0.0  ;;  %v894_v55 = vshrl.u32 %v7802_v24, 16 }
 0x145   : > { %v692_v33 = vpop.f32.mrf.mxu0 }
 0x146   : > { %v693_v34 = vadd.f32 %v7579_v57, %v692_v33  ;;  %v7811_v36 = vsel %vm975_vm4, %v993_v4, %v995_v27  ;;  %v892_v40 = vrot.slane %v890_v32, 1 }
 0x147   : > { %v6774_v43 = vpop.f32.mrf.mxu0  ;;  %2052 = vmatprep.mubr.bf16.mxu0 %v7811_v36 }
 0x148   : > { %v775_v45 = vmax.f32 %v693_v34, 0.0  ;;  %v7815_v47 = vsel %vm809_vm3, %v888_v37, %v892_v40  ;;  %v896_v3 = vor.u32 %v894_v55, %v892_v40 }
 0x149   : > { %v697_v48 = vpop.f32.mrf.mxu0  ;;  %1738 = vmatprep.mubr.bf16.mxu1 %v7815_v47  ;;  %2053 = vmatmul.mubr.bf16.gmra.mxu0 %v7815_v47 }
 0x14a   : > { %v7819_v49 = vpack.c.bf16 %v775_v45, %v774_v44  ;;  %1739 = vmatmul.mubr.bf16.gmra.mxu1 %v7785_v1  ;;  %v698_v52 = vadd.f32 %v7579_v57, %v697_v48 }
 0x14b   : > { %v6777_v50 = vpop.f32.mrf.mxu0 }
 0x14c   : > { %v997_v54 = vrot.slane %v7819_v49, 1  ;;  %v898_v56 = vshll.u32 %v7819_v49, 16  ;;  %v776_v7 = vmax.f32 %v698_v52, 0.0  ;;  %v902_v23 = vshrl.u32 %v7819_v49, 16 }
 0x14d   : > { %v700_v60 = vpop.f32.mrf.mxu0 }
 0x14e   : > { %v701_v62 = vadd.f32 %v7579_v57, %v700_v60  ;;  %v7828_v58 = vsel %vm975_vm4, %v995_v27, %v997_v54  ;;  %v900_v4 = vrot.slane %v898_v56, 1 }
 0x14f   : > { %v6778_v5 = vpop.f32.mrf.mxu0  ;;  %2060 = vmatprep.mubr.bf16.mxu0 %v7828_v58 }
 0x150   : > { %v777_v8 = vmax.f32 %v701_v62, 0.0  ;;  %v7832_v9 = vsel %vm809_vm3, %v896_v3, %v900_v4  ;;  %v904_v32 = vor.u32 %v902_v23, %v900_v4 }
 0x151   : > { %v705_v12 = vpop.f32.mrf.mxu0  ;;  %1746 = vmatprep.mubr.bf16.mxu1 %v7832_v9  ;;  %2061 = vmatmul.mubr.bf16.gmra.mxu0 %v7832_v9 }
 0x152   : > { %v7836_v13 = vpack.c.bf16 %v777_v8, %v776_v7  ;;  %1747 = vmatmul.mubr.bf16.gmra.mxu1 %v7802_v24  ;;  %v706_v17 = vadd.f32 %v7579_v57, %v705_v12 }
 0x153   : > { %v6781_v15 = vpop.f32.mrf.mxu0 }
 0x154   : > { %v999_v20 = vrot.slane %v7836_v13, 1  ;;  %v906_v25 = vshll.u32 %v7836_v13, 16  ;;  %v778_v37 = vmax.f32 %v706_v17, 0.0 }
 0x155   : > { %v708_v26 = vpop.f32.mrf.mxu0 }
 0x156   : > { %v709_v27 = vadd.f32 %v7579_v57, %v708_v26  ;;  %v7845_v29 = vsel %vm975_vm4, %v997_v54, %v999_v20  ;;  %v908_v33 = vrot.slane %v906_v25, 1  ;;  %v910_v54 = vshrl.u32 %v7836_v13, 16 }
 0x157   : > { %v6782_v34 = vpop.f32.mrf.mxu0  ;;  %2068 = vmatprep.mubr.bf16.mxu0 %v7845_v29 }
 0x158   : > { %v779_v40 = vmax.f32 %v709_v27, 0.0  ;;  %v7849_v43 = vsel %vm809_vm3, %v904_v32, %v908_v33  ;;  %v912_v3 = vor.u32 %v910_v54, %v908_v33 }
 0x159   : > { %v713_v44 = vpop.f32.mrf.mxu0  ;;  %1754 = vmatprep.mubr.bf16.mxu1 %v7849_v43  ;;  %2069 = vmatmul.mubr.bf16.gmra.mxu0 %v7849_v43 }
 0x15a   : > { %v7853_v45 = vpack.c.bf16 %v779_v40, %v778_v37  ;;  %1755 = vmatmul.mubr.bf16.gmra.mxu1 %v7819_v49  ;;  %v714_v50 = vadd.f32 %v7579_v57, %v713_v44 }
 0x15b   : > { %v6785_v48 = vpop.f32.mrf.mxu0 }
 0x15c   : > { %v1001_v52 = vrot.slane %v7853_v45, 1  ;;  %v914_v55 = vshll.u32 %v7853_v45, 16  ;;  %v780_v7 = vmax.f32 %v714_v50, 0.0  ;;  %v918_v26 = vshrl.u32 %v7853_v45, 16 }
 0x15d   : > { %v716_v56 = vpop.f32.mrf.mxu0 }
 0x15e   : > { %v717_v60 = vadd.f32 %v7579_v57, %v716_v56  ;;  %v7862_v62 = vsel %vm975_vm4, %v999_v20, %v1001_v52  ;;  %v916_v4 = vrot.slane %v914_v55, 1  ;;  %v7876_v20 = vld [vmem:[%s8516_s2] ss:$0 sm:$0xff] }
 0x15f   : > { %v6786_v5 = vpop.f32.mrf.mxu0  ;;  %2076 = vmatprep.mubr.bf16.mxu0 %v7862_v62 }
 0x160   : > { %v781_v8 = vmax.f32 %v717_v60, 0.0  ;;  %v7866_v12 = vsel %vm809_vm3, %v912_v3, %v916_v4  ;;  %v920_v37 = vor.u32 %v918_v26, %v916_v4 }
 0x161   : > { %v721_v15 = vpop.f32.mrf.mxu0  ;;  %1762 = vmatprep.mubr.bf16.mxu1 %v7866_v12  ;;  %2077 = vmatmul.mubr.bf16.gmra.mxu0 %v7866_v12 }
 0x162   : > { %v7870_v17 = vpack.c.bf16 %v781_v8, %v780_v7  ;;  %1763 = vmatmul.mubr.bf16.gmra.mxu1 %v7836_v13  ;;  %v722_v23 = vadd.f32 %v7876_v20, %v721_v15 }
 0x163   : > { %v6789_v57 = vpop.f32.mrf.mxu0 }
 0x164   : > { %v1003_v25 = vrot.slane %v7870_v17, 1  ;;  %v922_v27 = vshll.u32 %v7870_v17, 16  ;;  %v782_v48 = vmax.f32 %v722_v23, 0.0  ;;  %v926_v4 = vshrl.u32 %v7870_v17, 16 }
 0x165   : > { %v724_v32 = vpop.f32.mrf.mxu0 }
 0x166   : > { %v725_v33 = vadd.f32 %v7876_v20, %v724_v32  ;;  %v7884_v34 = vsel %vm975_vm4, %v1001_v52, %v1003_v25  ;;  %v924_v40 = vrot.slane %v922_v27, 1 }
 0x167   : > { %v6790_v44 = vpop.f32.mrf.mxu0  ;;  %2084 = vmatprep.mubr.bf16.mxu0 %v7884_v34 }
 0x168   : > { %v783_v50 = vmax.f32 %v725_v33, 0.0  ;;  %v7888_v54 = vsel %vm809_vm3, %v920_v37, %v924_v40  ;;  %v928_v57 = vor.u32 %v926_v4, %v924_v40 }
 0x169   : > { %v729_v55 = vpop.f32.mrf.mxu0  ;;  %1770 = vmatprep.mubr.bf16.mxu1 %v7888_v54  ;;  %2085 = vmatmul.mubr.bf16.gmra.mxu0 %v7888_v54 }
 0x16a   : > { %v7892_v56 = vpack.c.bf16 %v783_v50, %v782_v48  ;;  %1771 = vmatmul.mubr.bf16.gmra.mxu1 %v7853_v45  ;;  %v730_v60 = vadd.f32 %v7876_v20, %v729_v55 }
 0x16b   : > { %v6793_v52 = vpop.f32.mrf.mxu0 }
 0x16c   : > { %8532 = vst [vmem:[#allocation5_spill] sm:$0xff] %v7892_v56  ;;  %v1005_v3 = vrot.slane %v7892_v56, 1  ;;  %v930_v5 = vshll.u32 %v7892_v56, 16  ;;  %v784_v27 = vmax.f32 %v730_v60, 0.0  ;;  %v934_v48 = vshrl.u32 %v7892_v56, 16 }
 0x16d   : > { %v732_v7 = vpop.f32.mrf.mxu0 }
 0x16e   : > { %v733_v8 = vadd.f32 %v7876_v20, %v732_v7  ;;  %v7901_v15 = vsel %vm975_vm4, %v1003_v25, %v1005_v3  ;;  %v932_v23 = vrot.slane %v930_v5, 1 }
 0x16f   : > { %v6794_v26 = vpop.f32.mrf.mxu0  ;;  %2092 = vmatprep.mubr.bf16.mxu0 %v7901_v15 }
 0x170   : > { %v785_v32 = vmax.f32 %v733_v8, 0.0  ;;  %v7905_v33 = vsel %vm809_vm3, %v928_v57, %v932_v23  ;;  %v936_v60 = vor.u32 %v934_v48, %v932_v23 }
 0x171   : > { %v737_v37 = vpop.f32.mrf.mxu0  ;;  %1778 = vmatprep.mubr.bf16.mxu1 %v7905_v33  ;;  %2093 = vmatmul.mubr.bf16.gmra.mxu0 %v7905_v33 }
 0x172   : > { %v7909_v44 = vpack.c.bf16 %v785_v32, %v784_v27  ;;  %v738_v25 = vadd.f32 %v7876_v20, %v737_v37  ;;  %1779 = vmatmul.mubr.bf16.gmra.mxu1 %v7870_v17 }
 0x173   : > { %v6797_v40 = vpop.f32.mrf.mxu0 }
 0x174   : > { %8533 = vst [vmem:[#allocation6_spill] sm:$0xff] %v7909_v44  ;;  %v1007_v50 = vrot.slane %v7909_v44, 1  ;;  %v938_v55 = vshll.u32 %v7909_v44, 16  ;;  %v786_v4 = vmax.f32 %v738_v25, 0.0  ;;  %v1025_v25 = vshrl.u32 %v7909_v44, 16 }
 0x175   : > { %v740_v52 = vpop.f32.mrf.mxu0 }
 0x176   : > { %v741_v5 = vadd.f32 %v7876_v20, %v740_v52  ;;  %v7918_v7 = vsel %vm975_vm4, %v1005_v3, %v1007_v50  ;;  %v940_v8 = vrot.slane %v938_v55, 1 }
 0x177   : > { %2100 = vmatprep.mubr.bf16.mxu0 %v7918_v7  ;;  %v6798_v57 = vpop.f32.mrf.mxu0 }
 0x178   : > { %v787_v26 = vmax.f32 %v741_v5, 0.0  ;;  %v7922_v27 = vsel %vm809_vm3, %v936_v60, %v940_v8  ;;  %v1027_v52 = vor.u32 %v1025_v25, %v940_v8  ;;  %v6975_v57 = vld [vmem:[%s8517_s3 + $0x1f0] sm:$0xff]   ;;  %v6977_v8 = vld [vmem:[%s8517_s3 + $0x1e8] sm:$0xff]   ;;  %v6981_v25 = vld [vmem:[%s8517_s3 + $0x1d8] sm:$0xff]  }
 0x179   : > { %8534 = vst [vmem:[#allocation7_spill] sm:$0xff] %v7922_v27  ;;  %1786 = vmatprep.mubr.bf16.mxu1 %v7922_v27  ;;  %2101 = vmatmul.mubr.bf16.gmra.mxu0 %v7922_v27  ;;  %v7926_v32 = vpop.f32.mrf.mxu0 }
 0x17a   : > { %v7928_v23 = vpack.c.bf16 %v787_v26, %v786_v4  ;;  %1787 = vmatmul.mubr.bf16.gmra.mxu1 %v7892_v56  ;;  %v6978_v26 = vld [vmem:[%s8517_s3 + $0x1a8] sm:$0xff]  }
 0x17b   : > { %1827 = vmatprep.mubr.bf16.mxu1 %v7591_v16  ;;  %v6801_v3 = vpop.f32.mrf.mxu0  ;;  %v6973_v16 = vld [vmem:[%s8517_s3 + $0x1b8] sm:$0xff]  }
 0x17c   : > { %8535 = vst [vmem:[#allocation8_spill] sm:$0xff] %v7928_v23  ;;  %v1035_v37 = vrot.slane %v7928_v23, 1  ;;  %v1029_v40 = vshll.u32 %v7928_v23, 16  ;;  %v6980_v3 = vld [vmem:[%s8517_s3 + $0x1a0] sm:$0xff]  }
 0x17d   : > { %v748_v48 = vpop.f32.mrf.mxu0 }
 0x17e   : > { %v7938_v55 = vsel %vm975_vm4, %v1007_v50, %v1035_v37  ;;  %v7940_v60 = vrot.slane %v1029_v40, 1  ;;  %v6976_v50 = vld [vmem:[%s8517_s3 + $0x1b0] sm:$0xff]   ;;  %v6982_v40 = vld [vmem:[%s8517_s3 + $0x198] sm:$0xff]  }
 0x17f   : > { %2108 = vmatprep.mubr.bf16.mxu0 %v7938_v55  ;;  %v6802_v4 = vpop.f32.mrf.mxu0 }
 0x180   : > { %v7948_v5 = vsel %vm809_vm3, %v1027_v52, %v7940_v60  ;;  %v6984_v52 = vld [vmem:[%s8517_s3 + $0x190] sm:$0xff]   ;;  %v6986_v4 = vld [vmem:[%s8517_s3 + $0x188] sm:$0xff]  }
 0x181   : > { %8536 = vst [vmem:[#allocation9_spill] sm:$0xff] %v7948_v5  ;;  %2109 = vmatmul.mubr.bf16.gmra.mxu0 %v7948_v5 }
 0x182   : > { %1828 = vmatmul.mubr.bf16.vlgmr.msra.gmra.mxu1 %v7601_v28  ;;  %6819 = vmatprep.mubr.bf16.mxu0 %v7656_v6  ;;  %v6979_v28 = vld [vmem:[%s8517_s3 + $0x1e0] sm:$0xff]  }
 0x183   : > { %6225 = vmatpush3.bf16.msra.mxu1 %v6973_v16  ;;  %1835 = vmatprep.mubr.bf16.mxu1 %v7607_v35  ;;  %v6985_v16 = vld [vmem:[%s8517_s3 + $0x1c8] sm:$0xff]  }
 0x184   : > { %6226 = vmatprep.subr.bf16.mxu1 %v6975_v57  ;;  %v6988_v57 = vld [vmem:[%s8517_s3 + $0x180] sm:$0xff]  }
 0x187   : > { %6227 = vmatpush3.bf16.msra.mxu1 %v6976_v50  ;;  %v749_v50 = vadd.f32 %v7876_v20, %v748_v48 }
 0x188   : > { %6228 = vmatprep.subr.bf16.mxu1 %v6977_v8 }
 0x189   : > { %6820 = vmatmul.mubr.bf16.vlgmr.msra.gmra.mxu0 %v7691_v30 }
 0x18a   : > { %1836 = vmatmul.mubr.bf16.gmra.mxu1 %v7624_v46  ;;  %6823 = vmatprep.mubr.bf16.mxu0 %v7723_v53  ;;  %v6983_v46 = vld [vmem:[%s8517_s3 + $0x1d0] sm:$0xff]  }
 0x18b   : > { %1843 = vmatprep.mubr.bf16.mxu1 %v7637_v59  ;;  %6229 = vmatpush3.bf16.msra.mxu1 %v6978_v26  ;;  %v789_v26 = vmax.f32 %v749_v50, 0.0 }
 0x18c   : > { %6230 = vmatprep.subr.bf16.mxu1 %v6979_v28 }
 0x18f   : > { %6231 = vmatpush3.bf16.msra.mxu1 %v6980_v3 }
 0x190   : > { %6232 = vmatprep.subr.bf16.mxu1 %v6981_v25  ;;  %v1038_v25 = vshrl.u32 %v7928_v23, 16 }
 0x191   : > { %6824 = vmatmul.mubr.bf16.gmra.mxu0 %v7743_v10 }
 0x192   : > { %1844 = vmatmul.mubr.bf16.gmra.mxu1 %v7656_v6  ;;  %6827 = vmatprep.mubr.bf16.mxu0 %v7760_v31  ;;  %v6987_v6 = vld [vmem:[%s8517_s3 + $0x1c0] sm:$0xff]  }
 0x193   : > { %1851 = vmatprep.mubr.bf16.mxu1 %v7673_v18  ;;  %6233 = vmatpush3.bf16.msra.mxu1 %v6982_v40 }
 0x194   : > { %6234 = vmatprep.subr.bf16.mxu1 %v6983_v46 }
 0x197   : > { %6235 = vmatpush3.bf16.msra.mxu1 %v6984_v52 }
 0x198   : > { %6236 = vmatprep.subr.bf16.mxu1 %v6985_v16 }
 0x199   : > { %6828 = vmatmul.mubr.bf16.gmra.mxu0 %v7777_v51 }
 0x19a   : > { %1852 = vmatmul.mubr.bf16.gmra.mxu1 %v7691_v30  ;;  %6831 = vmatprep.mubr.bf16.mxu0 %v7794_v11  ;;  %v746_v30 = vadd.f32 %v7876_v20, %v7926_v32  ;;  %v1040_v20 = vor.u32 %v1038_v25, %v7940_v60 }
 0x19b   : > { %1859 = vmatprep.mubr.bf16.mxu1 %v7708_v42  ;;  %6237 = vmatpush3.bf16.msra.mxu1 %v6986_v4 }
 0x19c   : > { %6238 = vmatprep.subr.bf16.mxu1 %v6987_v6  ;;  %v788_v8 = vmax.f32 %v746_v30, 0.0 }
 0x19f   : > { %6239 = vmatpush3.bf16.msra.mxu1 %v6988_v57 }
 0x1a1   : > { %6832 = vmatmul.mubr.bf16.gmra.mxu0 %v7811_v36 }
 0x1a2   : > { %1860 = vmatmul.mubr.bf16.gmra.mxu1 %v7723_v53  ;;  %6835 = vmatprep.mubr.bf16.mxu0 %v7828_v58  ;;  %v808_v53 = vpack.c.bf16 %v789_v26, %v788_v8 }
 0x1a3   : > { %1867 = vmatprep.mubr.bf16.mxu1 %v7734_v2 }
 0x1a4   : > { %v1042_v28 = vshll.u32 %v808_v53, 16  ;;  %v1048_v32 = vrot.slane %v808_v53, 1 }
 0x1a6   : > { %v1044_v3 = vrot.slane %v1042_v28, 1 }
 0x1a9   : > { %6836 = vmatmul.mubr.bf16.gmra.mxu0 %v7845_v29 }
 0x1aa   : > { %1868 = vmatmul.mubr.bf16.gmra.mxu1 %v7743_v10  ;;  %6839 = vmatprep.mubr.bf16.mxu0 %v7862_v62  ;;  %v8026_v10 = vsel %vm809_vm3, %v1040_v20, %v1044_v3 }
 0x1ab   : > { %1875 = vmatprep.mubr.bf16.mxu1 %v7751_v21  ;;  %8537 = vst [vmem:[#allocation10_spill] sm:$0xff] %v8026_v10 }
 0x1b1   : > { %6840 = vmatmul.mubr.bf16.gmra.mxu0 %v7884_v34 }
 0x1b2   : > { %1876 = vmatmul.mubr.bf16.gmra.mxu1 %v7760_v31  ;;  %6843 = vmatprep.mubr.bf16.mxu0 %v7901_v15  ;;  %v1049_v31 = vsel %vm975_vm4, %v1035_v37, %v1048_v32 }
 0x1b3   : > { %1883 = vmatprep.mubr.bf16.mxu1 %v7768_v41 }
 0x1b9   : > { %6844 = vmatmul.mubr.bf16.gmra.mxu0 %v7918_v7 }
 0x1ba   : > { %1884 = vmatmul.mubr.bf16.gmra.mxu1 %v7777_v51  ;;  %6847 = vmatprep.mubr.bf16.mxu0 %v7938_v55 }
 0x1bb   : > { %1891 = vmatprep.mubr.bf16.mxu1 %v7785_v1 }
 0x1c1   : > { %6848 = vmatmul.mubr.bf16.gmra.mxu0 %v1049_v31 }
 0x1c2   : > { %v5904_v48 = vpop.f32.mrf.mxu1  ;;  %1892 = vmatmul.mubr.bf16.gmra.mxu1 %v7794_v11 }
 0x1c3   : > { %1899 = vmatprep.mubr.bf16.mxu1 %v7802_v24 }
 0x1c4   : > { %v5905_v60 = vpop.f32.mrf.mxu1 }
 0x1c5   : > { %v8037_v40 = vadd.f32 %v5905_v60, %v5904_v48 }
 0x1c6   : > { %v5907_v46 = vpop.f32.mrf.mxu1 }
 0x1c8   : > { %v5908_v51 = vpop.f32.mrf.mxu1 }
 0x1c9   : > { %v8039_v52 = vadd.f32 %v5908_v51, %v5907_v46  ;;  %v6128_v55 = vpop.f32.mrf.mxu0 }
 0x1ca   : > { %v5910_v16 = vpop.f32.mrf.mxu1  ;;  %1900 = vmatmul.mubr.bf16.gmra.mxu1 %v7811_v36 }
 0x1cb   : > { %1907 = vmatprep.mubr.bf16.mxu1 %v7819_v49  ;;  %v6129_v37 = vpop.f32.mrf.mxu0 }
 0x1cc   : > { %v8043_v4 = vadd.f32 %v6129_v37, %v6128_v55  ;;  %v5911_v6 = vpop.f32.mrf.mxu1 }
 0x1cd   : > { %v8045_v11 = vadd.f32 %v5911_v6, %v5910_v16  ;;  %v8047_v57 = vpop.f32.mrf.mxu0 }
 0x1ce   : > { %v5913_v30 = vpop.f32.mrf.mxu1 }
 0x1cf   : > { %v8049_v50 = vpop.f32.mrf.mxu0 }
 0x1d0   : > { %v5914_v8 = vpop.f32.mrf.mxu1 }
 0x1d1   : > { %v8051_v26 = vadd.f32 %v5914_v8, %v5913_v30  ;;  %v6134_v53 = vpop.f32.mrf.mxu0 }
 0x1d2   : > { %v5916_v28 = vpop.f32.mrf.mxu1  ;;  %1908 = vmatmul.mubr.bf16.gmra.mxu1 %v7828_v58 }
 0x1d3   : > { %1915 = vmatprep.mubr.bf16.mxu1 %v7836_v13  ;;  %v6135_v36 = vpop.f32.mrf.mxu0 }
 0x1d4   : > { %v8055_v3 = vadd.f32 %v6135_v36, %v6134_v53  ;;  %v5917_v25 = vpop.f32.mrf.mxu1 }
 0x1d5   : > { %v8057_v20 = vadd.f32 %v5917_v25, %v5916_v28  ;;  %v8059_v32 = vpop.f32.mrf.mxu0 }
 0x1d6   : > { %v5919_v31 = vpop.f32.mrf.mxu1 }
 0x1d7   : > { %v8061_v48 = vpop.f32.mrf.mxu0 }
 0x1d8   : > { %v5920_v60 = vpop.f32.mrf.mxu1 }
 0x1d9   : > { %v8063_v46 = vadd.f32 %v5920_v60, %v5919_v31  ;;  %v6140_v51 = vpop.f32.mrf.mxu0 }
 0x1da   : > { %v5922_v55 = vpop.f32.mrf.mxu1  ;;  %1916 = vmatmul.mubr.bf16.gmra.mxu1 %v7845_v29 }
 0x1db   : > { %1923 = vmatprep.mubr.bf16.mxu1 %v7853_v45  ;;  %v6141_v58 = vpop.f32.mrf.mxu0 }
 0x1dc   : > { %v8067_v16 = vadd.f32 %v6141_v58, %v6140_v51  ;;  %v5923_v37 = vpop.f32.mrf.mxu1 }
 0x1dd   : > { %v8069_v6 = vadd.f32 %v5923_v37, %v5922_v55  ;;  %v8071_v30 = vpop.f32.mrf.mxu0 }
 0x1de   : > { %v5925_v8 = vpop.f32.mrf.mxu1 }
 0x1df   : > { %v8073_v53 = vpop.f32.mrf.mxu0 }
 0x1e0   : > { %v5926_v28 = vpop.f32.mrf.mxu1 }
 0x1e1   : > { %v8075_v36 = vadd.f32 %v5926_v28, %v5925_v8  ;;  %v6146_v25 = vpop.f32.mrf.mxu0 }
 0x1e2   : > { %v5928_v31 = vpop.f32.mrf.mxu1  ;;  %1924 = vmatmul.mubr.bf16.gmra.mxu1 %v7862_v62 }
 0x1e3   : > { %1931 = vmatprep.mubr.bf16.mxu1 %v7870_v17  ;;  %v6147_v29 = vpop.f32.mrf.mxu0 }
 0x1e4   : > { %v8079_v60 = vadd.f32 %v6147_v29, %v6146_v25  ;;  %v5929_v51 = vpop.f32.mrf.mxu1 }
 0x1e5   : > { %v8081_v55 = vadd.f32 %v5929_v51, %v5928_v31  ;;  %v8083_v58 = vpop.f32.mrf.mxu0 }
 0x1e6   : > { %v5931_v37 = vpop.f32.mrf.mxu1 }
 0x1e7   : > { %8538 = vst [vmem:[#allocation11_spill] sm:$0xff] %v8081_v55  ;;  %v8085_v0 = vpop.f32.mrf.mxu0 }
 0x1e8   : > { %v5932_v23 = vpop.f32.mrf.mxu1 }
 0x1e9   : > { %v8087_v8 = vadd.f32 %v5932_v23, %v5931_v37  ;;  %v6152_v28 = vpop.f32.mrf.mxu0 }
 0x1ea   : > { %v5934_v10 = vpop.f32.mrf.mxu1  ;;  %1932 = vmatmul.mubr.bf16.gmra.mxu1 %v7884_v34 }
 0x1eb   : > { %8539 = vst [vmem:[#allocation12_spill] sm:$0xff] %v8087_v8  ;;  %1939 = vmatprep.mubr.bf16.mxu1 %v7892_v56  ;;  %v6153_v62 = vpop.f32.mrf.mxu0 }
 0x1ec   : > { %v8091_v25 = vadd.f32 %v6153_v62, %v6152_v28  ;;  %v5935_v29 = vpop.f32.mrf.mxu1 }
 0x1ed   : > { %v8093_v31 = vadd.f32 %v5935_v29, %v5934_v10  ;;  %v8095_v51 = vpop.f32.mrf.mxu0 }
 0x1ee   : > { %8541 = vst [vmem:[#allocation14_spill] sm:$0xff] %v8095_v51  ;;  %v5937_v5 = vpop.f32.mrf.mxu1 }
 0x1ef   : > { %8540 = vst [vmem:[#allocation13_spill] sm:$0xff] %v8093_v31  ;;  %v8097_v55 = vpop.f32.mrf.mxu0 }
 0x1f0   : > { %8542 = vst [vmem:[#allocation15_spill] sm:$0xff] %v8097_v55  ;;  %v5938_v27 = vpop.f32.mrf.mxu1 }
 0x1f1   : > { %v8099_v23 = vadd.f32 %v5938_v27, %v5937_v5  ;;  %v6158_v37 = vpop.f32.mrf.mxu0 }
 0x1f2   : > { %v5940_v8 = vpop.f32.mrf.mxu1  ;;  %1940 = vmatmul.mubr.bf16.gmra.mxu1 %v7901_v15 }
 0x1f3   : > { %8543 = vst [vmem:[#allocation16_spill] sm:$0xff] %v8099_v23  ;;  %1947 = vmatprep.mubr.bf16.mxu1 %v7909_v44  ;;  %v6159_v34 = vpop.f32.mrf.mxu0 }
 0x1f4   : > { %v8103_v28 = vadd.f32 %v6159_v34, %v6158_v37  ;;  %v5941_v62 = vpop.f32.mrf.mxu1 }
 0x1f5   : > { %v8105_v10 = vadd.f32 %v5941_v62, %v5940_v8  ;;  %v6161_v29 = vpop.f32.mrf.mxu0 }
 0x1f6   : > { %v5943_v31 = vpop.f32.mrf.mxu1 }
 0x1f7   : > { %8544 = vst [vmem:[#allocation17_spill] sm:$0xff] %v8105_v10  ;;  %v6162_v51 = vpop.f32.mrf.mxu0 }
 0x1f8   : > { %v8107_v56 = vadd.f32 %v6162_v51, %v6161_v29  ;;  %v5944_v55 = vpop.f32.mrf.mxu1 }
 0x1f9   : > { %v8109_v27 = vadd.f32 %v5944_v55, %v5943_v31  ;;  %v6164_v5 = vpop.f32.mrf.mxu0 }
 0x1fa   : > { %v5946_v23 = vpop.f32.mrf.mxu1  ;;  %1948 = vmatmul.mubr.bf16.gmra.mxu1 %v7918_v7 }
 0x1fb   : > { %8545 = vst [vmem:[#allocation18_spill] sm:$0xff] %v8109_v27  ;;  %v6165_v15 = vpop.f32.mrf.mxu0  ;;  %2149 = vmatprep.mubr.bf16.mxu1 %v7666_v14 }
 0x1fc   : > { %v8113_v37 = vadd.f32 %v6165_v15, %v6164_v5  ;;  %v5947_v34 = vpop.f32.mrf.mxu1 }
 0x1fd   : > { %v8115_v8 = vadd.f32 %v5947_v34, %v5946_v23  ;;  %v6167_v62 = vpop.f32.mrf.mxu0 }
 0x1fe   : > { %v5949_v10 = vpop.f32.mrf.mxu1 }
 0x1ff   : > { %8546 = vst [vmem:[#allocation19_spill] sm:$0xff] %v8115_v8  ;;  %v6168_v44 = vpop.f32.mrf.mxu0 }
 0x200   : > { %v8117_v51 = vadd.f32 %v6168_v44, %v6167_v62  ;;  %v5950_v29 = vpop.f32.mrf.mxu1 }
 0x201   : > { %v8119_v55 = vadd.f32 %v5950_v29, %v5949_v10  ;;  %v6170_v31 = vpop.f32.mrf.mxu0 }
 0x202   : > { %v5952_v27 = vpop.f32.mrf.mxu1  ;;  %2150 = vmatmul.mubr.bf16.vlgmr.msra.gmra.mxu1 %v7607_v35 }
 0x203   : > { %8547 = vst [vmem:[#allocation20_spill] sm:$0xff] %v8119_v55  ;;  %v6171_v7 = vpop.f32.mrf.mxu0  ;;  %2157 = vmatprep.mubr.bf16.mxu1 %v7701_v39 }
 0x204   : > { %v8123_v14 = vadd.f32 %v6171_v7, %v6170_v31  ;;  %v5953_v5 = vpop.f32.mrf.mxu1 }
 0x205   : > { %v8125_v23 = vadd.f32 %v5953_v5, %v5952_v27  ;;  %v6173_v15 = vpop.f32.mrf.mxu0 }
 0x206   : > { %v5955_v34 = vpop.f32.mrf.mxu1 }
 0x207   : > { %8548 = vst [vmem:[#allocation21_spill] sm:$0xff] %v8125_v23  ;;  %v6174_v8 = vpop.f32.mrf.mxu0 }
 0x208   : > { %v8127_v44 = vadd.f32 %v6174_v8, %v6173_v15  ;;  %v5956_v62 = vpop.f32.mrf.mxu1 }
 0x209   : > { %v8129_v10 = vadd.f32 %v5956_v62, %v5955_v34  ;;  %v6176_v29 = vpop.f32.mrf.mxu0 }
 0x20a   : > { %v5958_v55 = vpop.f32.mrf.mxu1  ;;  %2158 = vmatmul.mubr.bf16.gmra.mxu1 %v7637_v59 }
 0x20b   : > { %8549 = vst [vmem:[#allocation22_spill] sm:$0xff] %v8129_v10  ;;  %v6177_v35 = vpop.f32.mrf.mxu0  ;;  %2165 = vmatprep.mubr.bf16.mxu1 %v7730_v63 }
 0x20c   : > { %v8133_v39 = vadd.f32 %v6177_v35, %v6176_v29  ;;  %v5959_v31 = vpop.f32.mrf.mxu1 }
 0x20d   : > { %v8135_v27 = vadd.f32 %v5959_v31, %v5958_v55  ;;  %v6179_v7 = vpop.f32.mrf.mxu0 }
 0x20e   : > { %v5961_v5 = vpop.f32.mrf.mxu1 }
 0x20f   : > { %8550 = vst [vmem:[#allocation23_spill] sm:$0xff] %v8135_v27  ;;  %v6180_v23 = vpop.f32.mrf.mxu0 }
 0x210   : > { %v8137_v8 = vadd.f32 %v6180_v23, %v6179_v7  ;;  %v5962_v15 = vpop.f32.mrf.mxu1 }
 0x211   : > { %v8139_v34 = vadd.f32 %v5962_v15, %v5961_v5  ;;  %v6182_v62 = vpop.f32.mrf.mxu0 }
 0x212   : > { %v5964_v10 = vpop.f32.mrf.mxu1  ;;  %2166 = vmatmul.mubr.bf16.gmra.mxu1 %v7673_v18 }
 0x213   : > { %8551 = vst [vmem:[#allocation24_spill] sm:$0xff] %v8139_v34  ;;  %v6183_v59 = vpop.f32.mrf.mxu0  ;;  %2173 = vmatprep.mubr.bf16.mxu1 %v7747_v19 }
 0x214   : > { %v8143_v63 = vadd.f32 %v6183_v59, %v6182_v62  ;;  %v5965_v29 = vpop.f32.mrf.mxu1 }
 0x215   : > { %v8145_v55 = vadd.f32 %v5965_v29, %v5964_v10  ;;  %v6185_v35 = vpop.f32.mrf.mxu0 }
 0x216   : > { %v5967_v31 = vpop.f32.mrf.mxu1 }
 0x217   : > { %8552 = vst [vmem:[#allocation25_spill] sm:$0xff] %v8145_v55  ;;  %v6186_v27 = vpop.f32.mrf.mxu0 }
 0x218   : > { %v8147_v23 = vadd.f32 %v6186_v27, %v6185_v35  ;;  %v5968_v7 = vpop.f32.mrf.mxu1 }
 0x219   : > { %v8149_v5 = vadd.f32 %v5968_v7, %v5967_v31  ;;  %v6188_v15 = vpop.f32.mrf.mxu0 }
 0x21a   : > { %v5970_v34 = vpop.f32.mrf.mxu1  ;;  %2174 = vmatmul.mubr.bf16.gmra.mxu1 %v7708_v42 }
 0x21b   : > { %8553 = vst [vmem:[#allocation26_spill] sm:$0xff] %v8149_v5  ;;  %v6189_v18 = vpop.f32.mrf.mxu0  ;;  %2181 = vmatprep.mubr.bf16.mxu1 %v7764_v38 }
 0x21c   : > { %v8153_v19 = vadd.f32 %v6189_v18, %v6188_v15  ;;  %v5971_v62 = vpop.f32.mrf.mxu1 }
 0x21d   : > { %v8155_v10 = vadd.f32 %v5971_v62, %v5970_v34  ;;  %v6191_v59 = vpop.f32.mrf.mxu0 }
 0x21e   : > { %v5973_v29 = vpop.f32.mrf.mxu1 }
 0x21f   : > { %8554 = vst [vmem:[#allocation27_spill] sm:$0xff] %v8155_v10  ;;  %v6192_v55 = vpop.f32.mrf.mxu0 }
 0x220   : > { %v8157_v27 = vadd.f32 %v6192_v55, %v6191_v59  ;;  %v5974_v35 = vpop.f32.mrf.mxu1 }
 0x221   : > { %v8159_v31 = vadd.f32 %v5974_v35, %v5973_v29  ;;  %v6194_v7 = vpop.f32.mrf.mxu0 }
 0x222   : > { %v5976_v5 = vpop.f32.mrf.mxu1  ;;  %2182 = vmatmul.mubr.bf16.gmra.mxu1 %v7734_v2 }
 0x223   : > { %8555 = vst [vmem:[#allocation28_spill] sm:$0xff] %v8159_v31  ;;  %v6195_v42 = vpop.f32.mrf.mxu0  ;;  %2189 = vmatprep.mubr.bf16.mxu1 %v7781_v61 }
 0x224   : > { %v8163_v38 = vadd.f32 %v6195_v42, %v6194_v7  ;;  %v5977_v15 = vpop.f32.mrf.mxu1 }
 0x225   : > { %v8165_v34 = vadd.f32 %v5977_v15, %v5976_v5  ;;  %v6197_v18 = vpop.f32.mrf.mxu0 }
 0x226   : > { %v5979_v62 = vpop.f32.mrf.mxu1 }
 0x227   : > { %8556 = vst [vmem:[#allocation29_spill] sm:$0xff] %v8165_v34  ;;  %v6198_v10 = vpop.f32.mrf.mxu0 }
 0x228   : > { %v8167_v55 = vadd.f32 %v6198_v10, %v6197_v18  ;;  %v5980_v59 = vpop.f32.mrf.mxu1 }
 0x229   : > { %v8169_v29 = vadd.f32 %v5980_v59, %v5979_v62  ;;  %v6200_v35 = vpop.f32.mrf.mxu0 }
 0x22a   : > { %v5982_v31 = vpop.f32.mrf.mxu1  ;;  %2190 = vmatmul.mubr.bf16.gmra.mxu1 %v7751_v21 }
 0x22b   : > { %8557 = vst [vmem:[#allocation30_spill] sm:$0xff] %v8169_v29  ;;  %v6201_v2 = vpop.f32.mrf.mxu0  ;;  %2197 = vmatprep.mubr.bf16.mxu1 %v7798_v22 }
 0x22c   : > { %v8173_v61 = vadd.f32 %v6201_v2, %v6200_v35  ;;  %v5983_v7 = vpop.f32.mrf.mxu1 }
 0x22d   : > { %v8175_v5 = vadd.f32 %v5983_v7, %v5982_v31  ;;  %v6203_v42 = vpop.f32.mrf.mxu0 }
 0x22e   : > { %v5985_v15 = vpop.f32.mrf.mxu1 }
 0x22f   : > { %8558 = vst [vmem:[#allocation31_spill] sm:$0xff] %v8175_v5  ;;  %v6204_v34 = vpop.f32.mrf.mxu0 }
 0x230   : > { %v8177_v10 = vadd.f32 %v6204_v34, %v6203_v42  ;;  %v5986_v18 = vpop.f32.mrf.mxu1 }
 0x231   : > { %v8179_v62 = vadd.f32 %v5986_v18, %v5985_v15  ;;  %v6206_v59 = vpop.f32.mrf.mxu0 }
 0x232   : > { %v5988_v29 = vpop.f32.mrf.mxu1  ;;  %2198 = vmatmul.mubr.bf16.gmra.mxu1 %v7768_v41 }
 0x233   : > { %8559 = vst [vmem:[#allocation32_spill] sm:$0xff] %v8179_v62  ;;  %v6207_v21 = vpop.f32.mrf.mxu0  ;;  %2205 = vmatprep.mubr.bf16.mxu1 %v7815_v47 }
 0x234   : > { %v8183_v22 = vadd.f32 %v6207_v21, %v6206_v59  ;;  %v5989_v35 = vpop.f32.mrf.mxu1 }
 0x235   : > { %v8185_v31 = vadd.f32 %v5989_v35, %v5988_v29  ;;  %v6209_v2 = vpop.f32.mrf.mxu0 }
 0x236   : > { %v5991_v7 = vpop.f32.mrf.mxu1 }
 0x237   : > { %8560 = vst [vmem:[#allocation33_spill] sm:$0xff] %v8185_v31  ;;  %v6210_v5 = vpop.f32.mrf.mxu0 }
 0x238   : > { %v8187_v34 = vadd.f32 %v6210_v5, %v6209_v2  ;;  %v5992_v42 = vpop.f32.mrf.mxu1 }
 0x239   : > { %v8189_v15 = vadd.f32 %v5992_v42, %v5991_v7  ;;  %v6212_v18 = vpop.f32.mrf.mxu0 }
 0x23a   : > { %v5994_v62 = vpop.f32.mrf.mxu1  ;;  %2206 = vmatmul.mubr.bf16.gmra.mxu1 %v7785_v1  ;;  %v8204_v1 = vld [vmem:[%s8518_s4] ss:$0 sm:$0xff] }
 0x23b   : > { %v6213_v41 = vpop.f32.mrf.mxu0  ;;  %2213 = vmatprep.mubr.bf16.mxu1 %v7832_v9 }
 0x23c   : > { %v8193_v47 = vadd.f32 %v6213_v41, %v6212_v18  ;;  %v5995_v59 = vpop.f32.mrf.mxu1 }
 0x23d   : > { %v8195_v29 = vadd.f32 %v5995_v59, %v5994_v62  ;;  %v6215_v21 = vpop.f32.mrf.mxu0 }
 0x23e   : > { %8561 = vst [vmem:[#allocation34_spill] sm:$0xff] %v8193_v47  ;;  %v5997_v35 = vpop.f32.mrf.mxu1 }
 0x23f   : > { %8562 = vst [vmem:[#allocation35_spill] sm:$0xff] %v8195_v29  ;;  %v6216_v31 = vpop.f32.mrf.mxu0 }
 0x240   : > { %v8197_v5 = vadd.f32 %v6216_v31, %v6215_v21  ;;  %v5998_v2 = vpop.f32.mrf.mxu1  ;;  %v1669_v31 = vadd.f32 %v8037_v40, %v8204_v1  ;;  %v6133_v40 = vadd.f32 %v8049_v50, %v8047_v57 }
 0x241   : > { %v8199_v7 = vadd.f32 %v5998_v2, %v5997_v35  ;;  %v6218_v42 = vpop.f32.mrf.mxu0 }
 0x242   : > { %8563 = vst [vmem:[#allocation36_spill] sm:$0xff] %v8197_v5  ;;  %v6016_v9 = vpop.f32.mrf.mxu1  ;;  %2214 = vmatmul.mubr.bf16.gmra.mxu1 %v7802_v24  ;;  %v1672_v24 = vadd.f32 %v8039_v52, %v8204_v1 }
 0x243   : > { %8564 = vst [vmem:[#allocation37_spill] sm:$0xff] %v8199_v7  ;;  %v6219_v18 = vpop.f32.mrf.mxu0  ;;  %2221 = vmatprep.mubr.bf16.mxu1 %v7849_v43 }
 0x244   : > { %v8208_v62 = vadd.f32 %v6219_v18, %v6218_v42  ;;  %v6017_v41 = vpop.f32.mrf.mxu1 }
 0x245   : > { %v6018_v59 = vadd.f32 %v6017_v41, %v6016_v9  ;;  %v6221_v21 = vpop.f32.mrf.mxu0 }
 0x246   : > { %v6019_v35 = vpop.f32.mrf.mxu1 }
 0x247   : > { %v1830_v2 = vadd.f32 %v6018_v59, %v1669_v31  ;;  %v6222_v7 = vpop.f32.mrf.mxu0  ;;  %v1680_v59 = vadd.f32 %v8051_v26, %v8204_v1 }
 0x248   : > { %v8212_v5 = vadd.f32 %v6222_v7, %v6221_v21  ;;  %v6020_v29 = vpop.f32.mrf.mxu1  ;;  %v1677_v7 = vadd.f32 %v8045_v11, %v8204_v1 }
 0x249   : > { %v6021_v47 = vadd.f32 %v6020_v29, %v6019_v35  ;;  %v8217_v43 = vadd.f32 %v8043_v4, %v1830_v2 }
 0x24a   : > { %v6022_v42 = vpop.f32.mrf.mxu1  ;;  %2222 = vmatmul.mubr.bf16.gmra.mxu1 %v7819_v49 }
 0x24b   : > { %v1833_v9 = vadd.f32 %v6021_v47, %v1672_v24  ;;  %2229 = vmatprep.mubr.bf16.mxu1 %v7866_v12  ;;  %v6139_v12 = vadd.f32 %v8061_v48, %v8059_v32  ;;  %v1685_v47 = vadd.f32 %v8057_v20, %v8204_v1 }
 0x24c   : > { %v6023_v18 = vpop.f32.mrf.mxu1 }
 0x24d   : > { %v6024_v41 = vadd.f32 %v6023_v18, %v6022_v42  ;;  %v8225_v31 = vadd.f32 %v6133_v40, %v1833_v9  ;;  %v1688_v42 = vadd.f32 %v8063_v46, %v8204_v1  ;;  %v1693_v9 = vadd.f32 %v8069_v6, %v8204_v1 }
 0x24e   : > { %v6025_v52 = vpop.f32.mrf.mxu1 }
 0x24f   : > { %v1838_v29 = vadd.f32 %v6024_v41, %v1677_v7 }
 0x250   : > { %v6026_v4 = vpop.f32.mrf.mxu1 }
 0x251   : > { %v6027_v49 = vadd.f32 %v6026_v4, %v6025_v52  ;;  %v8230_v21 = vadd.f32 %v8055_v3, %v1838_v29  ;;  %v1696_v52 = vadd.f32 %v8075_v36, %v8204_v1 }
 0x252   : > { %v6028_v57 = vpop.f32.mrf.mxu1  ;;  %2230 = vmatmul.mubr.bf16.gmra.mxu1 %v7836_v13 }
 0x253   : > { %v1841_v11 = vadd.f32 %v6027_v49, %v1680_v59  ;;  %2237 = vmatprep.mubr.bf16.mxu1 %v7888_v54  ;;  %v6145_v54 = vadd.f32 %v8073_v53, %v8071_v30  ;;  %v8565_v53 = vld [vmem:[#allocation7_spill] sm:$0xff] }
 0x254   : > { %v6029_v50 = vpop.f32.mrf.mxu1  ;;  %v8566_v59 = vld [vmem:[#allocation11_spill] sm:$0xff] }
 0x255   : > { %v6030_v35 = vadd.f32 %v6029_v50, %v6028_v57  ;;  %v8238_v2 = vadd.f32 %v6139_v12, %v1841_v11  ;;  %v1701_v49 = vadd.f32 %v8566_v59, %v8204_v1  ;;  %v8567_v50 = vld [vmem:[#allocation12_spill] sm:$0xff]  ;;  %v8576_v59 = vld [vmem:[#allocation17_spill] sm:$0xff] }
 0x256   : > { %v6031_v26 = vpop.f32.mrf.mxu1 }
 0x257   : > { %v1846_v24 = vadd.f32 %v6030_v35, %v1685_v47  ;;  %v1704_v47 = vadd.f32 %v8567_v50, %v8204_v1 }
 0x258   : > { %v6032_v3 = vpop.f32.mrf.mxu1 }
 0x259   : > { %v6033_v13 = vadd.f32 %v6032_v3, %v6031_v26  ;;  %v8243_v40 = vadd.f32 %v8067_v16, %v1846_v24  ;;  %v8569_v26 = vld [vmem:[#allocation14_spill] sm:$0xff]  ;;  %v8570_v24 = vld [vmem:[#allocation15_spill] sm:$0xff] }
 0x25a   : > { %v6034_v32 = vpop.f32.mrf.mxu1  ;;  %2238 = vmatmul.mubr.bf16.gmra.mxu1 %v7853_v45  ;;  %v6157_v3 = vadd.f32 %v8570_v24, %v8569_v26  ;;  %v8578_v26 = vld [vmem:[#allocation8_spill] sm:$0xff] }
 0x25b   : > { %v1849_v20 = vadd.f32 %v6033_v13, %v1688_v42  ;;  %2245 = vmatprep.mubr.bf16.mxu1 %v7905_v33  ;;  %v6151_v33 = vadd.f32 %v8085_v0, %v8083_v58  ;;  %v8568_v58 = vld [vmem:[#allocation5_spill] sm:$0xff] }
 0x25c   : > { %v6035_v48 = vpop.f32.mrf.mxu1  ;;  %v8571_v13 = vld [vmem:[#allocation9_spill] sm:$0xff] }
 0x25d   : > { %v6036_v18 = vadd.f32 %v6035_v48, %v6034_v32  ;;  %v8251_v7 = vadd.f32 %v6145_v54, %v1849_v20  ;;  %v8572_v54 = vld [vmem:[#allocation13_spill] sm:$0xff] }
 0x25e   : > { %v6037_v46 = vpop.f32.mrf.mxu1  ;;  %v1709_v20 = vadd.f32 %v8572_v54, %v8204_v1 }
 0x25f   : > { %v1854_v41 = vadd.f32 %v6036_v18, %v1693_v9 }
 0x260   : > { %v6038_v16 = vpop.f32.mrf.mxu1 }
 0x261   : > { %v6039_v45 = vadd.f32 %v6038_v16, %v6037_v46  ;;  %v8256_v29 = vadd.f32 %v8079_v60, %v1854_v41  ;;  %v8573_v41 = vld [vmem:[#allocation16_spill] sm:$0xff] }
 0x262   : > { %v6040_v30 = vpop.f32.mrf.mxu1  ;;  %2246 = vmatmul.mubr.bf16.gmra.mxu1 %v7870_v17  ;;  %v1712_v16 = vadd.f32 %v8573_v41, %v8204_v1 }
 0x263   : > { %v1857_v6 = vadd.f32 %v6039_v45, %v1696_v52  ;;  %2253 = vmatprep.mubr.bf16.mxu1 %v8565_v53  ;;  %v8575_v53 = vld [vmem:[#allocation10_spill] sm:$0xff] }
 0x264   : > { %v6041_v4 = vpop.f32.mrf.mxu1 }
 0x265   : > { %v6042_v57 = vadd.f32 %v6041_v4, %v6040_v30  ;;  %v8264_v12 = vadd.f32 %v6151_v33, %v1857_v6  ;;  %v8574_v33 = vld [vmem:[#allocation6_spill] sm:$0xff] }
 0x266   : > { %v6043_v36 = vpop.f32.mrf.mxu1 }
 0x267   : > { %v1862_v11 = vadd.f32 %v6042_v57, %v1701_v49  ;;  %v1717_v49 = vadd.f32 %v8576_v59, %v8204_v1 }
 0x268   : > { %v6044_v60 = vpop.f32.mrf.mxu1 }
 0x269   : > { %v6045_v17 = vadd.f32 %v6044_v60, %v6043_v36  ;;  %v8269_v35 = vadd.f32 %v8091_v25, %v1862_v11 }
 0x26a   : > { %v6046_v0 = vpop.f32.mrf.mxu1  ;;  %2254 = vmatmul.mubr.bf16.gmra.mxu1 %v8568_v58 }
 0x26b   : > { %v1865_v42 = vadd.f32 %v6045_v17, %v1704_v47  ;;  %2261 = vmatprep.mubr.bf16.mxu1 %v8571_v13 }
 0x26c   : > { %v6047_v32 = vpop.f32.mrf.mxu1 }
 0x26d   : > { %v6048_v48 = vadd.f32 %v6047_v32, %v6046_v0  ;;  %v8277_v9 = vadd.f32 %v6157_v3, %v1865_v42  ;;  %v8579_v42 = vld [vmem:[#allocation19_spill] sm:$0xff] }
 0x26e   : > { %v6049_v18 = vpop.f32.mrf.mxu1  ;;  %v1725_v13 = vadd.f32 %v8579_v42, %v8204_v1  ;;  %v8584_v42 = vld [vmem:[#allocation24_spill] sm:$0xff] }
 0x26f   : > { %v1870_v46 = vadd.f32 %v6048_v48, %v1709_v20 }
 0x270   : > { %v6050_v25 = vpop.f32.mrf.mxu1 }
 0x271   : > { %v6051_v52 = vadd.f32 %v6050_v25, %v6049_v18  ;;  %v8282_v45 = vadd.f32 %v8103_v28, %v1870_v46  ;;  %v8577_v28 = vld [vmem:[#allocation18_spill] sm:$0xff]  ;;  %v8580_v18 = vld [vmem:[#allocation20_spill] sm:$0xff] }
 0x272   : > { %v6052_v30 = vpop.f32.mrf.mxu1  ;;  %2262 = vmatmul.mubr.bf16.gmra.mxu1 %v8574_v33  ;;  %v1720_v47 = vadd.f32 %v8577_v28, %v8204_v1  ;;  %v1728_v46 = vadd.f32 %v8580_v18, %v8204_v1  ;;  %v8585_v18 = vld [vmem:[#allocation25_spill] sm:$0xff] }
 0x273   : > { %v1873_v6 = vadd.f32 %v6051_v52, %v1712_v16  ;;  %2269 = vmatprep.mubr.bf16.mxu1 %v8575_v53 }
 0x274   : > { %v6053_v4 = vpop.f32.mrf.mxu1 }
 0x275   : > { %v6054_v57 = vadd.f32 %v6053_v4, %v6052_v30  ;;  %v8289_v36 = vadd.f32 %v8107_v56, %v1873_v6  ;;  %v8581_v30 = vld [vmem:[#allocation21_spill] sm:$0xff] }
 0x276   : > { %v6055_v11 = vpop.f32.mrf.mxu1  ;;  %v1733_v33 = vadd.f32 %v8581_v30, %v8204_v1  ;;  %v8586_v30 = vld [vmem:[#allocation26_spill] sm:$0xff] }
 0x277   : > { %v1878_v60 = vadd.f32 %v6054_v57, %v1717_v49  ;;  %v8582_v49 = vld [vmem:[#allocation22_spill] sm:$0xff] }
 0x278   : > { %v6056_v50 = vpop.f32.mrf.mxu1  ;;  %v1736_v57 = vadd.f32 %v8582_v49, %v8204_v1  ;;  %v8587_v49 = vld [vmem:[#allocation27_spill] sm:$0xff] }
 0x279   : > { %v6057_v17 = vadd.f32 %v6056_v50, %v6055_v11  ;;  %v8294_v0 = vadd.f32 %v8113_v37, %v1878_v60 }
 0x27a   : > { %v6058_v58 = vpop.f32.mrf.mxu1  ;;  %2270 = vmatmul.mubr.bf16.gmra.mxu1 %v8578_v26 }
 0x27b   : > { %v1881_v24 = vadd.f32 %v6057_v17, %v1720_v47  ;;  %v8583_v47 = vld [vmem:[#allocation23_spill] sm:$0xff] }
 0x27c   : > { %v6059_v3 = vpop.f32.mrf.mxu1  ;;  %v1741_v17 = vadd.f32 %v8583_v47, %v8204_v1  ;;  %v8588_v47 = vld [vmem:[#allocation28_spill] sm:$0xff] }
 0x27d   : > { %v6060_v56 = vadd.f32 %v6059_v3, %v6058_v58  ;;  %v8300_v32 = vadd.f32 %v8117_v51, %v1881_v24 }
 0x27e   : > { %v6061_v54 = vpop.f32.mrf.mxu1 }
 0x27f   : > { %v1886_v20 = vadd.f32 %v6060_v56, %v1725_v13  ;;  %v1744_v13 = vadd.f32 %v8584_v42, %v8204_v1  ;;  %v8589_v42 = vld [vmem:[#allocation29_spill] sm:$0xff] }
 0x280   : > { %v6062_v48 = vpop.f32.mrf.mxu1 }
 0x281   : > { %v6063_v37 = vadd.f32 %v6062_v48, %v6061_v54  ;;  %v8305_v25 = vadd.f32 %v8123_v14, %v1886_v20 }
 0x282   : > { %v6064_v41 = vpop.f32.mrf.mxu1 }
 0x283   : > { %v1889_v16 = vadd.f32 %v6063_v37, %v1728_v46  ;;  %v1749_v46 = vadd.f32 %v8585_v18, %v8204_v1  ;;  %v8590_v18 = vld [vmem:[#allocation30_spill] sm:$0xff] }
 0x284   : > { %v6065_v52 = vpop.f32.mrf.mxu1 }
 0x285   : > { %v6066_v6 = vadd.f32 %v6065_v52, %v6064_v41  ;;  %v8310_v51 = vadd.f32 %v8127_v44, %v1889_v16 }
 0x286   : > { %v6067_v53 = vpop.f32.mrf.mxu1 }
 0x287   : > { %v1894_v4 = vadd.f32 %v6066_v6, %v1733_v33  ;;  %v1752_v33 = vadd.f32 %v8586_v30, %v8204_v1  ;;  %v8591_v30 = vld [vmem:[#allocation31_spill] sm:$0xff] }
 0x288   : > { %v6068_v59 = vpop.f32.mrf.mxu1 }
 0x289   : > { %v6069_v11 = vadd.f32 %v6068_v59, %v6067_v53  ;;  %v8315_v14 = vadd.f32 %v8133_v39, %v1894_v4 }
 0x28a   : > { %v6070_v60 = vpop.f32.mrf.mxu1 }
 0x28b   : > { %v1897_v50 = vadd.f32 %v6069_v11, %v1736_v57  ;;  %v1757_v57 = vadd.f32 %v8587_v49, %v8204_v1  ;;  %v8592_v49 = vld [vmem:[#allocation32_spill] sm:$0xff] }
 0x28c   : > { %v6071_v28 = vpop.f32.mrf.mxu1 }
 0x28d   : > { %v6072_v58 = vadd.f32 %v6071_v28, %v6070_v60  ;;  %v8320_v44 = vadd.f32 %v8137_v8, %v1897_v50 }
 0x28e   : > { %v6073_v26 = vpop.f32.mrf.mxu1 }
 0x28f   : > { %v1902_v24 = vadd.f32 %v6072_v58, %v1741_v17  ;;  %v1760_v17 = vadd.f32 %v8588_v47, %v8204_v1  ;;  %v8593_v47 = vld [vmem:[#allocation33_spill] sm:$0xff] }
 0x290   : > { %v6074_v3 = vpop.f32.mrf.mxu1 }
 0x291   : > { %v6075_v56 = vadd.f32 %v6074_v3, %v6073_v26  ;;  %v8325_v39 = vadd.f32 %v8143_v63, %v1902_v24 }
 0x292   : > { %v6076_v54 = vpop.f32.mrf.mxu1 }
 0x293   : > { %v1905_v20 = vadd.f32 %v6075_v56, %v1744_v13  ;;  %v1765_v13 = vadd.f32 %v8589_v42, %v8204_v1  ;;  %v1784_v42 = vadd.f32 %v8189_v15, %v8204_v1  ;;  %v8597_v15 = vld [vmem:[#allocation37_spill] sm:$0xff] }
 0x294   : > { %v6077_v48 = vpop.f32.mrf.mxu1 }
 0x295   : > { %v6078_v37 = vadd.f32 %v6077_v48, %v6076_v54  ;;  %v8330_v8 = vadd.f32 %v8147_v23, %v1905_v20 }
 0x296   : > { %v6079_v41 = vpop.f32.mrf.mxu1 }
 0x297   : > { %v1910_v16 = vadd.f32 %v6078_v37, %v1749_v46  ;;  %v1768_v46 = vadd.f32 %v8590_v18, %v8204_v1  ;;  %v8595_v18 = vld [vmem:[#allocation35_spill] sm:$0xff] }
 0x298   : > { %v6080_v52 = vpop.f32.mrf.mxu1 }
 0x299   : > { %v6081_v6 = vadd.f32 %v6080_v52, %v6079_v41  ;;  %v8335_v63 = vadd.f32 %v8153_v19, %v1910_v16 }
 0x29a   : > { %v6082_v53 = vpop.f32.mrf.mxu1 }
 0x29b   : > { %v1913_v4 = vadd.f32 %v6081_v6, %v1752_v33  ;;  %v1773_v33 = vadd.f32 %v8591_v30, %v8204_v1  ;;  %v6821_v30 = vpop.f32.mrf.mxu0 }
 0x29c   : > { %v6083_v59 = vpop.f32.mrf.mxu1 }
 0x29d   : > { %v6084_v11 = vadd.f32 %v6083_v59, %v6082_v53  ;;  %v8340_v23 = vadd.f32 %v8157_v27, %v1913_v4 }
 0x29e   : > { %v6085_v60 = vpop.f32.mrf.mxu1 }
 0x29f   : > { %v1918_v50 = vadd.f32 %v6084_v11, %v1757_v57  ;;  %v1776_v57 = vadd.f32 %v8592_v49, %v8204_v1 }
 0x2a0   : > { %v6086_v28 = vpop.f32.mrf.mxu1 }
 0x2a1   : > { %v6087_v58 = vadd.f32 %v6086_v28, %v6085_v60  ;;  %v8345_v19 = vadd.f32 %v8163_v38, %v1918_v50 }
 0x2a2   : > { %v6088_v26 = vpop.f32.mrf.mxu1 }
 0x2a3   : > { %v1921_v24 = vadd.f32 %v6087_v58, %v1760_v17  ;;  %v1781_v17 = vadd.f32 %v8593_v47, %v8204_v1 }
 0x2a4   : > { %v6089_v3 = vpop.f32.mrf.mxu1 }
 0x2a5   : > { %v6090_v56 = vadd.f32 %v6089_v3, %v6088_v26  ;;  %v8350_v27 = vadd.f32 %v8167_v55, %v1921_v24 }
 0x2a6   : > { %v6091_v54 = vpop.f32.mrf.mxu1 }
 0x2a7   : > { %v1926_v20 = vadd.f32 %v6090_v56, %v1765_v13  ;;  %v8594_v56 = vld [vmem:[#allocation34_spill] sm:$0xff] }
 0x2a8   : > { %v6092_v48 = vpop.f32.mrf.mxu1 }
 0x2a9   : > { %v6093_v37 = vadd.f32 %v6092_v48, %v6091_v54  ;;  %v8355_v38 = vadd.f32 %v8173_v61, %v1926_v20 }
 0x2aa   : > { %v6094_v41 = vpop.f32.mrf.mxu1 }
 0x2ab   : > { %v1929_v16 = vadd.f32 %v6093_v37, %v1768_v46  ;;  %v1789_v46 = vadd.f32 %v8595_v18, %v8204_v1 }
 0x2ac   : > { %v6095_v52 = vpop.f32.mrf.mxu1 }
 0x2ad   : > { %v6096_v6 = vadd.f32 %v6095_v52, %v6094_v41  ;;  %v8360_v55 = vadd.f32 %v8177_v10, %v1929_v16  ;;  %v8596_v41 = vld [vmem:[#allocation36_spill] sm:$0xff] }
 0x2ae   : > { %v6097_v53 = vpop.f32.mrf.mxu1 }
 0x2af   : > { %v1934_v4 = vadd.f32 %v6096_v6, %v1773_v33  ;;  %v1792_v6 = vadd.f32 %v8597_v15, %v8204_v1 }
 0x2b0   : > { %v6098_v59 = vpop.f32.mrf.mxu1 }
 0x2b1   : > { %v6099_v11 = vadd.f32 %v6098_v59, %v6097_v53  ;;  %v8365_v61 = vadd.f32 %v8183_v22, %v1934_v4 }
 0x2b2   : > { %v6100_v60 = vpop.f32.mrf.mxu1 }
 0x2b3   : > { %v1937_v50 = vadd.f32 %v6099_v11, %v1776_v57  ;;  %v2312_v57 = vpop.f32.mrf.mxu0 }
 0x2b4   : > { %v6101_v28 = vpop.f32.mrf.mxu1 }
 0x2b5   : > { %v6102_v58 = vadd.f32 %v6101_v28, %v6100_v60  ;;  %v8370_v10 = vadd.f32 %v8187_v34, %v1937_v50 }
 0x2b6   : > { %v6103_v26 = vpop.f32.mrf.mxu1 }
 0x2b7   : > { %v1942_v24 = vadd.f32 %v6102_v58, %v1781_v17  ;;  %v6822_v17 = vpop.f32.mrf.mxu0 }
 0x2b8   : > { %v6104_v3 = vpop.f32.mrf.mxu1 }
 0x2b9   : > { %v6105_v13 = vadd.f32 %v6104_v3, %v6103_v26  ;;  %v8375_v22 = vadd.f32 %v8594_v56, %v1942_v24  ;;  %v2315_v56 = vpop.f32.mrf.mxu0 }
 0x2ba   : > { %v6106_v54 = vpop.f32.mrf.mxu1 }
 0x2bb   : > { %v1945_v20 = vadd.f32 %v6105_v13, %v1784_v42  ;;  %v6990_v42 = vld [vmem:[#allocation2 + $0x138] sm:$0xff]   ;;  %v8393_v15 = vpop.f32.mrf.mxu0 }
 0x2bc   : > { %v6107_v48 = vpop.f32.mrf.mxu1  ;;  %v6991_v13 = vld [vmem:[#allocation2 + $0xf8] sm:$0xff]  }
 0x2bd   : > { %v6108_v37 = vadd.f32 %v6107_v48, %v6106_v54  ;;  %v8380_v34 = vadd.f32 %v8596_v41, %v1945_v20  ;;  %v6992_v20 = vld [vmem:[#allocation2 + $0xb8] sm:$0xff]   ;;  %v6993_v48 = vld [vmem:[#allocation2 + $0xf0] sm:$0xff]   ;;  %6360 = vmatprep.subr.bf16.mxu0 %v6991_v13  ;;  %v7008_v13 = vld [vmem:[#allocation2 + $0x120] sm:$0xff]  }
 0x2be   : > { %v6109_v16 = vpop.f32.mrf.mxu1  ;;  %6361 = vmatpush3.bf16.msra.mxu0 %v6992_v20  ;;  %v6996_v41 = vld [vmem:[#allocation2 + $0x130] sm:$0xff]  }
 0x2bf   : > { %v1950_v52 = vadd.f32 %v6108_v37, %v1789_v46  ;;  %v6995_v46 = vld [vmem:[#allocation2 + $0x170] sm:$0xff]   ;;  %6362 = vmatprep.subr.bf16.mxu0 %v6993_v48 }
 0x2c0   : > { %v6110_v33 = vpop.f32.mrf.mxu1  ;;  %v6994_v37 = vld [vmem:[#allocation2 + $0xb0] sm:$0xff]  }
 0x2c1   : > { %v6111_v53 = vadd.f32 %v6110_v33, %v6109_v16  ;;  %v8385_v4 = vadd.f32 %v8208_v62, %v1950_v52  ;;  %v6989_v62 = vld [vmem:[#allocation2 + $0x178] sm:$0xff]   ;;  %v6997_v33 = vld [vmem:[#allocation2 + $0xe8] sm:$0xff]  }
 0x2c2   : > { %v6240_v59 = vpop.f32.mrf.mxu1  ;;  %6404 = vmatprep.subr.bf16.mxu1 %v6989_v62  ;;  %6363 = vmatpush3.bf16.msra.mxu0 %v6994_v37  ;;  %v7012_v37 = vld [vmem:[#allocation2 + $0x118] sm:$0xff]  }
 0x2c3   : > { %v1953_v49 = vadd.f32 %v6111_v53, %v1792_v6  ;;  %6405 = vmatpush3.bf16.msra.mxu1 %v6990_v42  ;;  %v7001_v53 = vld [vmem:[#allocation2 + $0x168] sm:$0xff]   ;;  %6364 = vmatprep.subr.bf16.mxu0 %v6997_v33  ;;  %v7000_v42 = vld [vmem:[#allocation2 + $0xa0] sm:$0xff]  }
 0x2c4   : > { %v6241_v11 = vpop.f32.mrf.mxu1  ;;  %6406 = vmatprep.subr.bf16.mxu1 %v6995_v46 }
 0x2c5   : > { %v6242_v60 = vadd.f32 %v6241_v11, %v6240_v59  ;;  %v8388_v50 = vadd.f32 %v8212_v5, %v1953_v49  ;;  %v6998_v11 = vld [vmem:[#allocation2 + $0xa8] sm:$0xff]  }
 0x2c6   : > { %v6243_v28 = vpop.f32.mrf.mxu1  ;;  %6365 = vmatpush3.bf16.msra.mxu0 %v6998_v11 }
 0x2c7   : > { %v2152_v47 = vadd.f32 %v6242_v60, %v8217_v43  ;;  %6407 = vmatpush3.bf16.msra.mxu1 %v6996_v41  ;;  %v7002_v60 = vld [vmem:[#allocation2 + $0x128] sm:$0xff]  }
 0x2c8   : > { %v6244_v58 = vpop.f32.mrf.mxu1  ;;  %6408 = vmatprep.subr.bf16.mxu1 %v7001_v53 }
 0x2c9   : > { %v6245_v26 = vadd.f32 %v6244_v58, %v6243_v28  ;;  %v2313_v3 = vadd.f32 %v2312_v57, %v2152_v47  ;;  %v6999_v47 = vld [vmem:[#allocation2 + $0xe0] sm:$0xff]  }
 0x2ca   : > { %v6246_v24 = vpop.f32.mrf.mxu1  ;;  %v7007_v58 = vld [vmem:[#allocation2 + $0x160] sm:$0xff]   ;;  %6366 = vmatprep.subr.bf16.mxu0 %v6999_v47 }
 0x2cb   : > { %v2155_v1 = vadd.f32 %v6245_v26, %v8225_v31  ;;  %v2439_v16 = vmax.f32 %v2313_v3, 0.0  ;;  %v2328_v26 = vpop.f32.mrf.mxu0  ;;  %6409 = vmatpush3.bf16.msra.mxu1 %v7002_v60  ;;  %6367 = vmatpush3.bf16.msra.mxu0 %v7000_v42 }
 0x2cc   : > { %v6247_v54 = vpop.f32.mrf.mxu1  ;;  %6410 = vmatprep.subr.bf16.mxu1 %v7007_v58  ;;  %v7016_v58 = vld [vmem:[#allocation2 + $0x148] sm:$0xff]  }
 0x2cd   : > { %v6248_v18 = vadd.f32 %v6247_v54, %v6246_v24  ;;  %v2316_v5 = vadd.f32 %v2315_v56, %v2155_v1 }
 0x2ce   : > { %v6249_v43 = vpop.f32.mrf.mxu1 }
 0x2cf   : > { %v2160_v31 = vadd.f32 %v6248_v18, %v8230_v21  ;;  %v2440_v52 = vmax.f32 %v2316_v5, 0.0  ;;  %v7010_v18 = vld [vmem:[#allocation2 + $0x158] sm:$0xff]   ;;  %6411 = vmatpush3.bf16.msra.mxu1 %v7008_v13  ;;  %v7015_v13 = vld [vmem:[#allocation2 + $0xc0] sm:$0xff]  }
 0x2d0   : > { %v6250_v6 = vpop.f32.mrf.mxu1  ;;  %6412 = vmatprep.subr.bf16.mxu1 %v7010_v18 }
 0x2d1   : > { %v6251_v59 = vadd.f32 %v6250_v6, %v6249_v43  ;;  %v2471_v49 = vpack.c.bf16 %v2440_v52, %v2439_v16  ;;  %v2321_v21 = vadd.f32 %v6821_v30, %v2160_v31  ;;  %v6826_v30 = vpop.f32.mrf.mxu0  ;;  %v7013_v16 = vld [vmem:[#allocation2 + $0x150] sm:$0xff]  }
 0x2d2   : > { %v6252_v57 = vpop.f32.mrf.mxu1 }
 0x2d3   : > { %v2163_v28 = vadd.f32 %v6251_v59, %v8238_v2  ;;  %2487 = vxpose.xlu1.c.b16.start [1/8] (narrow) %v2471_v49, 16  ;;  %v2441_v54 = vmax.f32 %v2321_v21, 0.0  ;;  %v7003_v2 = vld [vmem:[#allocation2 + $0xd8] sm:$0xff]   ;;  %v2331_v52 = vpop.f32.mrf.mxu0  ;;  %v7006_v49 = vld [vmem:[#allocation2 + $0x90] sm:$0xff]   ;;  %6413 = vmatpush3.bf16.msra.mxu1 %v7012_v37 }
 0x2d4   : > { %v6253_v24 = vpop.f32.mrf.mxu1  ;;  %6368 = vmatprep.subr.bf16.mxu0 %v7003_v2  ;;  %6414 = vmatprep.subr.bf16.mxu1 %v7013_v16 }
 0x2d5   : > { %v6254_v1 = vadd.f32 %v6253_v24, %v6252_v57  ;;  %v2324_v3 = vadd.f32 %v6822_v17, %v2163_v28  ;;  %v7004_v17 = vld [vmem:[#allocation2 + $0x98] sm:$0xff]   ;;  %v7014_v57 = vld [vmem:[#allocation2 + $0x110] sm:$0xff]   ;;  %v6829_v21 = vpop.f32.mrf.mxu0 }
 0x2d6   : > { %v6255_v62 = vpop.f32.mrf.mxu1  ;;  %6369 = vmatpush3.bf16.msra.mxu0 %v7004_v17 }
 0x2d7   : > { %v2168_v56 = vadd.f32 %v6254_v1, %v8243_v40  ;;  %v2442_v20 = vmax.f32 %v2324_v3, 0.0  ;;  %v7005_v40 = vld [vmem:[#allocation2 + $0xd0] sm:$0xff]   ;;  %v7011_v3 = vld [vmem:[#allocation2 + $0x88] sm:$0xff]   ;;  %6415 = vmatpush3.bf16.msra.mxu1 %v7014_v57 }
 0x2d8   : > { %v6256_v48 = vpop.f32.mrf.mxu1  ;;  %6370 = vmatprep.subr.bf16.mxu0 %v7005_v40  ;;  %6416 = vmatprep.subr.bf16.mxu1 %v7016_v58 }
 0x2d9   : > { %v6257_v5 = vadd.f32 %v6256_v48, %v6255_v62  ;;  %v2472_v46 = vpack.c.bf16 %v2442_v20, %v2441_v54  ;;  %v2329_v31 = vadd.f32 %v2328_v26, %v2168_v56  ;;  %v7018_v62 = vld [vmem:[#allocation2 + $0x108] sm:$0xff]   ;;  %v7019_v56 = vld [vmem:[#allocation2 + $0x140] sm:$0xff]   ;;  %v2344_v54 = vpop.f32.mrf.mxu0 }
 0x2da   : > { %v6258_v43 = vpop.f32.mrf.mxu1  ;;  %6371 = vmatpush3.bf16.msra.mxu0 %v7006_v49 }
 0x2db   : > { %v2171_v41 = vadd.f32 %v6257_v5, %v8251_v7  ;;  %2488 = vxpose.xlu1.c.b16.cont [2/8] (narrow) %v2472_v46, 16  ;;  %v2443_v60 = vmax.f32 %v2329_v31, 0.0  ;;  %v7009_v7 = vld [vmem:[#allocation2 + $0xc8] sm:$0xff]   ;;  %v7017_v5 = vld [vmem:[#allocation2 + $0x80] sm:$0xff]   ;;  %6417 = vmatpush3.bf16.msra.mxu1 %v7018_v62 }
 0x2dc   : > { %v6259_v33 = vpop.f32.mrf.mxu1  ;;  %6372 = vmatprep.subr.bf16.mxu0 %v7009_v7  ;;  %v7020_v46 = vld [vmem:[#allocation2 + $0x100] sm:$0xff]   ;;  %6418 = vmatprep.subr.bf16.mxu1 %v7019_v56 }
 0x2dd   : > { %v6260_v6 = vadd.f32 %v6259_v33, %v6258_v43  ;;  %v2332_v53 = vadd.f32 %v2331_v52, %v2171_v41 }
 0x2de   : > { %v6261_v59 = vpop.f32.mrf.mxu1  ;;  %6373 = vmatpush3.bf16.msra.mxu0 %v7011_v3 }
 0x2df   : > { %v2176_v11 = vadd.f32 %v6260_v6, %v8256_v29  ;;  %v2444_v28 = vmax.f32 %v2332_v53, 0.0  ;;  %6374 = vmatprep.subr.bf16.mxu0 %v7015_v13  ;;  %6419 = vmatpush3.bf16.msra.mxu1 %v7020_v46 }
 0x2e0   : > { %v6262_v47 = vpop.f32.mrf.mxu1 }
 0x2e1   : > { %v6263_v26 = vadd.f32 %v6262_v47, %v6261_v59  ;;  %v2473_v24 = vpack.c.bf16 %v2444_v28, %v2443_v60  ;;  %v2337_v29 = vadd.f32 %v8393_v15, %v2176_v11  ;;  %v6830_v15 = vpop.f32.mrf.mxu0 }
 0x2e2   : > { %v6264_v1 = vpop.f32.mrf.mxu1  ;;  %6375 = vmatpush3.bf16.msra.mxu0 %v7017_v5 }
 0x2e3   : > { %v2179_v42 = vadd.f32 %v6263_v26, %v8264_v12  ;;  %2489 = vxpose.xlu1.c.b16.cont [3/8] (narrow) %v2473_v24, 16  ;;  %v2445_v17 = vmax.f32 %v2337_v29, 0.0  ;;  %v2347_v52 = vpop.f32.mrf.mxu0 }
 0x2e4   : > { %v6265_v20 = vpop.f32.mrf.mxu1 }
 0x2e5   : > { %v6266_v2 = vadd.f32 %v6265_v20, %v6264_v1  ;;  %v2340_v48 = vadd.f32 %v6826_v30, %v2179_v42  ;;  %v6833_v11 = vpop.f32.mrf.mxu0 }
 0x2e6   : > { %v6267_v18 = vpop.f32.mrf.mxu1 }
 0x2e7   : > { %v2184_v43 = vadd.f32 %v6266_v2, %v8269_v35  ;;  %v2446_v12 = vmax.f32 %v2340_v48, 0.0  ;;  %v2360_v26 = vpop.f32.mrf.mxu0 }
 0x2e8   : > { %v6268_v37 = vpop.f32.mrf.mxu1 }
 0x2e9   : > { %v6269_v41 = vadd.f32 %v6268_v37, %v6267_v18  ;;  %v2474_v31 = vpack.c.bf16 %v2446_v12, %v2445_v17  ;;  %v2345_v16 = vadd.f32 %v2344_v54, %v2184_v43  ;;  %v6834_v13 = vpop.f32.mrf.mxu0 }
 0x2ea   : > { %v6270_v40 = vpop.f32.mrf.mxu1 }
 0x2eb   : > { %v2187_v30 = vadd.f32 %v6269_v41, %v8277_v9  ;;  %2490 = vxpose.xlu1.c.b16.cont [4/8] (narrow) %v2474_v31, 16  ;;  %v2447_v49 = vmax.f32 %v2345_v16, 0.0  ;;  %v2363_v18 = vpop.f32.mrf.mxu0 }
 0x2ec   : > { %v6271_v33 = vpop.f32.mrf.mxu1 }
 0x2ed   : > { %v6272_v6 = vadd.f32 %v6271_v33, %v6270_v40  ;;  %v2348_v53 = vadd.f32 %v2347_v52, %v2187_v30 }
 0x2ee   : > { %v6273_v35 = vpop.f32.mrf.mxu1 }
 0x2ef   : > { %v2192_v59 = vadd.f32 %v6272_v6, %v8282_v45  ;;  %v2448_v57 = vmax.f32 %v2348_v53, 0.0 }
 0x2f0   : > { %v6274_v60 = vpop.f32.mrf.mxu1 }
 0x2f1   : > { %v6275_v28 = vadd.f32 %v6274_v60, %v6273_v35  ;;  %v2475_v7 = vpack.c.bf16 %v2448_v57, %v2447_v49  ;;  %v2353_v9 = vadd.f32 %v6829_v21, %v2192_v59 }
 0x2f2   : > { %v6276_v47 = vpop.f32.mrf.mxu1 }
 0x2f3   : > { %v2195_v58 = vadd.f32 %v6275_v28, %v8289_v36  ;;  %2491 = vxpose.xlu1.c.b16.cont [5/8] (narrow) %v2475_v7, 16  ;;  %v2449_v29 = vmax.f32 %v2353_v9, 0.0 }
 0x2f4   : > { %v6277_v24 = vpop.f32.mrf.mxu1 }
 0x2f5   : > { %v6278_v1 = vadd.f32 %v6277_v24, %v6276_v47  ;;  %v2356_v3 = vadd.f32 %v6830_v15, %v2195_v58  ;;  %v6837_v15 = vpop.f32.mrf.mxu0 }
 0x2f6   : > { %v6279_v62 = vpop.f32.mrf.mxu1 }
 0x2f7   : > { %v2200_v42 = vadd.f32 %v6278_v1, %v8294_v0  ;;  %v2450_v45 = vmax.f32 %v2356_v3, 0.0  ;;  %v2376_v16 = vpop.f32.mrf.mxu0 }
 0x2f8   : > { %v6280_v56 = vpop.f32.mrf.mxu1 }
 0x2f9   : > { %v6281_v54 = vadd.f32 %v6280_v56, %v6279_v62  ;;  %v2476_v20 = vpack.c.bf16 %v2450_v45, %v2449_v29  ;;  %v2361_v36 = vadd.f32 %v2360_v26, %v2200_v42  ;;  %v6838_v49 = vpop.f32.mrf.mxu0  ;;  %v7021_v56 = vld [vmem:[#allocation2 + $0x78] sm:$0xff]  }
 0x2fa   : > { %v6282_v2 = vpop.f32.mrf.mxu1  ;;  %6382 = vmatprep.subr.bf16.mxu0 %v7021_v56 }
 0x2fb   : > { %v2203_v48 = vadd.f32 %v6281_v54, %v8300_v32  ;;  %2492 = vxpose.xlu1.c.b16.cont [6/8] (narrow) %v2476_v20, 16  ;;  %v2451_v12 = vmax.f32 %v2361_v36, 0.0  ;;  %v2379_v58 = vpop.f32.mrf.mxu0  ;;  %v7022_v54 = vld [vmem:[#allocation2 + $0x278] sm:$0xff]  }
 0x2fc   : > { %v6283_v21 = vpop.f32.mrf.mxu1  ;;  %6448 = vmatprep.subr.bf16.mxu1 %v7022_v54 }
 0x2fd   : > { %v6284_v5 = vadd.f32 %v6283_v21, %v6282_v2  ;;  %v2364_v46 = vadd.f32 %v2363_v18, %v2203_v48  ;;  %v6841_v62 = vpop.f32.mrf.mxu0 }
 0x2fe   : > { %v6285_v43 = vpop.f32.mrf.mxu1 }
 0x2ff   : > { %v2208_v17 = vadd.f32 %v6284_v5, %v8305_v25  ;;  %v2452_v0 = vmax.f32 %v2364_v46, 0.0  ;;  %v2392_v2 = vpop.f32.mrf.mxu0 }
 0x300   : > { %v6286_v37 = vpop.f32.mrf.mxu1 }
 0x301   : > { %v6287_v41 = vadd.f32 %v6286_v37, %v6285_v43  ;;  %v2477_v31 = vpack.c.bf16 %v2452_v0, %v2451_v12  ;;  %v2369_v32 = vadd.f32 %v6833_v11, %v2208_v17  ;;  %v6842_v43 = vpop.f32.mrf.mxu0 }
 0x302   : > { %v6288_v40 = vpop.f32.mrf.mxu1 }
 0x303   : > { %v2211_v30 = vadd.f32 %v6287_v41, %v8310_v51  ;;  %2493 = vxpose.xlu1.c.b16.cont [7/8] (narrow) %v2477_v31, 16  ;;  %v2453_v59 = vmax.f32 %v2369_v32, 0.0  ;;  %v2395_v41 = vpop.f32.mrf.mxu0 }
 0x304   : > { %v6289_v52 = vpop.f32.mrf.mxu1 }
 0x305   : > { %v6290_v33 = vadd.f32 %v6289_v52, %v6288_v40  ;;  %v2372_v6 = vadd.f32 %v6834_v13, %v2211_v30 }
 0x306   : > { %v6291_v53 = vpop.f32.mrf.mxu1 }
 0x307   : > { %v2216_v35 = vadd.f32 %v6290_v33, %v8315_v14  ;;  %v2454_v25 = vmax.f32 %v2372_v6, 0.0  ;;  %v6845_v33 = vpop.f32.mrf.mxu0 }
 0x308   : > { %v6292_v57 = vpop.f32.mrf.mxu1 }
 0x309   : > { %v6293_v60 = vadd.f32 %v6292_v57, %v6291_v53  ;;  %v2478_v28 = vpack.c.bf16 %v2454_v25, %v2453_v59  ;;  %v2377_v51 = vadd.f32 %v2376_v16, %v2216_v35 }
 0x30a   : > { %v6294_v7 = vpop.f32.mrf.mxu1 }
 0x30b   : > { %v2219_v47 = vadd.f32 %v6293_v60, %v8320_v44  ;;  %2494 = vxpose.xlu1.c.b16.end [8/8] (narrow) %v2478_v28, 16  ;;  %v2455_v3 = vmax.f32 %v2377_v51, 0.0 }
 0x30c   : > { %v6295_v11 = vpop.f32.mrf.mxu1 }
 0x30d   : > { %v6296_v9 = vadd.f32 %v6295_v11, %v6294_v7  ;;  %v2380_v26 = vadd.f32 %v2379_v58, %v2219_v47 }
 0x30e   : > { %v6297_v24 = vpop.f32.mrf.mxu1 }
 0x30f   : > { %v2224_v1 = vadd.f32 %v6296_v9, %v8325_v39  ;;  %v2456_v14 = vmax.f32 %v2380_v26, 0.0 }
 0x310   : > { %v6298_v42 = vpop.f32.mrf.mxu1 }
 0x311   : > { %v6299_v29 = vadd.f32 %v6298_v42, %v6297_v24  ;;  %v2479_v45 = vpack.c.bf16 %v2456_v14, %v2455_v3  ;;  %v2385_v20 = vadd.f32 %v6837_v15, %v2224_v1 }
 0x312   : > { %v6300_v13 = vpop.f32.mrf.mxu1 }
 0x313   : > { %v2227_v44 = vadd.f32 %v6299_v29, %v8330_v8  ;;  %2503 = vxpose.xlu0.c.b16.start [1/8] (narrow) %v2479_v45, 16  ;;  %v2457_v5 = vmax.f32 %v2385_v20, 0.0 }
 0x314   : > { %v6301_v48 = vpop.f32.mrf.mxu1 }
 0x315   : > { %v6302_v36 = vadd.f32 %v6301_v48, %v6300_v13  ;;  %v2388_v18 = vadd.f32 %v6838_v49, %v2227_v44  ;;  %v2408_v49 = vpop.f32.mrf.mxu0 }
 0x316   : > { %v6303_v39 = vpop.f32.mrf.mxu1 }
 0x317   : > { %v2232_v21 = vadd.f32 %v6302_v36, %v8335_v63  ;;  %v2458_v46 = vmax.f32 %v2388_v18, 0.0  ;;  %v6846_v58 = vpop.f32.mrf.mxu0 }
 0x318   : > { %v6304_v17 = vpop.f32.mrf.mxu1 }
 0x319   : > { %v6305_v12 = vadd.f32 %v6304_v17, %v6303_v39  ;;  %v2480_v0 = vpack.c.bf16 %v2458_v46, %v2457_v5  ;;  %v2393_v15 = vadd.f32 %v2392_v2, %v2232_v21  ;;  %v2411_v3 = vpop.f32.mrf.mxu0 }
 0x31a   : > { %v6306_v37 = vpop.f32.mrf.mxu1 }
 0x31b   : > { %v2235_v8 = vadd.f32 %v6305_v12, %v8340_v23  ;;  %2504 = vxpose.xlu0.c.b16.cont [2/8] (narrow) %v2480_v0, 16  ;;  %v2459_v52 = vmax.f32 %v2393_v15, 0.0  ;;  %v6849_v56 = vpop.f32.mrf.mxu0 }
 0x31c   : > { %v6307_v31 = vpop.f32.mrf.mxu1 }
 0x31d   : > { %v6308_v40 = vadd.f32 %v6307_v31, %v6306_v37  ;;  %v2396_v30 = vadd.f32 %v2395_v41, %v2235_v8  ;;  %v2424_v36 = vpop.f32.mrf.mxu0 }
 0x31e   : > { %v6309_v32 = vpop.f32.mrf.mxu1 }
 0x31f   : > { %v2240_v16 = vadd.f32 %v6308_v40, %v8345_v19  ;;  %v2460_v63 = vmax.f32 %v2396_v30, 0.0  ;;  %v6850_v17 = vpop.f32.mrf.mxu0 }
 0x320   : > { %v6310_v6 = vpop.f32.mrf.mxu1 }
 0x321   : > { %v6311_v53 = vadd.f32 %v6310_v6, %v6309_v32  ;;  %v2481_v35 = vpack.c.bf16 %v2460_v63, %v2459_v52  ;;  %v2401_v23 = vadd.f32 %v6841_v62, %v2240_v16  ;;  %v2427_v41 = vpop.f32.mrf.mxu0 }
 0x322   : > { %v6312_v59 = vpop.f32.mrf.mxu1 }
 0x323   : > { %v2243_v25 = vadd.f32 %v6311_v53, %v8350_v27  ;;  %2505 = vxpose.xlu0.c.b16.cont [3/8] (narrow) %v2481_v35, 16  ;;  %v2461_v51 = vmax.f32 %v2401_v23, 0.0 }
 0x324   : > { %v6313_v57 = vpop.f32.mrf.mxu1 }
 0x325   : > { %v6314_v60 = vadd.f32 %v6313_v57, %v6312_v59  ;;  %v2404_v28 = vadd.f32 %v6842_v43, %v2243_v25 }
 0x326   : > { %v6315_v7 = vpop.f32.mrf.mxu1 }
 0x327   : > { %v2248_v47 = vadd.f32 %v6314_v60, %v8355_v38  ;;  %v2462_v19 = vmax.f32 %v2404_v28, 0.0 }
 0x328   : > { %v6316_v11 = vpop.f32.mrf.mxu1 }
 0x329   : > { %v6317_v9 = vadd.f32 %v6316_v11, %v6315_v7  ;;  %v2482_v26 = vpack.c.bf16 %v2462_v19, %v2461_v51  ;;  %v2409_v27 = vadd.f32 %v2408_v49, %v2248_v47  ;;  %v7023_v7 = vld [vmem:[#allocation2 + $0x38] sm:$0xff]   ;;  %v7025_v51 = vld [vmem:[#allocation2 + $0x70] sm:$0xff]  }
 0x32a   : > { %v6318_v24 = vpop.f32.mrf.mxu1  ;;  %v7024_v47 = vld [vmem:[#allocation2 + $0x238] sm:$0xff]   ;;  %v7026_v19 = vld [vmem:[#allocation2 + $0x270] sm:$0xff]  }
 0x32b   : > { %v2251_v1 = vadd.f32 %v6317_v9, %v8360_v55  ;;  %2506 = vxpose.xlu0.c.b16.cont [4/8] (narrow) %v2482_v26, 16  ;;  %v2463_v13 = vmax.f32 %v2409_v27, 0.0  ;;  %v7027_v11 = vld [vmem:[#allocation2 + $0x30] sm:$0xff]   ;;  %v7029_v26 = vld [vmem:[#allocation2 + $0x68] sm:$0xff]  }
 0x32c   : > { %v6319_v14 = vpop.f32.mrf.mxu1  ;;  %v7028_v9 = vld [vmem:[#allocation2 + $0x230] sm:$0xff]   ;;  %v7032_v27 = vld [vmem:[#allocation2 + $0x228] sm:$0xff]  }
 0x32d   : > { %v6320_v62 = vadd.f32 %v6319_v14, %v6318_v24  ;;  %v2412_v42 = vadd.f32 %v2411_v3, %v2251_v1  ;;  %v7030_v24 = vld [vmem:[#allocation2 + $0x268] sm:$0xff]   ;;  %v7033_v3 = vld [vmem:[#allocation2 + $0x60] sm:$0xff]  }
 0x32e   : > { %v6321_v29 = vpop.f32.mrf.mxu1  ;;  %v7031_v1 = vld [vmem:[#allocation2 + $0x28] sm:$0xff]   ;;  %v7034_v14 = vld [vmem:[#allocation2 + $0x260] sm:$0xff]  }
 0x32f   : > { %v2256_v45 = vadd.f32 %v6320_v62, %v8365_v61  ;;  %v2464_v38 = vmax.f32 %v2412_v42, 0.0  ;;  %v7035_v62 = vld [vmem:[#allocation2 + $0x20] sm:$0xff]  }
 0x330   : > { %v6322_v54 = vpop.f32.mrf.mxu1  ;;  %v7036_v42 = vld [vmem:[#allocation2 + $0x220] sm:$0xff]  }
 0x331   : > { %v6323_v44 = vadd.f32 %v6322_v54, %v6321_v29  ;;  %v2483_v20 = vpack.c.bf16 %v2464_v38, %v2463_v13  ;;  %v2417_v55 = vadd.f32 %v6845_v33, %v2256_v45  ;;  %v7037_v29 = vld [vmem:[#allocation2 + $0x58] sm:$0xff]   ;;  %v7042_v54 = vld [vmem:[#allocation2 + $0x250] sm:$0xff]  }
 0x332   : > { %v6324_v2 = vpop.f32.mrf.mxu1  ;;  %v7038_v45 = vld [vmem:[#allocation2 + $0x258] sm:$0xff]  }
 0x333   : > { %v2259_v48 = vadd.f32 %v6323_v44, %v8370_v10  ;;  %2507 = vxpose.xlu0.c.b16.cont [5/8] (narrow) %v2483_v20, 16  ;;  %v2465_v43 = vmax.f32 %v2417_v55, 0.0  ;;  %v7039_v13 = vld [vmem:[#allocation2 + $0x18] sm:$0xff]   ;;  %v7043_v44 = vld [vmem:[#allocation2 + $0x10] sm:$0xff]   ;;  %v7047_v55 = vld [vmem:[#allocation2 + $0x8] sm:$0xff]  }
 0x334   : > { %v6325_v18 = vpop.f32.mrf.mxu1  ;;  %v7040_v38 = vld [vmem:[#allocation2 + $0x218] sm:$0xff]   ;;  %v7044_v20 = vld [vmem:[#allocation2 + $0x210] sm:$0xff]  }
 0x335   : > { %v6326_v39 = vadd.f32 %v6325_v18, %v6324_v2  ;;  %v2420_v21 = vadd.f32 %v6846_v58, %v2259_v48  ;;  %v7045_v2 = vld [vmem:[#allocation2 + $0x48] sm:$0xff]   ;;  %v7049_v18 = vld [vmem:[#allocation2 + $0x40] sm:$0xff]  }
 0x336   : > { %v6327_v5 = vpop.f32.mrf.mxu1  ;;  %v7046_v48 = vld [vmem:[#allocation2 + $0x248] sm:$0xff]  }
 0x337   : > { %v2264_v46 = vadd.f32 %v6326_v39, %v8375_v22  ;;  %v2466_v61 = vmax.f32 %v2420_v21, 0.0  ;;  %v7050_v39 = vld [vmem:[#allocation2 + $0x240] sm:$0xff]  }
 0x338   : > { %v6328_v12 = vpop.f32.mrf.mxu1  ;;  %v7051_v21 = vld [vmem:[#allocation2] sm:$0xff]  }
 0x339   : > { %v6329_v0 = vadd.f32 %v6328_v12, %v6327_v5  ;;  %v2484_v37 = vpack.c.bf16 %v2466_v61, %v2465_v43  ;;  %v2425_v10 = vadd.f32 %v2424_v36, %v2264_v46  ;;  %v7048_v36 = vld [vmem:[#allocation2 + $0x208] sm:$0xff]   ;;  %v7052_v5 = vld [vmem:[#allocation2 + $0x200] sm:$0xff]   ;;  %v7053_v46 = vld [vmem:[#allocation2 + $0x1f8] sm:$0xff]  }
 0x33a   : > { %v6330_v8 = vpop.f32.mrf.mxu1  ;;  %v7054_v43 = vld [vmem:[#allocation2 + $0x378] sm:$0xff]  }
 0x33b   : > { %v2267_v15 = vadd.f32 %v6329_v0, %v8380_v34  ;;  %2508 = vxpose.xlu0.c.b16.cont [6/8] (narrow) %v2484_v37, 16  ;;  %v2467_v52 = vmax.f32 %v2425_v10, 0.0  ;;  %v7055_v61 = vld [vmem:[#allocation2 + $0x1b8] sm:$0xff]   ;;  %v7057_v37 = vld [vmem:[#allocation2 + $0x1f0] sm:$0xff]  }
 0x33c   : > { %v6331_v31 = vpop.f32.mrf.mxu1  ;;  %v7056_v12 = vld [vmem:[#allocation2 + $0x338] sm:$0xff]   ;;  %v7059_v10 = vld [vmem:[#allocation2 + $0x1b0] sm:$0xff]  }
 0x33d   : > { %v6332_v40 = vadd.f32 %v6331_v31, %v6330_v8  ;;  %v2428_v30 = vadd.f32 %v2427_v41, %v2267_v15  ;;  %v7058_v8 = vld [vmem:[#allocation2 + $0x370] sm:$0xff]   ;;  %v7061_v31 = vld [vmem:[#allocation2 + $0x1e8] sm:$0xff]  }
 0x33e   : > { %v6333_v32 = vpop.f32.mrf.mxu1  ;;  %v7060_v41 = vld [vmem:[#allocation2 + $0x330] sm:$0xff]  }
 0x33f   : > { %v2272_v16 = vadd.f32 %v6332_v40, %v8385_v4  ;;  %v2468_v22 = vmax.f32 %v2428_v30, 0.0  ;;  %v7062_v40 = vld [vmem:[#allocation2 + $0x368] sm:$0xff]  }
 0x340   : > { %v6334_v63 = vpop.f32.mrf.mxu1  ;;  %v7063_v30 = vld [vmem:[#allocation2 + $0x1a8] sm:$0xff]  }
 0x341   : > { %v6335_v33 = vadd.f32 %v6334_v63, %v6333_v32  ;;  %v2485_v6 = vpack.c.bf16 %v2468_v22, %v2467_v52  ;;  %v2433_v35 = vadd.f32 %v6849_v56, %v2272_v16  ;;  %v7041_v56 = vld [vmem:[#allocation2 + $0x50] sm:$0xff]   ;;  %v7064_v32 = vld [vmem:[#allocation2 + $0x328] sm:$0xff]   ;;  %v7065_v16 = vld [vmem:[#allocation2 + $0x1e0] sm:$0xff]  }
 0x342   : > { %v7066_v52 = vld [vmem:[#allocation2 + $0x360] sm:$0xff]  }
 0x343   : > { %v2275_v53 = vadd.f32 %v6335_v33, %v8388_v50  ;;  %2509 = vxpose.xlu0.c.b16.cont [7/8] (narrow) %v2485_v6, 16  ;;  %v2469_v34 = vmax.f32 %v2433_v35, 0.0  ;;  %v7067_v22 = vld [vmem:[#allocation2 + $0x1a0] sm:$0xff]   ;;  %v7069_v33 = vld [vmem:[#allocation2 + $0x1d8] sm:$0xff]  }
 0x344   : > { %v7068_v63 = vld [vmem:[#allocation2 + $0x320] sm:$0xff]   ;;  %v7070_v6 = vld [vmem:[#allocation2 + $0x358] sm:$0xff]  }
 0x345   : > { %v2436_v59 = vadd.f32 %v6850_v17, %v2275_v53  ;;  %v7071_v53 = vld [vmem:[#allocation2 + $0x198] sm:$0xff]  }
 0x346   : > { %v7072_v35 = vld [vmem:[#allocation2 + $0x318] sm:$0xff]  }
 0x347   : > { %v2470_v25 = vmax.f32 %v2436_v59, 0.0  ;;  %v7073_v59 = vld [vmem:[#allocation2 + $0x1d0] sm:$0xff]  }
 0x349   : > { %v2486_v23 = vpack.c.bf16 %v2470_v25, %v2469_v34  ;;  %v7074_v34 = vld [vmem:[#allocation2 + $0x350] sm:$0xff]  }
 0x34a   : > { %v7075_v25 = vld [vmem:[#allocation2 + $0x190] sm:$0xff]  }
 0x34b   : > { %2510 = vxpose.xlu0.c.b16.end [8/8] (narrow) %v2486_v23, 16  ;;  %v7076_v23 = vld [vmem:[#allocation2 + $0x310] sm:$0xff]  }
 0x351   : > { %v8425_v49 = vpop.trf.xlu1 }
 0x352   : > { %v8430_v4 = vshrl.u32 %v8425_v49, 16  ;;  %v2899_v60 = vrot.slane %v8425_v49, 1  ;;  %v3247_v17 = vrot.slane %v8425_v49, 2 }
 0x391   : > { %v8427_v57 = vpop.trf.xlu0 }
 0x392   : > { %v8434_v28 = vshrl.u32 %v8427_v57, 16  ;;  %v2900_v50 = vrot.slane %v8427_v57, 1  ;;  %v3248_v58 = vrot.slane %v8427_v57, 2  ;;  %v3596_v15 = vrot.slane %v8427_v57, 3 }
 0x394   : > { %2720 = vmatprep.mubr.bf16.mxu0 %v8434_v28  ;;  %3031 = vmatprep.mubr.bf16.mxu1 %v2900_v50  ;;  %v3074_v0 = vrot.slane %v8434_v28, 1  ;;  %v7078_v50 = vld [vmem:[#allocation2 + $0x348] sm:$0xff]  }
 0x395   : > { %2721 = vmatmul.mubr.bf16.vlgmr.msra.gmra.mxu0 %v8430_v4  ;;  %3032 = vmatmul.mubr.bf16.vlgmr.msra.gmra.mxu1 %v2899_v60  ;;  %v7077_v60 = vld [vmem:[#allocation2 + $0x1c8] sm:$0xff]  }
 0x396   : > { %6383 = vmatpush3.bf16.msra.mxu0 %v7023_v7  ;;  %6449 = vmatpush3.bf16.msra.mxu1 %v7024_v47  ;;  %v7079_v7 = vld [vmem:[#allocation2 + $0x188] sm:$0xff]  }
 0x397   : > { %2856 = vmatprep.mubr.bf16.mxu0 %v8427_v57  ;;  %3379 = vmatprep.mubr.bf16.mxu1 %v3248_v58  ;;  %v7080_v47 = vld [vmem:[#allocation2 + $0x308] sm:$0xff]   ;;  %v7083_v58 = vld [vmem:[#allocation2 + $0x180] sm:$0xff]  }
 0x398   : > { %6384 = vmatprep.subr.bf16.mxu0 %v7025_v51  ;;  %6450 = vmatprep.subr.bf16.mxu1 %v7026_v19  ;;  %v7081_v51 = vld [vmem:[#allocation2 + $0x1c0] sm:$0xff]  }
 0x399   : > { %v7082_v19 = vld [vmem:[#allocation2 + $0x340] sm:$0xff]  }
 0x39a   : > { %6385 = vmatpush3.bf16.msra.mxu0 %v7027_v11  ;;  %6451 = vmatpush3.bf16.msra.mxu1 %v7028_v9  ;;  %v7084_v11 = vld [vmem:[#allocation2 + $0x300] sm:$0xff]   ;;  %v7085_v9 = vld [vmem:[#allocation2 + $0x2f8] sm:$0xff]  }
 0x39b   : > { %6386 = vmatprep.subr.bf16.mxu0 %v7029_v26  ;;  %6452 = vmatprep.subr.bf16.mxu1 %v7030_v24  ;;  %v7086_v26 = vld [vmem:[#allocation2 + $0x478] sm:$0xff]  }
 0x39c   : > { %v7087_v24 = vld [vmem:[#allocation2 + $0x2b8] sm:$0xff]  }
 0x39e   : > { %6387 = vmatpush3.bf16.msra.mxu0 %v7031_v1  ;;  %6453 = vmatpush3.bf16.msra.mxu1 %v7032_v27  ;;  %v3073_v1 = vrot.slane %v8430_v4, 1  ;;  %v7088_v27 = vld [vmem:[#allocation2 + $0x438] sm:$0xff]  }
 0x39f   : > { %6388 = vmatprep.subr.bf16.mxu0 %v7033_v3  ;;  %6454 = vmatprep.subr.bf16.mxu1 %v7034_v14  ;;  %v3595_v3 = vrot.slane %v8425_v49, 3  ;;  %v7089_v14 = vld [vmem:[#allocation2 + $0x2f0] sm:$0xff]  }
 0x3a2   : > { %6389 = vmatpush3.bf16.msra.mxu0 %v7035_v62  ;;  %6455 = vmatpush3.bf16.msra.mxu1 %v7036_v42  ;;  %v3422_v62 = vrot.slane %v8434_v28, 2  ;;  %v7090_v42 = vld [vmem:[#allocation2 + $0x470] sm:$0xff]  }
 0x3a3   : > { %6390 = vmatprep.subr.bf16.mxu0 %v7037_v29  ;;  %6456 = vmatprep.subr.bf16.mxu1 %v7038_v45  ;;  %v3944_v29 = vrot.slane %v8427_v57, 4  ;;  %v7091_v45 = vld [vmem:[#allocation2 + $0x2b0] sm:$0xff]  }
 0x3a6   : > { %6391 = vmatpush3.bf16.msra.mxu0 %v7039_v13  ;;  %6457 = vmatpush3.bf16.msra.mxu1 %v7040_v38  ;;  %v7092_v13 = vld [vmem:[#allocation2 + $0x430] sm:$0xff]   ;;  %v7093_v38 = vld [vmem:[#allocation2 + $0x2e8] sm:$0xff]  }
 0x3a7   : > { %6392 = vmatprep.subr.bf16.mxu0 %v7041_v56  ;;  %6458 = vmatprep.subr.bf16.mxu1 %v7042_v54  ;;  %v7094_v56 = vld [vmem:[#allocation2 + $0x468] sm:$0xff]  }
 0x3a8   : > { %v7095_v54 = vld [vmem:[#allocation2 + $0x2a8] sm:$0xff]  }
 0x3aa   : > { %6393 = vmatpush3.bf16.msra.mxu0 %v7043_v44  ;;  %6459 = vmatpush3.bf16.msra.mxu1 %v7044_v20  ;;  %v7096_v44 = vld [vmem:[#allocation2 + $0x428] sm:$0xff]   ;;  %v7097_v20 = vld [vmem:[#allocation2 + $0x2e0] sm:$0xff]  }
 0x3ab   : > { %6394 = vmatprep.subr.bf16.mxu0 %v7045_v2  ;;  %6460 = vmatprep.subr.bf16.mxu1 %v7046_v48  ;;  %v7098_v2 = vld [vmem:[#allocation2 + $0x460] sm:$0xff]  }
 0x3ac   : > { %v7099_v48 = vld [vmem:[#allocation2 + $0x2a0] sm:$0xff]  }
 0x3ae   : > { %6395 = vmatpush3.bf16.msra.mxu0 %v7047_v55  ;;  %6461 = vmatpush3.bf16.msra.mxu1 %v7048_v36  ;;  %v7100_v55 = vld [vmem:[#allocation2 + $0x420] sm:$0xff]   ;;  %v7101_v36 = vld [vmem:[#allocation2 + $0x2d8] sm:$0xff]  }
 0x3af   : > { %6396 = vmatprep.subr.bf16.mxu0 %v7049_v18  ;;  %6462 = vmatprep.subr.bf16.mxu1 %v7050_v39  ;;  %v7102_v18 = vld [vmem:[#allocation2 + $0x458] sm:$0xff]  }
 0x3b0   : > { %v7103_v39 = vld [vmem:[#allocation2 + $0x298] sm:$0xff]  }
 0x3b2   : > { %6397 = vmatpush3.bf16.msra.mxu0 %v7051_v21  ;;  %6463 = vmatpush3.bf16.msra.mxu1 %v7052_v5  ;;  %v7104_v21 = vld [vmem:[#allocation2 + $0x418] sm:$0xff]   ;;  %v7105_v5 = vld [vmem:[#allocation2 + $0x2d0] sm:$0xff]  }
 0x3b3   : > { %6426 = vmatprep.subr.bf16.mxu0 %v7053_v46  ;;  %6492 = vmatprep.subr.bf16.mxu1 %v7054_v43  ;;  %v7106_v46 = vld [vmem:[#allocation2 + $0x450] sm:$0xff]  }
 0x3b4   : > { %v7107_v43 = vld [vmem:[#allocation2 + $0x290] sm:$0xff]  }
 0x3b5   : > { %2857 = vmatmul.mubr.bf16.vlgmr.msra.gmra.mxu0 %v8425_v49  ;;  %3380 = vmatmul.mubr.bf16.vlgmr.msra.gmra.mxu1 %v3247_v17  ;;  %v7109_v17 = vld [vmem:[#allocation2 + $0x2c8] sm:$0xff]  }
 0x3b6   : > { %6427 = vmatpush3.bf16.msra.mxu0 %v7055_v61  ;;  %3205 = vmatprep.mubr.bf16.mxu0 %v3074_v0  ;;  %v7108_v61 = vld [vmem:[#allocation2 + $0x410] sm:$0xff]   ;;  %v7111_v0 = vld [vmem:[#allocation2 + $0x288] sm:$0xff]  }
 0x3b7   : > { %6493 = vmatpush3.bf16.msra.mxu1 %v7056_v12  ;;  %3727 = vmatprep.mubr.bf16.mxu1 %v3596_v15  ;;  %v7110_v12 = vld [vmem:[#allocation2 + $0x448] sm:$0xff]   ;;  %v7114_v15 = vld [vmem:[#allocation2 + $0x440] sm:$0xff]  }
 0x3b8   : > { %6428 = vmatprep.subr.bf16.mxu0 %v7057_v37  ;;  %6494 = vmatprep.subr.bf16.mxu1 %v7058_v8  ;;  %v7112_v37 = vld [vmem:[#allocation2 + $0x408] sm:$0xff]   ;;  %v7113_v8 = vld [vmem:[#allocation2 + $0x2c0] sm:$0xff]  }
 0x3ba   : > { %6429 = vmatpush3.bf16.msra.mxu0 %v7059_v10  ;;  %v7115_v10 = vld [vmem:[#allocation2 + $0x280] sm:$0xff]  }
 0x3bb   : > { %6495 = vmatpush3.bf16.msra.mxu1 %v7060_v41  ;;  %6430 = vmatprep.subr.bf16.mxu0 %v7061_v31  ;;  %v7116_v41 = vld [vmem:[#allocation2 + $0x400] sm:$0xff]   ;;  %v7117_v31 = vld [vmem:[#allocation2 + $0x3f8] sm:$0xff]  }
 0x3bc   : > { %6496 = vmatprep.subr.bf16.mxu1 %v7062_v40  ;;  %v7118_v40 = vld [vmem:[#allocation2 + $0x578] sm:$0xff]  }
 0x3be   : > { %6431 = vmatpush3.bf16.msra.mxu0 %v7063_v30  ;;  %v7119_v30 = vld [vmem:[#allocation2 + $0x3b8] sm:$0xff]  }
 0x3bf   : > { %6497 = vmatpush3.bf16.msra.mxu1 %v7064_v32  ;;  %6432 = vmatprep.subr.bf16.mxu0 %v7065_v16  ;;  %v3421_v32 = vrot.slane %v8430_v4, 2  ;;  %v7120_v16 = vld [vmem:[#allocation2 + $0x538] sm:$0xff]  }
 0x3c0   : > { %6498 = vmatprep.subr.bf16.mxu1 %v7066_v52  ;;  %v3943_v52 = vrot.slane %v8425_v49, 4 }
 0x3c2   : > { %6433 = vmatpush3.bf16.msra.mxu0 %v7067_v22  ;;  %v7121_v22 = vld [vmem:[#allocation2 + $0x3f0] sm:$0xff]  }
 0x3c3   : > { %6499 = vmatpush3.bf16.msra.mxu1 %v7068_v63  ;;  %6434 = vmatprep.subr.bf16.mxu0 %v7069_v33  ;;  %v3770_v63 = vrot.slane %v8434_v28, 3  ;;  %v7122_v33 = vld [vmem:[#allocation2 + $0x570] sm:$0xff]  }
 0x3c4   : > { %6500 = vmatprep.subr.bf16.mxu1 %v7070_v6  ;;  %v4292_v6 = vrot.slane %v8427_v57, 5 }
 0x3c6   : > { %6435 = vmatpush3.bf16.msra.mxu0 %v7071_v53  ;;  %v7123_v53 = vld [vmem:[#allocation2 + $0x3b0] sm:$0xff]  }
 0x3c7   : > { %6501 = vmatpush3.bf16.msra.mxu1 %v7072_v35  ;;  %6436 = vmatprep.subr.bf16.mxu0 %v7073_v59  ;;  %v7124_v35 = vld [vmem:[#allocation2 + $0x530] sm:$0xff]   ;;  %v7125_v59 = vld [vmem:[#allocation2 + $0x3e8] sm:$0xff]  }
 0x3c8   : > { %6502 = vmatprep.subr.bf16.mxu1 %v7074_v34  ;;  %v7126_v34 = vld [vmem:[#allocation2 + $0x568] sm:$0xff]  }
 0x3ca   : > { %6437 = vmatpush3.bf16.msra.mxu0 %v7075_v25  ;;  %v7127_v25 = vld [vmem:[#allocation2 + $0x3a8] sm:$0xff]  }
 0x3cb   : > { %6503 = vmatpush3.bf16.msra.mxu1 %v7076_v23  ;;  %6438 = vmatprep.subr.bf16.mxu0 %v7077_v60  ;;  %v7128_v23 = vld [vmem:[#allocation2 + $0x528] sm:$0xff]   ;;  %v7129_v60 = vld [vmem:[#allocation2 + $0x3e0] sm:$0xff]  }
 0x3cc   : > { %6504 = vmatprep.subr.bf16.mxu1 %v7078_v50  ;;  %v7130_v50 = vld [vmem:[#allocation2 + $0x560] sm:$0xff]  }
 0x3ce   : > { %6439 = vmatpush3.bf16.msra.mxu0 %v7079_v7  ;;  %v7131_v7 = vld [vmem:[#allocation2 + $0x3a0] sm:$0xff]  }
 0x3cf   : > { %6505 = vmatpush3.bf16.msra.mxu1 %v7080_v47  ;;  %6440 = vmatprep.subr.bf16.mxu0 %v7081_v51  ;;  %v7132_v47 = vld [vmem:[#allocation2 + $0x520] sm:$0xff]   ;;  %v7133_v51 = vld [vmem:[#allocation2 + $0x3d8] sm:$0xff]  }
 0x3d0   : > { %6506 = vmatprep.subr.bf16.mxu1 %v7082_v19  ;;  %v7134_v19 = vld [vmem:[#allocation2 + $0x558] sm:$0xff]  }
 0x3d2   : > { %6441 = vmatpush3.bf16.msra.mxu0 %v7083_v58  ;;  %v7135_v58 = vld [vmem:[#allocation2 + $0x398] sm:$0xff]  }
 0x3d3   : > { %6507 = vmatpush3.bf16.msra.mxu1 %v7084_v11  ;;  %6470 = vmatprep.subr.bf16.mxu0 %v7085_v9  ;;  %v7136_v11 = vld [vmem:[#allocation2 + $0x518] sm:$0xff]   ;;  %v7137_v9 = vld [vmem:[#allocation2 + $0x3d0] sm:$0xff]  }
 0x3d4   : > { %6536 = vmatprep.subr.bf16.mxu1 %v7086_v26  ;;  %v7138_v26 = vld [vmem:[#allocation2 + $0x550] sm:$0xff]  }
 0x3d5   : > { %3206 = vmatmul.mubr.bf16.vlgmr.msra.gmra.mxu0 %v3073_v1  ;;  %v7140_v1 = vld [vmem:[#allocation2 + $0x510] sm:$0xff]  }
 0x3d6   : > { %3728 = vmatmul.mubr.bf16.vlgmr.msra.gmra.mxu1 %v3595_v3  ;;  %6471 = vmatpush3.bf16.msra.mxu0 %v7087_v24  ;;  %v7139_v24 = vld [vmem:[#allocation2 + $0x390] sm:$0xff]   ;;  %v7142_v3 = vld [vmem:[#allocation2 + $0x548] sm:$0xff]  }
 0x3d7   : > { %3553 = vmatprep.mubr.bf16.mxu0 %v3422_v62  ;;  %6537 = vmatpush3.bf16.msra.mxu1 %v7088_v27  ;;  %v7141_v27 = vld [vmem:[#allocation2 + $0x3c8] sm:$0xff]  }
 0x3d8   : > { %4075 = vmatprep.mubr.bf16.mxu1 %v3944_v29  ;;  %6472 = vmatprep.subr.bf16.mxu0 %v7089_v14  ;;  %v7143_v14 = vld [vmem:[#allocation2 + $0x388] sm:$0xff]   ;;  %v7146_v29 = vld [vmem:[#allocation2 + $0x540] sm:$0xff]  }
 0x3d9   : > { %6538 = vmatprep.subr.bf16.mxu1 %v7090_v42  ;;  %v7144_v62 = vld [vmem:[#allocation2 + $0x508] sm:$0xff]   ;;  %v7145_v42 = vld [vmem:[#allocation2 + $0x3c0] sm:$0xff]  }
 0x3da   : > { %6473 = vmatpush3.bf16.msra.mxu0 %v7091_v45  ;;  %v7147_v45 = vld [vmem:[#allocation2 + $0x380] sm:$0xff]  }
 0x3db   : > { %6539 = vmatpush3.bf16.msra.mxu1 %v7092_v13  ;;  %6474 = vmatprep.subr.bf16.mxu0 %v7093_v38  ;;  %v7148_v13 = vld [vmem:[#allocation2 + $0x500] sm:$0xff]   ;;  %v7149_v38 = vld [vmem:[#allocation2 + $0x4f8] sm:$0xff]  }
 0x3dc   : > { %6540 = vmatprep.subr.bf16.mxu1 %v7094_v56  ;;  %v7150_v56 = vld [vmem:[#allocation2 + $0x678] sm:$0xff]  }
 0x3de   : > { %6475 = vmatpush3.bf16.msra.mxu0 %v7095_v54  ;;  %v7151_v54 = vld [vmem:[#allocation2 + $0x4b8] sm:$0xff]  }
 0x3df   : > { %6541 = vmatpush3.bf16.msra.mxu1 %v7096_v44  ;;  %6476 = vmatprep.subr.bf16.mxu0 %v7097_v20  ;;  %v3769_v44 = vrot.slane %v8430_v4, 3  ;;  %v7152_v20 = vld [vmem:[#allocation2 + $0x638] sm:$0xff]  }
 0x3e0   : > { %6542 = vmatprep.subr.bf16.mxu1 %v7098_v2  ;;  %v4291_v2 = vrot.slane %v8425_v49, 5 }
 0x3e2   : > { %6477 = vmatpush3.bf16.msra.mxu0 %v7099_v48  ;;  %v7153_v48 = vld [vmem:[#allocation2 + $0x4f0] sm:$0xff]  }
 0x3e3   : > { %6543 = vmatpush3.bf16.msra.mxu1 %v7100_v55  ;;  %6478 = vmatprep.subr.bf16.mxu0 %v7101_v36  ;;  %v4118_v55 = vrot.slane %v8434_v28, 4  ;;  %v7154_v36 = vld [vmem:[#allocation2 + $0x670] sm:$0xff]  }
 0x3e4   : > { %6544 = vmatprep.subr.bf16.mxu1 %v7102_v18  ;;  %v4640_v18 = vrot.slane %v8427_v57, 6 }
 0x3e6   : > { %6479 = vmatpush3.bf16.msra.mxu0 %v7103_v39  ;;  %v7155_v39 = vld [vmem:[#allocation2 + $0x4b0] sm:$0xff]  }
 0x3e7   : > { %6545 = vmatpush3.bf16.msra.mxu1 %v7104_v21  ;;  %6480 = vmatprep.subr.bf16.mxu0 %v7105_v5  ;;  %v7156_v21 = vld [vmem:[#allocation2 + $0x630] sm:$0xff]   ;;  %v7157_v5 = vld [vmem:[#allocation2 + $0x4e8] sm:$0xff]  }
 0x3e8   : > { %6546 = vmatprep.subr.bf16.mxu1 %v7106_v46  ;;  %v7158_v46 = vld [vmem:[#allocation2 + $0x668] sm:$0xff]  }
 0x3ea   : > { %6481 = vmatpush3.bf16.msra.mxu0 %v7107_v43  ;;  %v7159_v43 = vld [vmem:[#allocation2 + $0x4a8] sm:$0xff]  }
 0x3eb   : > { %6547 = vmatpush3.bf16.msra.mxu1 %v7108_v61  ;;  %6482 = vmatprep.subr.bf16.mxu0 %v7109_v17  ;;  %v7160_v61 = vld [vmem:[#allocation2 + $0x628] sm:$0xff]   ;;  %v7161_v17 = vld [vmem:[#allocation2 + $0x4e0] sm:$0xff]  }
 0x3ec   : > { %6548 = vmatprep.subr.bf16.mxu1 %v7110_v12  ;;  %v7162_v12 = vld [vmem:[#allocation2 + $0x660] sm:$0xff]  }
 0x3ee   : > { %6483 = vmatpush3.bf16.msra.mxu0 %v7111_v0  ;;  %v7163_v0 = vld [vmem:[#allocation2 + $0x4a0] sm:$0xff]  }
 0x3ef   : > { %6549 = vmatpush3.bf16.msra.mxu1 %v7112_v37  ;;  %6484 = vmatprep.subr.bf16.mxu0 %v7113_v8  ;;  %v7164_v37 = vld [vmem:[#allocation2 + $0x620] sm:$0xff]   ;;  %v7165_v8 = vld [vmem:[#allocation2 + $0x4d8] sm:$0xff]  }
 0x3f0   : > { %6550 = vmatprep.subr.bf16.mxu1 %v7114_v15  ;;  %v7166_v15 = vld [vmem:[#allocation2 + $0x658] sm:$0xff]  }
 0x3f2   : > { %6485 = vmatpush3.bf16.msra.mxu0 %v7115_v10  ;;  %v7167_v10 = vld [vmem:[#allocation2 + $0x498] sm:$0xff]  }
 0x3f3   : > { %6551 = vmatpush3.bf16.msra.mxu1 %v7116_v41  ;;  %6514 = vmatprep.subr.bf16.mxu0 %v7117_v31  ;;  %v7168_v41 = vld [vmem:[#allocation2 + $0x618] sm:$0xff]   ;;  %v7169_v31 = vld [vmem:[#allocation2 + $0x4d0] sm:$0xff]  }
 0x3f4   : > { %6580 = vmatprep.subr.bf16.mxu1 %v7118_v40  ;;  %v7170_v40 = vld [vmem:[#allocation2 + $0x650] sm:$0xff]  }
 0x3f5   : > { %3554 = vmatmul.mubr.bf16.vlgmr.msra.gmra.mxu0 %v3421_v32  ;;  %v7172_v32 = vld [vmem:[#allocation2 + $0x610] sm:$0xff]  }
 0x3f6   : > { %4076 = vmatmul.mubr.bf16.vlgmr.msra.gmra.mxu1 %v3943_v52  ;;  %6515 = vmatpush3.bf16.msra.mxu0 %v7119_v30  ;;  %v7171_v30 = vld [vmem:[#allocation2 + $0x490] sm:$0xff]   ;;  %v7174_v52 = vld [vmem:[#allocation2 + $0x648] sm:$0xff]  }
 0x3f7   : > { %3901 = vmatprep.mubr.bf16.mxu0 %v3770_v63  ;;  %6581 = vmatpush3.bf16.msra.mxu1 %v7120_v16  ;;  %v7173_v16 = vld [vmem:[#allocation2 + $0x4c8] sm:$0xff]  }
 0x3f8   : > { %4423 = vmatprep.mubr.bf16.mxu1 %v4292_v6  ;;  %6516 = vmatprep.subr.bf16.mxu0 %v7121_v22  ;;  %v7175_v22 = vld [vmem:[#allocation2 + $0x488] sm:$0xff]   ;;  %v7178_v6 = vld [vmem:[#allocation2 + $0x640] sm:$0xff]  }
 0x3f9   : > { %6582 = vmatprep.subr.bf16.mxu1 %v7122_v33  ;;  %v7176_v63 = vld [vmem:[#allocation2 + $0x608] sm:$0xff]   ;;  %v7177_v33 = vld [vmem:[#allocation2 + $0x4c0] sm:$0xff]  }
 0x3fa   : > { %6517 = vmatpush3.bf16.msra.mxu0 %v7123_v53  ;;  %v7179_v53 = vld [vmem:[#allocation2 + $0x480] sm:$0xff]  }
 0x3fb   : > { %6583 = vmatpush3.bf16.msra.mxu1 %v7124_v35  ;;  %6518 = vmatprep.subr.bf16.mxu0 %v7125_v59  ;;  %v7180_v35 = vld [vmem:[#allocation2 + $0x600] sm:$0xff]   ;;  %v7181_v59 = vld [vmem:[#allocation2 + $0x5f8] sm:$0xff]  }
 0x3fc   : > { %6584 = vmatprep.subr.bf16.mxu1 %v7126_v34  ;;  %v7182_v34 = vld [vmem:[#allocation2 + $0x778] sm:$0xff]  }
 0x3fe   : > { %6519 = vmatpush3.bf16.msra.mxu0 %v7127_v25  ;;  %v7183_v25 = vld [vmem:[#allocation2 + $0x5b8] sm:$0xff]  }
 0x3ff   : > { %6585 = vmatpush3.bf16.msra.mxu1 %v7128_v23  ;;  %6520 = vmatprep.subr.bf16.mxu0 %v7129_v60  ;;  %v4117_v23 = vrot.slane %v8430_v4, 4  ;;  %v7184_v60 = vld [vmem:[#allocation2 + $0x738] sm:$0xff]  }
 0x400   : > { %6586 = vmatprep.subr.bf16.mxu1 %v7130_v50  ;;  %v4639_v50 = vrot.slane %v8425_v49, 6 }
 0x402   : > { %6521 = vmatpush3.bf16.msra.mxu0 %v7131_v7  ;;  %v7185_v7 = vld [vmem:[#allocation2 + $0x5f0] sm:$0xff]  }
 0x403   : > { %6587 = vmatpush3.bf16.msra.mxu1 %v7132_v47  ;;  %6522 = vmatprep.subr.bf16.mxu0 %v7133_v51  ;;  %v4466_v47 = vrot.slane %v8434_v28, 5  ;;  %v7186_v51 = vld [vmem:[#allocation2 + $0x770] sm:$0xff]  }
 0x404   : > { %6588 = vmatprep.subr.bf16.mxu1 %v7134_v19  ;;  %v4988_v19 = vrot.slane %v8427_v57, 7  ;;  %v7196_v57 = vld [vmem:[#allocation2 + $0x720] sm:$0xff]  }
 0x406   : > { %6523 = vmatpush3.bf16.msra.mxu0 %v7135_v58  ;;  %v7187_v58 = vld [vmem:[#allocation2 + $0x5b0] sm:$0xff]  }
 0x407   : > { %6589 = vmatpush3.bf16.msra.mxu1 %v7136_v11  ;;  %6524 = vmatprep.subr.bf16.mxu0 %v7137_v9  ;;  %v7188_v11 = vld [vmem:[#allocation2 + $0x730] sm:$0xff]   ;;  %v7189_v9 = vld [vmem:[#allocation2 + $0x5e8] sm:$0xff]  }
 0x408   : > { %6590 = vmatprep.subr.bf16.mxu1 %v7138_v26  ;;  %v7190_v26 = vld [vmem:[#allocation2 + $0x768] sm:$0xff]  }
 0x40a   : > { %6525 = vmatpush3.bf16.msra.mxu0 %v7139_v24  ;;  %v7191_v24 = vld [vmem:[#allocation2 + $0x5a8] sm:$0xff]  }
 0x40b   : > { %6591 = vmatpush3.bf16.msra.mxu1 %v7140_v1  ;;  %6526 = vmatprep.subr.bf16.mxu0 %v7141_v27  ;;  %v7192_v1 = vld [vmem:[#allocation2 + $0x728] sm:$0xff]   ;;  %v7193_v27 = vld [vmem:[#allocation2 + $0x5e0] sm:$0xff]  }
 0x40c   : > { %6592 = vmatprep.subr.bf16.mxu1 %v7142_v3  ;;  %v7194_v3 = vld [vmem:[#allocation2 + $0x760] sm:$0xff]  }
 0x40e   : > { %6527 = vmatpush3.bf16.msra.mxu0 %v7143_v14  ;;  %v7195_v14 = vld [vmem:[#allocation2 + $0x5a0] sm:$0xff]  }
 0x40f   : > { %6593 = vmatpush3.bf16.msra.mxu1 %v7144_v62  ;;  %6528 = vmatprep.subr.bf16.mxu0 %v7145_v42  ;;  %v7197_v62 = vld [vmem:[#allocation2 + $0x5d8] sm:$0xff]  }
 0x410   : > { %6594 = vmatprep.subr.bf16.mxu1 %v7146_v29  ;;  %v7198_v42 = vld [vmem:[#allocation2 + $0x758] sm:$0xff]  }
 0x411   : > { %v7199_v29 = vld [vmem:[#allocation2 + $0x598] sm:$0xff]  }
 0x412   : > { %6529 = vmatpush3.bf16.msra.mxu0 %v7147_v45  ;;  %v7200_v45 = vld [vmem:[#allocation2 + $0x718] sm:$0xff]  }
 0x413   : > { %6595 = vmatpush3.bf16.msra.mxu1 %v7148_v13  ;;  %6558 = vmatprep.subr.bf16.mxu0 %v7149_v38  ;;  %v7201_v13 = vld [vmem:[#allocation2 + $0x5d0] sm:$0xff]  }
 0x414   : > { %6624 = vmatprep.subr.bf16.mxu1 %v7150_v56  ;;  %v7202_v38 = vld [vmem:[#allocation2 + $0x750] sm:$0xff]  }
 0x415   : > { %3902 = vmatmul.mubr.bf16.vlgmr.msra.gmra.mxu0 %v3769_v44  ;;  %v7203_v56 = vld [vmem:[#allocation2 + $0x590] sm:$0xff]   ;;  %v7205_v44 = vld [vmem:[#allocation2 + $0x5c8] sm:$0xff]  }
 0x416   : > { %4424 = vmatmul.mubr.bf16.vlgmr.msra.gmra.mxu1 %v4291_v2  ;;  %6559 = vmatpush3.bf16.msra.mxu0 %v7151_v54  ;;  %v7204_v54 = vld [vmem:[#allocation2 + $0x710] sm:$0xff]   ;;  %v7207_v2 = vld [vmem:[#allocation2 + $0x588] sm:$0xff]  }
 0x417   : > { %4249 = vmatprep.mubr.bf16.mxu0 %v4118_v55  ;;  %6625 = vmatpush3.bf16.msra.mxu1 %v7152_v20  ;;  %v7206_v20 = vld [vmem:[#allocation2 + $0x748] sm:$0xff]   ;;  %v7209_v55 = vld [vmem:[#allocation2 + $0x5c0] sm:$0xff]  }
 0x418   : > { %4771 = vmatprep.mubr.bf16.mxu1 %v4640_v18  ;;  %6560 = vmatprep.subr.bf16.mxu0 %v7153_v48  ;;  %v7208_v48 = vld [vmem:[#allocation2 + $0x708] sm:$0xff]   ;;  %v7211_v18 = vld [vmem:[#allocation2 + $0x580] sm:$0xff]  }
 0x419   : > { %6626 = vmatprep.subr.bf16.mxu1 %v7154_v36  ;;  %v7210_v36 = vld [vmem:[#allocation2 + $0x740] sm:$0xff]  }
 0x41a   : > { %6561 = vmatpush3.bf16.msra.mxu0 %v7155_v39  ;;  %v7212_v39 = vld [vmem:[#allocation2 + $0x700] sm:$0xff]  }
 0x41b   : > { %6627 = vmatpush3.bf16.msra.mxu1 %v7156_v21  ;;  %6562 = vmatprep.subr.bf16.mxu0 %v7157_v5  ;;  %v7213_v21 = vld [vmem:[#allocation2 + $0x6f8] sm:$0xff]  }
 0x41c   : > { %6628 = vmatprep.subr.bf16.mxu1 %v7158_v46  ;;  %v7214_v5 = vld [vmem:[#allocation2 + $0x6b8] sm:$0xff]   ;;  %v4465_v46 = vrot.slane %v8430_v4, 5 }
 0x41e   : > { %6563 = vmatpush3.bf16.msra.mxu0 %v7159_v43  ;;  %v7215_v43 = vld [vmem:[#allocation2 + $0x6f0] sm:$0xff]  }
 0x41f   : > { %6629 = vmatpush3.bf16.msra.mxu1 %v7160_v61  ;;  %6564 = vmatprep.subr.bf16.mxu0 %v7161_v17  ;;  %v4987_v61 = vrot.slane %v8425_v49, 7  ;;  %v8598_v17 = vmov 0.0  }
 0x420   : > { %6630 = vmatprep.subr.bf16.mxu1 %v7162_v12 }
 0x422   : > { %6565 = vmatpush3.bf16.msra.mxu0 %v7163_v0 }
 0x423   : > { %6631 = vmatpush3.bf16.msra.mxu1 %v7164_v37  ;;  %6566 = vmatprep.subr.bf16.mxu0 %v7165_v8  ;;  %v4814_v37 = vrot.slane %v8434_v28, 6  ;;  %v7216_v8 = vld [vmem:[#allocation2 + $0x6b0] sm:$0xff]  }
 0x424   : > { %6632 = vmatprep.subr.bf16.mxu1 %v7166_v15 }
 0x426   : > { %6567 = vmatpush3.bf16.msra.mxu0 %v7167_v10 }
 0x427   : > { %6633 = vmatpush3.bf16.msra.mxu1 %v7168_v41  ;;  %6568 = vmatprep.subr.bf16.mxu0 %v7169_v31  ;;  %v7217_v41 = vld [vmem:[#allocation2 + $0x6e8] sm:$0xff]  }
 0x428   : > { %6634 = vmatprep.subr.bf16.mxu1 %v7170_v40 }
 0x42a   : > { %6569 = vmatpush3.bf16.msra.mxu0 %v7171_v30 }
 0x42b   : > { %6635 = vmatpush3.bf16.msra.mxu1 %v7172_v32  ;;  %6570 = vmatprep.subr.bf16.mxu0 %v7173_v16  ;;  %v7218_v32 = vld [vmem:[#allocation2 + $0x6a8] sm:$0xff]  }
 0x42c   : > { %6636 = vmatprep.subr.bf16.mxu1 %v7174_v52 }
 0x42e   : > { %6571 = vmatpush3.bf16.msra.mxu0 %v7175_v22  ;;  %v7219_v22 = vld [vmem:[#allocation2 + $0x6e0] sm:$0xff]  }
 0x42f   : > { %6637 = vmatpush3.bf16.msra.mxu1 %v7176_v63  ;;  %6572 = vmatprep.subr.bf16.mxu0 %v7177_v33  ;;  %v7220_v63 = vld [vmem:[#allocation2 + $0x6a0] sm:$0xff]   ;;  %v7221_v33 = vld [vmem:[#allocation2 + $0x6d8] sm:$0xff]  }
 0x430   : > { %6638 = vmatprep.subr.bf16.mxu1 %v7178_v6  ;;  %v7222_v6 = vld [vmem:[#allocation2 + $0x698] sm:$0xff]  }
 0x432   : > { %6573 = vmatpush3.bf16.msra.mxu0 %v7179_v53  ;;  %v7223_v53 = vld [vmem:[#allocation2 + $0x6d0] sm:$0xff]  }
 0x433   : > { %6639 = vmatpush3.bf16.msra.mxu1 %v7180_v35  ;;  %6602 = vmatprep.subr.bf16.mxu0 %v7181_v59  ;;  %v7224_v35 = vld [vmem:[#allocation2 + $0x690] sm:$0xff]   ;;  %v7225_v59 = vld [vmem:[#allocation2 + $0x6c8] sm:$0xff]  }
 0x434   : > { %6668 = vmatprep.subr.bf16.mxu1 %v7182_v34  ;;  %v7226_v34 = vld [vmem:[#allocation2 + $0x688] sm:$0xff]  }
 0x435   : > { %4250 = vmatmul.mubr.bf16.vlgmr.msra.gmra.mxu0 %v4117_v23  ;;  %v7228_v23 = vld [vmem:[#allocation2 + $0x680] sm:$0xff]  }
 0x436   : > { %4772 = vmatmul.mubr.bf16.vlgmr.msra.gmra.mxu1 %v4639_v50  ;;  %6603 = vmatpush3.bf16.msra.mxu0 %v7183_v25  ;;  %v7227_v25 = vld [vmem:[#allocation2 + $0x6c0] sm:$0xff]   ;;  %v7230_v50 = vld [vmem:[#allocation2 + $0x7b8] sm:$0xff]  }
 0x437   : > { %4597 = vmatprep.mubr.bf16.mxu0 %v4466_v47  ;;  %6669 = vmatpush3.bf16.msra.mxu1 %v7184_v60  ;;  %v7229_v60 = vld [vmem:[#allocation2 + $0x7f8] sm:$0xff]   ;;  %v7231_v47 = vld [vmem:[#allocation2 + $0x7f0] sm:$0xff]  }
 0x438   : > { %5119 = vmatprep.mubr.bf16.mxu1 %v4988_v19  ;;  %6604 = vmatprep.subr.bf16.mxu0 %v7185_v7  ;;  %v4813_v7 = vrot.slane %v8430_v4, 6 }
 0x439   : > { %6670 = vmatprep.subr.bf16.mxu1 %v7186_v51  ;;  %v5162_v51 = vrot.slane %v8434_v28, 7  ;;  %v7235_v28 = vld [vmem:[#allocation2 + $0x7e0] sm:$0xff]  }
 0x43a   : > { %6605 = vmatpush3.bf16.msra.mxu0 %v7187_v58 }
 0x43b   : > { %6671 = vmatpush3.bf16.msra.mxu1 %v7188_v11  ;;  %6606 = vmatprep.subr.bf16.mxu0 %v7189_v9  ;;  %v7232_v11 = vld [vmem:[#allocation2 + $0x7b0] sm:$0xff]  }
 0x43c   : > { %6672 = vmatprep.subr.bf16.mxu1 %v7190_v26 }
 0x43e   : > { %6607 = vmatpush3.bf16.msra.mxu0 %v7191_v24  ;;  %v7233_v24 = vld [vmem:[#allocation2 + $0x7e8] sm:$0xff]  }
 0x43f   : > { %6673 = vmatpush3.bf16.msra.mxu1 %v7192_v1  ;;  %6608 = vmatprep.subr.bf16.mxu0 %v7193_v27 }
 0x440   : > { %6674 = vmatprep.subr.bf16.mxu1 %v7194_v3 }
 0x442   : > { %6609 = vmatpush3.bf16.msra.mxu0 %v7195_v14 }
 0x443   : > { %6675 = vmatpush3.bf16.msra.mxu1 %v7196_v57  ;;  %6610 = vmatprep.subr.bf16.mxu0 %v7197_v62  ;;  %v7234_v62 = vld [vmem:[#allocation2 + $0x7a8] sm:$0xff]  }
 0x444   : > { %6676 = vmatprep.subr.bf16.mxu1 %v7198_v42 }
 0x446   : > { %6611 = vmatpush3.bf16.msra.mxu0 %v7199_v29 }
 0x447   : > { %6677 = vmatpush3.bf16.msra.mxu1 %v7200_v45  ;;  %6612 = vmatprep.subr.bf16.mxu0 %v7201_v13  ;;  %v7236_v13 = vld [vmem:[#allocation2 + $0x7a0] sm:$0xff]  }
 0x448   : > { %6678 = vmatprep.subr.bf16.mxu1 %v7202_v38  ;;  %v7237_v38 = vld [vmem:[#allocation2 + $0x7d8] sm:$0xff]  }
 0x44a   : > { %6613 = vmatpush3.bf16.msra.mxu0 %v7203_v56  ;;  %v7238_v56 = vld [vmem:[#allocation2 + $0x798] sm:$0xff]  }
 0x44b   : > { %6679 = vmatpush3.bf16.msra.mxu1 %v7204_v54  ;;  %6614 = vmatprep.subr.bf16.mxu0 %v7205_v44  ;;  %v7239_v54 = vld [vmem:[#allocation2 + $0x7d0] sm:$0xff]  }
 0x44c   : > { %6680 = vmatprep.subr.bf16.mxu1 %v7206_v20  ;;  %v7240_v44 = vld [vmem:[#allocation2 + $0x790] sm:$0xff]   ;;  %v7241_v20 = vld [vmem:[#allocation2 + $0x7c8] sm:$0xff]  }
 0x44e   : > { %6615 = vmatpush3.bf16.msra.mxu0 %v7207_v2  ;;  %v7242_v2 = vld [vmem:[#allocation2 + $0x788] sm:$0xff]  }
 0x44f   : > { %6681 = vmatpush3.bf16.msra.mxu1 %v7208_v48  ;;  %6616 = vmatprep.subr.bf16.mxu0 %v7209_v55  ;;  %v7243_v48 = vld [vmem:[#allocation2 + $0x7c0] sm:$0xff]  }
 0x450   : > { %6682 = vmatprep.subr.bf16.mxu1 %v7210_v36  ;;  %v7244_v55 = vld [vmem:[#allocation2 + $0x780] sm:$0xff]   ;;  %v5161_v36 = vrot.slane %v8430_v4, 7 }
 0x452   : > { %6617 = vmatpush3.bf16.msra.mxu0 %v7211_v18 }
 0x453   : > { %6683 = vmatpush3.bf16.msra.mxu1 %v7212_v39  ;;  %6646 = vmatprep.subr.bf16.mxu0 %v7213_v21 }
 0x454   : > { %6851 = vmatprep.subr.bf16.mxu1 %v8598_v17 }
 0x455   : > { %4598 = vmatmul.mubr.bf16.vlgmr.msra.gmra.mxu0 %v4465_v46  ;;  %v6376_v12 = vpop.f32.mrf.mxu0  ;;  %v6420_v0 = vpop.f32.mrf.mxu1 }
 0x456   : > { %5120 = vmatmul.mubr.bf16.vlgmr.msra.gmra.mxu1 %v4987_v61  ;;  %6647 = vmatpush3.bf16.msra.mxu0 %v7214_v5 }
 0x457   : > { %4945 = vmatprep.mubr.bf16.mxu0 %v4814_v37  ;;  %v6377_v15 = vpop.f32.mrf.mxu0  ;;  %v6421_v10 = vpop.f32.mrf.mxu1  ;;  %6648 = vmatprep.subr.bf16.mxu0 %v7215_v43 }
 0x458   : > { %v6378_v31 = vadd.f32 %v6377_v15, %v6376_v12  ;;  %v6422_v40 = vadd.f32 %v6421_v10, %v6420_v0  ;;  %6867 = vmatprep.mubr.msk.bf16.mxu1 %vm7300_vm0, %v8598_v17 }
 0x459   : > { %v6379_v49 = vpop.f32.mrf.mxu0  ;;  %v6423_v30 = vpop.f32.mrf.mxu1 }
 0x45a   : > { %6649 = vmatpush3.bf16.msra.mxu0 %v7216_v8 }
 0x45b   : > { %v6380_v16 = vpop.f32.mrf.mxu0  ;;  %v6424_v52 = vpop.f32.mrf.mxu1  ;;  %6650 = vmatprep.subr.bf16.mxu0 %v7217_v41 }
 0x45e   : > { %6651 = vmatpush3.bf16.msra.mxu0 %v7218_v32 }
 0x45f   : > { %6652 = vmatprep.subr.bf16.mxu0 %v7219_v22  ;;  %v7245_v22 = vld [vmem:[%s8521_s7 + $0x38] sm:$0xff]  }
 0x460   : > { %6852 = vmatpush3.bf16.msra.mxu1 %v7245_v22 }
 0x461   : > { %6853 = vmatprep.subr.bf16.mxu1 %v8598_v17 }
 0x462   : > { %6653 = vmatpush3.bf16.msra.mxu0 %v7220_v63 }
 0x463   : > { %6654 = vmatprep.subr.bf16.mxu0 %v7221_v33 }
 0x466   : > { %6655 = vmatpush3.bf16.msra.mxu0 %v7222_v6  ;;  %v7246_v6 = vld [vmem:[%s8521_s7 + $0x30] sm:$0xff]  }
 0x467   : > { %6656 = vmatprep.subr.bf16.mxu0 %v7223_v53  ;;  %6854 = vmatpush3.bf16.msra.mxu1 %v7246_v6  ;;  %v7247_v53 = vld [vmem:[%s8521_s7 + $0x28] sm:$0xff]  }
 0x468   : > { %6855 = vmatprep.subr.bf16.mxu1 %v8598_v17 }
 0x46a   : > { %6657 = vmatpush3.bf16.msra.mxu0 %v7224_v35  ;;  %v7248_v35 = vld [vmem:[%s8521_s7 + $0x20] sm:$0xff]  }
 0x46b   : > { %6658 = vmatprep.subr.bf16.mxu0 %v7225_v59  ;;  %6856 = vmatpush3.bf16.msra.mxu1 %v7247_v53  ;;  %v7249_v59 = vld [vmem:[%s8521_s7 + $0x18] sm:$0xff]  }
 0x46c   : > { %6857 = vmatprep.subr.bf16.mxu1 %v8598_v17 }
 0x46e   : > { %6659 = vmatpush3.bf16.msra.mxu0 %v7226_v34 }
 0x46f   : > { %6660 = vmatprep.subr.bf16.mxu0 %v7227_v25  ;;  %6858 = vmatpush3.bf16.msra.mxu1 %v7248_v35 }
 0x470   : > { %6859 = vmatprep.subr.bf16.mxu1 %v8598_v17 }
 0x472   : > { %6661 = vmatpush3.bf16.msra.mxu0 %v7228_v23 }
 0x473   : > { %6690 = vmatprep.subr.bf16.mxu0 %v7229_v60  ;;  %6860 = vmatpush3.bf16.msra.mxu1 %v7249_v59  ;;  %v7250_v60 = vld [vmem:[%s8521_s7 + $0x10] sm:$0xff]  }
 0x474   : > { %6861 = vmatprep.subr.bf16.mxu1 %v8598_v17 }
 0x475   : > { %v6398_v19 = vpop.f32.mrf.mxu0  ;;  %v6464_v58 = vpop.f32.mrf.mxu1  ;;  %4946 = vmatmul.mubr.bf16.vlgmr.msra.gmra.mxu0 %v4813_v7 }
 0x476   : > { %6691 = vmatpush3.bf16.msra.mxu0 %v7230_v50  ;;  %5293 = vmatprep.mubr.bf16.mxu0 %v5162_v51 }
 0x477   : > { %v6399_v9 = vpop.f32.mrf.mxu0  ;;  %v6465_v26 = vpop.f32.mrf.mxu1  ;;  %6692 = vmatprep.subr.bf16.mxu0 %v7231_v47  ;;  %6862 = vmatpush3.bf16.msra.mxu1 %v7250_v60 }
 0x478   : > { %v6400_v1 = vadd.f32 %v6399_v9, %v6398_v19  ;;  %v6466_v27 = vadd.f32 %v6465_v26, %v6464_v58  ;;  %6863 = vmatprep.subr.bf16.mxu1 %v8598_v17  ;;  %v7251_v9 = vld [vmem:[%s8521_s7 + $0x8] sm:$0xff]  }
 0x479   : > { %v6401_v3 = vpop.f32.mrf.mxu0  ;;  %v6467_v14 = vpop.f32.mrf.mxu1 }
 0x47a   : > { %v2859_v57 = vadd.f32 %v6400_v1, %v6378_v31  ;;  %6693 = vmatpush3.bf16.msra.mxu0 %v7232_v11  ;;  %v7252_v1 = vld [vmem:[%s8521_s7] sm:$0xff]  }
 0x47b   : > { %v6402_v42 = vpop.f32.mrf.mxu0  ;;  %v6468_v29 = vpop.f32.mrf.mxu1  ;;  %6694 = vmatprep.subr.bf16.mxu0 %v7233_v24  ;;  %6864 = vmatpush3.bf16.msra.mxu1 %v7251_v9 }
 0x47c   : > { %v3039_v45 = vadd.f32 %v6422_v40, %v2859_v57  ;;  %6865 = vmatprep.subr.bf16.mxu1 %v8598_v17 }
 0x47e   : > { %6695 = vmatpush3.bf16.msra.mxu0 %v7234_v62 }
 0x47f   : > { %6696 = vmatprep.subr.bf16.mxu0 %v7235_v28  ;;  %6866 = vmatpush3.bf16.msra.mxu1 %v7252_v1 }
 0x482   : > { %6697 = vmatpush3.bf16.msra.mxu0 %v7236_v13 }
 0x483   : > { %6698 = vmatprep.subr.bf16.mxu0 %v7237_v38 }
 0x486   : > { %6699 = vmatpush3.bf16.msra.mxu0 %v7238_v56 }
 0x487   : > { %6700 = vmatprep.subr.bf16.mxu0 %v7239_v54 }
 0x48a   : > { %6701 = vmatpush3.bf16.msra.mxu0 %v7240_v44 }
 0x48b   : > { %6702 = vmatprep.subr.bf16.mxu0 %v7241_v20 }
 0x48e   : > { %6703 = vmatpush3.bf16.msra.mxu0 %v7242_v2 }
 0x48f   : > { %6704 = vmatprep.subr.bf16.mxu0 %v7243_v48 }
 0x492   : > { %6705 = vmatpush3.bf16.msra.mxu0 %v7244_v55 }
 0x495   : > { %v6442_v18 = vpop.f32.mrf.mxu0  ;;  %5294 = vmatmul.mubr.bf16.vlgmr.msra.gmra.mxu0 %v5161_v36 }
 0x496   : > { %v6508_v39 = vpop.f32.mrf.mxu1 }
 0x497   : > { %v6443_v21 = vpop.f32.mrf.mxu0 }
 0x498   : > { %v6444_v5 = vadd.f32 %v6443_v21, %v6442_v18  ;;  %v6509_v46 = vpop.f32.mrf.mxu1 }
 0x499   : > { %v6510_v43 = vadd.f32 %v6509_v46, %v6508_v39  ;;  %v6445_v61 = vpop.f32.mrf.mxu0 }
 0x49a   : > { %v3213_v12 = vadd.f32 %v6444_v5, %v3039_v45  ;;  %v6511_v0 = vpop.f32.mrf.mxu1 }
 0x49b   : > { %v6446_v37 = vpop.f32.mrf.mxu0 }
 0x49c   : > { %v6512_v8 = vpop.f32.mrf.mxu1  ;;  %v3387_v15 = vadd.f32 %v6466_v27, %v3213_v12 }
 0x4b5   : > { %v6486_v10 = vpop.f32.mrf.mxu0 }
 0x4b6   : > { %v6552_v41 = vpop.f32.mrf.mxu1 }
 0x4b7   : > { %v6487_v31 = vpop.f32.mrf.mxu0 }
 0x4b8   : > { %v6488_v40 = vadd.f32 %v6487_v31, %v6486_v10  ;;  %v6553_v49 = vpop.f32.mrf.mxu1  ;;  %v5302_v31 = vld [vmem:[%s8520_s6] sm:$0x1] }
 0x4b9   : > { %v6554_v30 = vadd.f32 %v6553_v49, %v6552_v41  ;;  %v6489_v4 = vpop.f32.mrf.mxu0 }
 0x4ba   : > { %v3561_v32 = vadd.f32 %v6488_v40, %v3387_v15  ;;  %v6555_v16 = vpop.f32.mrf.mxu1 }
 0x4bb   : > { %v6490_v52 = vpop.f32.mrf.mxu0 }
 0x4bc   : > { %v6556_v63 = vpop.f32.mrf.mxu1  ;;  %v3735_v33 = vadd.f32 %v6510_v43, %v3561_v32  ;;  %v5322_v52 = vld [vmem:[%s8522_s8] sm:$0x1] }
 0x4d5   : > { %v6530_v34 = vpop.f32.mrf.mxu0 }
 0x4d6   : > { %v6596_v25 = vpop.f32.mrf.mxu1 }
 0x4d7   : > { %v6531_v23 = vpop.f32.mrf.mxu0 }
 0x4d8   : > { %v6532_v50 = vadd.f32 %v6531_v23, %v6530_v34  ;;  %v6597_v7 = vpop.f32.mrf.mxu1 }
 0x4d9   : > { %v6598_v47 = vadd.f32 %v6597_v7, %v6596_v25  ;;  %v6533_v51 = vpop.f32.mrf.mxu0 }
 0x4da   : > { %v3909_v19 = vadd.f32 %v6532_v50, %v3735_v33  ;;  %v6599_v58 = vpop.f32.mrf.mxu1 }
 0x4db   : > { %v6534_v11 = vpop.f32.mrf.mxu0 }
 0x4dc   : > { %v6600_v26 = vpop.f32.mrf.mxu1  ;;  %v4083_v24 = vadd.f32 %v6554_v30, %v3909_v19 }
 0x4f5   : > { %v6574_v27 = vpop.f32.mrf.mxu0 }
 0x4f6   : > { %v6640_v3 = vpop.f32.mrf.mxu1 }
 0x4f7   : > { %v6575_v14 = vpop.f32.mrf.mxu0 }
 0x4f8   : > { %v6576_v57 = vadd.f32 %v6575_v14, %v6574_v27  ;;  %v6641_v62 = vpop.f32.mrf.mxu1 }
 0x4f9   : > { %v6642_v42 = vadd.f32 %v6641_v62, %v6640_v3  ;;  %v6577_v29 = vpop.f32.mrf.mxu0 }
 0x4fa   : > { %v4257_v28 = vadd.f32 %v6576_v57, %v4083_v24  ;;  %v6643_v45 = vpop.f32.mrf.mxu1 }
 0x4fb   : > { %v6578_v13 = vpop.f32.mrf.mxu0 }
 0x4fc   : > { %v6644_v38 = vpop.f32.mrf.mxu1  ;;  %v4431_v56 = vadd.f32 %v6598_v47, %v4257_v28 }
 0x515   : > { %v6618_v54 = vpop.f32.mrf.mxu0 }
 0x516   : > { %v6684_v44 = vpop.f32.mrf.mxu1 }
 0x517   : > { %v6619_v17 = vpop.f32.mrf.mxu0 }
 0x518   : > { %v6620_v20 = vadd.f32 %v6619_v17, %v6618_v54  ;;  %v6685_v2 = vpop.f32.mrf.mxu1 }
 0x519   : > { %v6621_v48 = vpop.f32.mrf.mxu0  ;;  %v6686_v8 = vadd.f32 %v6685_v2, %v6684_v44 }
 0x51a   : > { %v4605_v55 = vadd.f32 %v6620_v20, %v4431_v56  ;;  %v6687_v36 = vpop.f32.mrf.mxu1 }
 0x51b   : > { %v6622_v18 = vpop.f32.mrf.mxu0 }
 0x51c   : > { %v6688_v39 = vpop.f32.mrf.mxu1  ;;  %v4779_v21 = vadd.f32 %v6642_v42, %v4605_v55 }
 0x535   : > { %v6662_v5 = vpop.f32.mrf.mxu0 }
 0x537   : > { %v6663_v46 = vpop.f32.mrf.mxu0 }
 0x538   : > { %v6664_v12 = vadd.f32 %v6663_v46, %v6662_v5 }
 0x539   : > { %v6665_v43 = vpop.f32.mrf.mxu0 }
 0x53a   : > { %v4953_v0 = vadd.f32 %v6664_v12, %v4779_v21 }
 0x53b   : > { %v6666_v61 = vpop.f32.mrf.mxu0 }
 0x53c   : > { %v5127_v10 = vadd.f32 %v6686_v8, %v4953_v0 }
 0x555   : > { %v6706_v37 = vpop.f32.mrf.mxu0 }
 0x557   : > { %v6707_v15 = vpop.f32.mrf.mxu0 }
 0x558   : > { %v6708_v41 = vadd.f32 %v6707_v15, %v6706_v37 }
 0x559   : > { %v6709_v40 = vpop.f32.mrf.mxu0 }
 0x55a   : > { %v5301_v49 = vadd.f32 %v6708_v41, %v5127_v10 }
 0x55b   : > { %v6710_v30 = vpop.f32.mrf.mxu0 }
 0x55c   : > { %v5303_v4 = vadd.f32 %v5302_v31, %v5301_v49 }
 0x55e   : > { %v5304_v32 = vmax.f32 %v5303_v4, 0.0 }
 0x560   : > { %v5305_v16 = vpack.c.bf16 %v5304_v32, %v5304_v32 }
 0x562   : > { %6868 = vmatmul.mubr.bf16.vlgmr.msra.gmra.mxu1 %v5305_v16 }
 0x622   : > { %v5405_v22 = vpop.f32.mrf.mxu1 }
 0x623   : > { %v5406_v63 = vadd.f32 %v5405_v22, %v5322_v52 }
 0x624   : > { %v6869_v33 = vpop.f32.mrf.mxu1 }
 0x625   : > { %v5411_v6 = vsub.f32 0.0, %v5406_v63 }
 0x626   : > { %v5408_v53 = vpop.f32.mrf.mxu1 }
 0x627   : > { %v5412_v35 = vmul.f32 1.442695, %v5411_v6 }
 0x628   : > { %v6870_v59 = vpop.f32.mrf.mxu1 }
 0x629   : > { %7253 = vpow2.f32 %v5412_v35 }
 0x636   : > { %v7254_v34 = vpop.eup %7253 }
 0x637   : > { %v5414_v25 = vadd.f32 1.0, %v7254_v34 }
 0x639   : > { %7255 = vrcp.f32 %v5414_v25 }
 0x646   : > { %v7256_v23 = vpop.eup %7255 }
 0x647   : > { %5417 = vst [vmem:[%s343_s14] sm:$0x1] %v7256_v23 }
 0x648 PF: > { %s20_s30 = sadd.s32 1, %s7294_s30  }
 0x649   : > { %p17_p1 = scmp.ge.s32.totalorder %s20_s30, 4  }
 0x64b   :  { %19 = sbr.rel (!%p17_p1) target bundleno = 1 (0x1), region = 106 }
 0x650   :  { %5435 = vsyncpa [#allocation3], 1 }
 0x651   :  { %5437 = vsyncpa [#allocation3 + $0x1], 1 }

</bundles_post_ra>
